<compile_context>
chip_gen: v5e
topology: v5e:2x2
jax: 0.10.0
libtpu: 0.0.40
codegen_flags: <defaults>
</compile_context>

<pallas_src>
import functools

import jax
import jax.numpy as jnp
from jax.experimental import pallas as pl
from jax.experimental.pallas import tpu as pltpu

D_IMG_OUT = 768                 # CLIP vision_model pooler_output dim
D_TXT_OUT = 512                 # CLIP text pooler_output dim
D_CAT = D_IMG_OUT + D_TXT_OUT   # 1280 = input dim of every head
D_EMB = 512                     # CLIP projection dim (image_embeds / text_embeds)
H_CLS = 312                     # classifier hidden dim
BN_EPS = 1e-5                   # nn.BatchNorm1d default eps
N_GROUPS = 3                    # adjectives / nouns / concat head groups
H3 = N_GROUPS * H_CLS           # 936 = all three classifier hidden layers on lanes
N_OUT = 8                       # packed output lanes: [lin0..2, clf0..2, pad, pad]


def _heads_kernel(tb, img_out_ref, txt_out_ref,
                  w1_img_ref, w1_txt_ref, b1_ref, bng_ref, bnb_ref,
                  wlin_img_ref, wlin_txt_ref, w2_ref, bias_ref,
                  out_ref):
    """One grid step == `tb` text prompts; all 3 head groups batched on lanes."""
    f32 = jnp.float32
    img = img_out_ref[...]                                   # (B, 768) f32, t-invariant

    # Static unrolled loop over the tb prompts of this step: per-prompt working
    # set stays at ~(B, 936) f32 (bounded vreg pressure) while the weight DMA
    # for all tb prompts arrives as one large block per step.
    for p in range(tb):
        txt = txt_out_ref[p]                                 # (1, 512)

        # ---- classifier: Linear(1280,312) -> ReLU -> BatchNorm1d -> Linear(312,1)
        #      three groups batched on lanes (936); f32 weights, f32 accumulation.
        txt_row = jnp.dot(txt, w1_txt_ref[p], preferred_element_type=f32) + b1_ref[p]
        h = jnp.dot(img, w1_img_ref[p], preferred_element_type=f32) + txt_row
        h = jnp.maximum(h, 0.0)
        # BatchNorm1d default (training) mode: biased batch stats over the image batch.
        mu = jnp.mean(h, axis=0, keepdims=True)              # (1, 936)
        d = h - mu
        var = jnp.mean(d * d, axis=0, keepdims=True)
        hn = d * jax.lax.rsqrt(var + BN_EPS)
        hn = hn * bng_ref[p] + bnb_ref[p]

        # ---- lane-packed output: lanes 0-2 = Linear(1280,1) heads,
        #      lanes 3-5 = classifier heads (block-diag W2), lanes 6-7 = 0.
        out8 = jnp.dot(hn, w2_ref[p], preferred_element_type=f32)          # (B, 8)
        out8 = out8 + jnp.dot(img, wlin_img_ref[p], preferred_element_type=f32)
        out8 = out8 + jnp.dot(txt, wlin_txt_ref[p], preferred_element_type=f32)
        out_ref[p] = out8 + bias_ref[p]


def prepare_clip_head_params(params):
    """One-time repack of the per-(group, prompt) head weights into lane-dense,
    per-prompt slabs.  Call once at parameter-load time, NOT per forward."""
    f32 = jnp.float32
    c_w1 = params['c_w1']                                                  # (3, T, 312, 1280)
    T = c_w1.shape[1]

    w1 = jnp.transpose(c_w1, (1, 0, 2, 3)).reshape(T, H3, D_CAT).astype(f32)
    w1_imgT = jnp.swapaxes(w1[:, :, :D_IMG_OUT], 1, 2)                     # (T, 768, 936)
    w1_txtT = jnp.swapaxes(w1[:, :, D_IMG_OUT:], 1, 2)                     # (T, 512, 936)

    b1 = jnp.transpose(params['c_b1'], (1, 0, 2)).reshape(T, 1, H3).astype(f32)
    bng = jnp.transpose(params['bn_g'], (1, 0, 2)).reshape(T, 1, H3).astype(f32)
    bnb = jnp.transpose(params['bn_b'], (1, 0, 2)).reshape(T, 1, H3).astype(f32)

    # block-diagonal Linear(312,1) of the 3 groups -> output lanes 3..5
    w2_t = jnp.transpose(params['c_w2'], (1, 0, 2)).astype(f32)            # (T, 3, 312)
    sel = jnp.zeros((N_GROUPS, N_OUT), f32).at[
        jnp.arange(N_GROUPS), N_GROUPS + jnp.arange(N_GROUPS)].set(1.0)    # (3, 8)
    w2_blk = (w2_t[..., None] * sel[None, :, None, :]).reshape(T, H3, N_OUT)

    # Linear(1280,1) heads -> output lanes 0..2
    lw = jnp.transpose(params['lin_w'], (1, 2, 0)).astype(f32)             # (T, 1280, 3)
    wlin = jnp.zeros((T, D_CAT, N_OUT), f32).at[:, :, :N_GROUPS].set(lw)
    wlin_imgT = wlin[:, :D_IMG_OUT, :]                                     # (T, 768, 8)
    wlin_txtT = wlin[:, D_IMG_OUT:, :]                                     # (T, 512, 8)

    bias = jnp.zeros((T, 1, N_OUT), f32)
    bias = bias.at[:, 0, 0:N_GROUPS].set(jnp.transpose(params['lin_b'], (1, 0)))
    bias = bias.at[:, 0, N_GROUPS:2 * N_GROUPS].set(jnp.transpose(params['c_b2'], (1, 0)))

    return dict(w1_imgT=w1_imgT, w1_txtT=w1_txtT, b1=b1, bng=bng, bnb=bnb,
                wlin_imgT=wlin_imgT, wlin_txtT=wlin_txtT, w2_blk=w2_blk, bias=bias)


def _pick_tb(T, max_tb=4):
    """Largest prompts-per-step dividing T while keeping grid length >= 2."""
    best = 1
    for tb in range(2, max_tb + 1):
        if T % tb == 0 and T // tb >= 2:
            best = tb
    return best


@functools.partial(jax.jit, static_argnames=("max_tb",))
def clip_heads_forward(image_embed, text_embed, image_out, text_out,
                       packed, logit_scale_exp, *, max_tb=4):
    f32 = jnp.float32
    B = image_out.shape[0]
    T = text_out.shape[0]
    tb = _pick_tb(T, max_tb)
    grid_len = T // tb

    # ---- CLIP logits_per_image: t-invariant normalize + one small matmul (XLA) ----
    img_n = image_embed.astype(f32)
    img_n = img_n * jax.lax.rsqrt(jnp.sum(img_n * img_n, axis=-1, keepdims=True))
    txt_n = text_embed.astype(f32)
    txt_n = txt_n * jax.lax.rsqrt(jnp.sum(txt_n * txt_n, axis=-1, keepdims=True))
    logits = logit_scale_exp * jnp.dot(img_n, txt_n.T,
                                       precision=jax.lax.Precision.HIGHEST)   # (B, T)

    image_out_f = image_out.astype(f32)                                        # (B, 768)
    text_out3 = text_out.astype(f32)[:, None, :]                               # (T, 1, 512)

    in_specs = [
        pl.BlockSpec((B, D_IMG_OUT), lambda i: (0, 0)),                # image_out (t-invariant)
        pl.BlockSpec((tb, 1, D_TXT_OUT), lambda i: (i, 0, 0)),         # text_out
        pl.BlockSpec((tb, D_IMG_OUT, H3), lambda i: (i, 0, 0)),        # w1_imgT
        pl.BlockSpec((tb, D_TXT_OUT, H3), lambda i: (i, 0, 0)),        # w1_txtT
        pl.BlockSpec((tb, 1, H3), lambda i: (i, 0, 0)),                # b1
        pl.BlockSpec((tb, 1, H3), lambda i: (i, 0, 0)),                # bn gamma
        pl.BlockSpec((tb, 1, H3), lambda i: (i, 0, 0)),                # bn beta
        pl.BlockSpec((tb, D_IMG_OUT, N_OUT), lambda i: (i, 0, 0)),     # wlin_imgT
        pl.BlockSpec((tb, D_TXT_OUT, N_OUT), lambda i: (i, 0, 0)),     # wlin_txtT
        pl.BlockSpec((tb, H3, N_OUT), lambda i: (i, 0, 0)),            # w2 block-diag
        pl.BlockSpec((tb, 1, N_OUT), lambda i: (i, 0, 0)),             # fused bias
    ]
    out_specs = pl.BlockSpec((tb, B, N_OUT), lambda i: (i, 0, 0))
    out_shape = jax.ShapeDtypeStruct((T, B, N_OUT), f32)

    # VMEM budget: double-buffered per-step blocks + invariant image block + slack.
    per_step_bytes = 4 * tb * ((D_IMG_OUT + D_TXT_OUT) * (H3 + N_OUT)
                               + 3 * H3 + H3 * N_OUT + N_OUT
                               + D_TXT_OUT + B * N_OUT)
    vmem_limit = int(min(max(2 * per_step_bytes + 4 * B * D_IMG_OUT * 2 + (4 << 20),
                             16 << 20), 100 << 20))

    flops = int(2 * T * ((B + 1) * D_CAT * H3 + B * (H3 * N_OUT + D_CAT * N_OUT)))
    transcendentals = int(T * H3)
    bytes_accessed = int(4 * (T * (D_CAT * (H3 + N_OUT) + 3 * H3 + H3 * N_OUT + N_OUT
                                   + D_TXT_OUT + B * N_OUT)
                              + B * D_IMG_OUT))

    out = pl.pallas_call(
        functools.partial(_heads_kernel, tb),
        out_shape=out_shape,
        grid_spec=pltpu.PrefetchScalarGridSpec(
            num_scalar_prefetch=0,
            grid=(grid_len,),
            in_specs=in_specs,
            out_specs=out_specs),
        compiler_params=pltpu.CompilerParams(
            dimension_semantics=("parallel",),
            vmem_limit_bytes=vmem_limit),
        cost_estimate=pl.CostEstimate(flops=flops,
                                      transcendentals=transcendentals,
                                      bytes_accessed=bytes_accessed),
    )(image_out_f, text_out3,
      packed['w1_imgT'], packed['w1_txtT'], packed['b1'], packed['bng'], packed['bnb'],
      packed['wlin_imgT'], packed['wlin_txtT'], packed['w2_blk'], packed['bias'])

    # Unpack: lanes 0..2 = Linear heads, 3..5 = classifier heads; (T, B) -> (B, T).
    lin = jnp.transpose(out[:, :, 0:N_GROUPS], (2, 1, 0))                  # (3, B, T)
    clf = jnp.transpose(out[:, :, N_GROUPS:2 * N_GROUPS], (2, 1, 0))       # (3, B, T)
    classifications = [lin[0], lin[1], lin[2], clf[0], clf[1], clf[2]]
    return classifications, logits


def _reference(image_embed, text_embed, image_out, text_out, params, scale):
    hi = jax.lax.Precision.HIGHEST
    img_n = image_embed / jnp.linalg.norm(image_embed, axis=-1, keepdims=True)
    txt_n = text_embed / jnp.linalg.norm(text_embed, axis=-1, keepdims=True)
    logits = scale * jnp.dot(img_n, txt_n.T, precision=hi)
    B, T = image_out.shape[0], text_out.shape[0]
    lin_all, clf_all = [], []
    for g in range(N_GROUPS):
        lin_cols, clf_cols = [], []
        for t in range(T):
            feat = jnp.concatenate(
                [image_out, jnp.broadcast_to(text_out[t], (B, D_TXT_OUT))], axis=-1)
            lin = jnp.dot(feat, params['lin_w'][g, t], precision=hi) + params['lin_b'][g, t]
            h = jnp.dot(feat, params['c_w1'][g, t].T, precision=hi) + params['c_b1'][g, t]
            h = jnp.maximum(h, 0.0)
            mu = h.mean(axis=0)
            var = ((h - mu) ** 2).mean(axis=0)
            hn = (h - mu) / jnp.sqrt(var + BN_EPS)
            hn = hn * params['bn_g'][g, t] + params['bn_b'][g, t]
            clf = jnp.dot(hn, params['c_w2'][g, t], precision=hi) + params['c_b2'][g, t]
            lin_cols.append(lin)
            clf_cols.append(clf)
        lin_all.append(jnp.stack(lin_cols, axis=1))
        clf_all.append(jnp.stack(clf_cols, axis=1))
    return ([lin_all[0], lin_all[1], lin_all[2],
             clf_all[0], clf_all[1], clf_all[2]], logits)


if __name__ == "__main__":
    B, T = 8, 2   # B images, T prompts (adjectives = nouns = concat = T heads)
    keys = jax.random.split(jax.random.PRNGKey(0), 10)

    # TODO(synk): the pretrained CLIPModel / CLIPProcessor backbone (ViT on pixel_values,
    # tokenizer, hacked newCLIPTextTransformer) has no clean Pallas equivalent here; its
    # four pooled outputs are synthesized deterministically.
    image_embed = jax.random.normal(keys[0], (B, D_EMB), jnp.float32)
    text_embed = jax.random.normal(keys[1], (T, D_EMB), jnp.float32)
    image_out = jax.random.normal(keys[2], (B, D_IMG_OUT), jnp.float32)
    text_out = jax.random.normal(keys[3], (T, D_TXT_OUT), jnp.float32)

    params = {
        'lin_w': 0.02 * jax.random.normal(keys[4], (N_GROUPS, T, D_CAT), jnp.float32),
        'lin_b': 0.01 * jax.random.normal(keys[5], (N_GROUPS, T), jnp.float32),
        'c_w1': 0.02 * jax.random.normal(keys[6], (N_GROUPS, T, H_CLS, D_CAT), jnp.float32),
        'c_b1': 0.01 * jax.random.normal(keys[7], (N_GROUPS, T, H_CLS), jnp.float32),
        'bn_g': jnp.ones((N_GROUPS, T, H_CLS), jnp.float32),   # BatchNorm1d init
        'bn_b': jnp.zeros((N_GROUPS, T, H_CLS), jnp.float32),
        'c_w2': 0.05 * jax.random.normal(keys[8], (N_GROUPS, T, H_CLS), jnp.float32),
        'c_b2': 0.01 * jax.random.normal(keys[9], (N_GROUPS, T), jnp.float32),
    }
    logit_scale_exp = float(jnp.exp(jnp.log(1.0 / 0.07)))   # CLIP default logit_scale.exp()

    # One-time parameter repack (hoisted out of the per-call hot path).
    packed = prepare_clip_head_params(params)
    packed = {k: jax.block_until_ready(v) for k, v in packed.items()}

    classifications, logits = clip_heads_forward(
        image_embed, text_embed, image_out, text_out, packed, logit_scale_exp)
    jax.block_until_ready(logits)
    for c in classifications:
        jax.block_until_ready(c)

    ref_cls, ref_logits = _reference(
        image_embed, text_embed, image_out, text_out, params, logit_scale_exp)
    assert logits.shape == (B, T)
    assert jnp.allclose(logits, ref_logits, rtol=1e-2, atol=1e-2)
    for got, want in zip(classifications, ref_cls):
        assert got.shape == (B, T)
        assert jnp.allclose(got, want, rtol=1e-2, atol=1e-2)

    print("KERNEL_OK")
</pallas_src>

<mosaic_0001>
module attributes {stable_mosaic.version = 11 : i64} {
  func.func @_heads_kernel(%arg0: i32, %arg1: memref<8x768xf32, #tpu.memory_space<vmem>>, %arg2: memref<1x1x512xf32, #tpu.memory_space<vmem>>, %arg3: memref<1x768x936xf32, #tpu.memory_space<vmem>>, %arg4: memref<1x512x936xf32, #tpu.memory_space<vmem>>, %arg5: memref<1x1x936xf32, #tpu.memory_space<vmem>>, %arg6: memref<1x1x936xf32, #tpu.memory_space<vmem>>, %arg7: memref<1x1x936xf32, #tpu.memory_space<vmem>>, %arg8: memref<1x768x8xf32, #tpu.memory_space<vmem>>, %arg9: memref<1x512x8xf32, #tpu.memory_space<vmem>>, %arg10: memref<1x936x8xf32, #tpu.memory_space<vmem>>, %arg11: memref<1x1x8xf32, #tpu.memory_space<vmem>>, %arg12: memref<1x8x8xf32, #tpu.memory_space<vmem>>) attributes {dimension_semantics = [#tpu.dimension_semantics<parallel>], iteration_bounds = array<i64: 2>, scalar_prefetch = 0 : i64, scratch_operands = 0 : i64, tpu.core_type = #tpu.core_type<tc>, window_params = [{pipeline_mode = #tpu.pipeline_mode<synchronous>, transform_indices = @transform_0, window_bounds = array<i64: 8, 768>}, {transform_indices = @transform_1, window_bounds = array<i64: 1, 1, 512>}, {transform_indices = @transform_2, window_bounds = array<i64: 1, 768, 936>}, {transform_indices = @transform_3, window_bounds = array<i64: 1, 512, 936>}, {transform_indices = @transform_4, window_bounds = array<i64: 1, 1, 936>}, {transform_indices = @transform_5, window_bounds = array<i64: 1, 1, 936>}, {transform_indices = @transform_6, window_bounds = array<i64: 1, 1, 936>}, {transform_indices = @transform_7, window_bounds = array<i64: 1, 768, 8>}, {transform_indices = @transform_8, window_bounds = array<i64: 1, 512, 8>}, {transform_indices = @transform_9, window_bounds = array<i64: 1, 936, 8>}, {transform_indices = @transform_10, window_bounds = array<i64: 1, 1, 8>}, {transform_indices = @transform_11, window_bounds = array<i64: 1, 8, 8>}]} {
    %c0 = arith.constant 0 : index
    %c0_0 = arith.constant 0 : index
    %0 = vector.load %arg1[%c0, %c0_0] : memref<8x768xf32, #tpu.memory_space<vmem>>, vector<8x768xf32>
    %c0_1 = arith.constant 0 : index
    %c0_2 = arith.constant 0 : index
    %c0_3 = arith.constant 0 : index
    %1 = vector.load %arg2[%c0_1, %c0_2, %c0_3] : memref<1x1x512xf32, #tpu.memory_space<vmem>>, vector<1x1x512xf32>
    %2 = vector.shape_cast %1 : vector<1x1x512xf32> to vector<1x512xf32>
    %c0_4 = arith.constant 0 : index
    %c0_5 = arith.constant 0 : index
    %c0_6 = arith.constant 0 : index
    %3 = vector.load %arg4[%c0_4, %c0_5, %c0_6] : memref<1x512x936xf32, #tpu.memory_space<vmem>>, vector<1x512x936xf32>
    %4 = vector.shape_cast %3 : vector<1x512x936xf32> to vector<512x936xf32>
    %cst = arith.constant dense<0.000000e+00> : vector<1x936xf32>
    %5 = tpu.matmul %2, %4, %cst {dimension_numbers = #tpu.dot_dimension_numbers<[1], [0], [0], [1], [0, 0, 1, 1], [], []>} : vector<1x512xf32>, vector<512x936xf32>, vector<1x936xf32> -> vector<1x936xf32>
    %c0_7 = arith.constant 0 : index
    %c0_8 = arith.constant 0 : index
    %c0_9 = arith.constant 0 : index
    %6 = vector.load %arg5[%c0_7, %c0_8, %c0_9] : memref<1x1x936xf32, #tpu.memory_space<vmem>>, vector<1x1x936xf32>
    %7 = vector.shape_cast %6 : vector<1x1x936xf32> to vector<1x936xf32>
    %8 = arith.addf %5, %7 : vector<1x936xf32>
    %c0_10 = arith.constant 0 : index
    %c0_11 = arith.constant 0 : index
    %c0_12 = arith.constant 0 : index
    %9 = vector.load %arg3[%c0_10, %c0_11, %c0_12] : memref<1x768x936xf32, #tpu.memory_space<vmem>>, vector<1x768x936xf32>
    %10 = vector.shape_cast %9 : vector<1x768x936xf32> to vector<768x936xf32>
    %cst_13 = arith.constant dense<0.000000e+00> : vector<8x936xf32>
    %11 = tpu.matmul %0, %10, %cst_13 {dimension_numbers = #tpu.dot_dimension_numbers<[1], [0], [0], [1], [0, 0, 1, 1], [], []>} : vector<8x768xf32>, vector<768x936xf32>, vector<8x936xf32> -> vector<8x936xf32>
    %12 = vector.broadcast %8 : vector<1x936xf32> to vector<8x936xf32>
    %13 = arith.addf %11, %12 : vector<8x936xf32>
    %cst_14 = arith.constant 0.000000e+00 : f32
    %14 = vector.broadcast %cst_14 : f32 to vector<8x936xf32>
    %15 = arith.maximumf %13, %14 : vector<8x936xf32>
    %cst_15 = arith.constant dense<0.000000e+00> : vector<936xf32>
    %16 = vector.multi_reduction <add>, %15, %cst_15 [0] : vector<8x936xf32> to vector<936xf32>
    %17 = vector.shape_cast %16 : vector<936xf32> to vector<1x936xf32>
    %cst_16 = arith.constant 8.000000e+00 : f32
    %18 = vector.broadcast %cst_16 : f32 to vector<1x936xf32>
    %19 = arith.divf %17, %18 : vector<1x936xf32>
    %20 = vector.broadcast %19 : vector<1x936xf32> to vector<8x936xf32>
    %21 = arith.subf %15, %20 : vector<8x936xf32>
    %22 = arith.mulf %21, %21 : vector<8x936xf32>
    %cst_17 = arith.constant dense<0.000000e+00> : vector<936xf32>
    %23 = vector.multi_reduction <add>, %22, %cst_17 [0] : vector<8x936xf32> to vector<936xf32>
    %24 = vector.shape_cast %23 : vector<936xf32> to vector<1x936xf32>
    %cst_18 = arith.constant 8.000000e+00 : f32
    %25 = vector.broadcast %cst_18 : f32 to vector<1x936xf32>
    %26 = arith.divf %24, %25 : vector<1x936xf32>
    %cst_19 = arith.constant 9.99999974E-6 : f32
    %27 = vector.broadcast %cst_19 : f32 to vector<1x936xf32>
    %28 = arith.addf %26, %27 : vector<1x936xf32>
    %29 = math.rsqrt %28 : vector<1x936xf32>
    %30 = vector.broadcast %29 : vector<1x936xf32> to vector<8x936xf32>
    %31 = arith.mulf %21, %30 : vector<8x936xf32>
    %c0_20 = arith.constant 0 : index
    %c0_21 = arith.constant 0 : index
    %c0_22 = arith.constant 0 : index
    %32 = vector.load %arg6[%c0_20, %c0_21, %c0_22] : memref<1x1x936xf32, #tpu.memory_space<vmem>>, vector<1x1x936xf32>
    %33 = vector.shape_cast %32 : vector<1x1x936xf32> to vector<1x936xf32>
    %34 = vector.broadcast %33 : vector<1x936xf32> to vector<8x936xf32>
    %35 = arith.mulf %31, %34 : vector<8x936xf32>
    %c0_23 = arith.constant 0 : index
    %c0_24 = arith.constant 0 : index
    %c0_25 = arith.constant 0 : index
    %36 = vector.load %arg7[%c0_23, %c0_24, %c0_25] : memref<1x1x936xf32, #tpu.memory_space<vmem>>, vector<1x1x936xf32>
    %37 = vector.shape_cast %36 : vector<1x1x936xf32> to vector<1x936xf32>
    %38 = vector.broadcast %37 : vector<1x936xf32> to vector<8x936xf32>
    %39 = arith.addf %35, %38 : vector<8x936xf32>
    %c0_26 = arith.constant 0 : index
    %c0_27 = arith.constant 0 : index
    %c0_28 = arith.constant 0 : index
    %40 = vector.load %arg10[%c0_26, %c0_27, %c0_28] : memref<1x936x8xf32, #tpu.memory_space<vmem>>, vector<1x936x8xf32>
    %41 = vector.shape_cast %40 : vector<1x936x8xf32> to vector<936x8xf32>
    %cst_29 = arith.constant dense<0.000000e+00> : vector<8x8xf32>
    %42 = tpu.matmul %39, %41, %cst_29 {dimension_numbers = #tpu.dot_dimension_numbers<[1], [0], [0], [1], [0, 0, 1, 1], [], []>} : vector<8x936xf32>, vector<936x8xf32>, vector<8x8xf32> -> vector<8x8xf32>
    %c0_30 = arith.constant 0 : index
    %c0_31 = arith.constant 0 : index
    %c0_32 = arith.constant 0 : index
    %43 = vector.load %arg8[%c0_30, %c0_31, %c0_32] : memref<1x768x8xf32, #tpu.memory_space<vmem>>, vector<1x768x8xf32>
    %44 = vector.shape_cast %43 : vector<1x768x8xf32> to vector<768x8xf32>
    %cst_33 = arith.constant dense<0.000000e+00> : vector<8x8xf32>
    %45 = tpu.matmul %0, %44, %cst_33 {dimension_numbers = #tpu.dot_dimension_numbers<[1], [0], [0], [1], [0, 0, 1, 1], [], []>} : vector<8x768xf32>, vector<768x8xf32>, vector<8x8xf32> -> vector<8x8xf32>
    %46 = arith.addf %42, %45 : vector<8x8xf32>
    %c0_34 = arith.constant 0 : index
    %c0_35 = arith.constant 0 : index
    %c0_36 = arith.constant 0 : index
    %47 = vector.load %arg9[%c0_34, %c0_35, %c0_36] : memref<1x512x8xf32, #tpu.memory_space<vmem>>, vector<1x512x8xf32>
    %48 = vector.shape_cast %47 : vector<1x512x8xf32> to vector<512x8xf32>
    %cst_37 = arith.constant dense<0.000000e+00> : vector<1x8xf32>
    %49 = tpu.matmul %2, %48, %cst_37 {dimension_numbers = #tpu.dot_dimension_numbers<[1], [0], [0], [1], [0, 0, 1, 1], [], []>} : vector<1x512xf32>, vector<512x8xf32>, vector<1x8xf32> -> vector<1x8xf32>
    %50 = vector.broadcast %49 : vector<1x8xf32> to vector<8x8xf32>
    %51 = arith.addf %46, %50 : vector<8x8xf32>
    %c0_38 = arith.constant 0 : index
    %c0_39 = arith.constant 0 : index
    %c0_40 = arith.constant 0 : index
    %52 = vector.load %arg11[%c0_38, %c0_39, %c0_40] : memref<1x1x8xf32, #tpu.memory_space<vmem>>, vector<1x1x8xf32>
    %53 = vector.shape_cast %52 : vector<1x1x8xf32> to vector<1x8xf32>
    %54 = vector.broadcast %53 : vector<1x8xf32> to vector<8x8xf32>
    %55 = arith.addf %51, %54 : vector<8x8xf32>
    %c0_41 = arith.constant 0 : index
    %c0_42 = arith.constant 0 : index
    %c0_43 = arith.constant 0 : index
    %56 = vector.load %arg12[%c0_41, %c0_42, %c0_43] : memref<1x8x8xf32, #tpu.memory_space<vmem>>, vector<1x8x8xf32>
    %57 = vector.shape_cast %56 : vector<1x8x8xf32> to vector<8x8xf32>
    %58 = vector.shape_cast %55 : vector<8x8xf32> to vector<1x8x8xf32>
    tpu.vector_store %arg12[%c0_41, %c0_42, %c0_43], %58 {strides = array<i32>} : memref<1x8x8xf32, #tpu.memory_space<vmem>>, vector<1x8x8xf32>,
    return
  }
  func.func @transform_0(%arg0: i32) -> (i32, i32) {
    %c0_i32 = arith.constant 0 : i32
    %c0_i32_0 = arith.constant 0 : i32
    %c0_i32_1 = arith.constant 0 : i32
    return %c0_i32, %c0_i32_0 : i32, i32
  }
  func.func @transform_1(%arg0: i32) -> (i32, i32, i32) {
    %c0_i32 = arith.constant 0 : i32
    %c0_i32_0 = arith.constant 0 : i32
    %c0_i32_1 = arith.constant 0 : i32
    return %arg0, %c0_i32, %c0_i32_0 : i32, i32, i32
  }
  func.func @transform_2(%arg0: i32) -> (i32, i32, i32) {
    %c0_i32 = arith.constant 0 : i32
    %c0_i32_0 = arith.constant 0 : i32
    %c0_i32_1 = arith.constant 0 : i32
    return %arg0, %c0_i32, %c0_i32_0 : i32, i32, i32
  }
  func.func @transform_3(%arg0: i32) -> (i32, i32, i32) {
    %c0_i32 = arith.constant 0 : i32
    %c0_i32_0 = arith.constant 0 : i32
    %c0_i32_1 = arith.constant 0 : i32
    return %arg0, %c0_i32, %c0_i32_0 : i32, i32, i32
  }
  func.func @transform_4(%arg0: i32) -> (i32, i32, i32) {
    %c0_i32 = arith.constant 0 : i32
    %c0_i32_0 = arith.constant 0 : i32
    %c0_i32_1 = arith.constant 0 : i32
    return %arg0, %c0_i32, %c0_i32_0 : i32, i32, i32
  }
  func.func @transform_5(%arg0: i32) -> (i32, i32, i32) {
    %c0_i32 = arith.constant 0 : i32
    %c0_i32_0 = arith.constant 0 : i32
    %c0_i32_1 = arith.constant 0 : i32
    return %arg0, %c0_i32, %c0_i32_0 : i32, i32, i32
  }
  func.func @transform_6(%arg0: i32) -> (i32, i32, i32) {
    %c0_i32 = arith.constant 0 : i32
    %c0_i32_0 = arith.constant 0 : i32
    %c0_i32_1 = arith.constant 0 : i32
    return %arg0, %c0_i32, %c0_i32_0 : i32, i32, i32
  }
  func.func @transform_7(%arg0: i32) -> (i32, i32, i32) {
    %c0_i32 = arith.constant 0 : i32
    %c0_i32_0 = arith.constant 0 : i32
    %c0_i32_1 = arith.constant 0 : i32
    return %arg0, %c0_i32, %c0_i32_0 : i32, i32, i32
  }
  func.func @transform_8(%arg0: i32) -> (i32, i32, i32) {
    %c0_i32 = arith.constant 0 : i32
    %c0_i32_0 = arith.constant 0 : i32
    %c0_i32_1 = arith.constant 0 : i32
    return %arg0, %c0_i32, %c0_i32_0 : i32, i32, i32
  }
  func.func @transform_9(%arg0: i32) -> (i32, i32, i32) {
    %c0_i32 = arith.constant 0 : i32
    %c0_i32_0 = arith.constant 0 : i32
    %c0_i32_1 = arith.constant 0 : i32
    return %arg0, %c0_i32, %c0_i32_0 : i32, i32, i32
  }
  func.func @transform_10(%arg0: i32) -> (i32, i32, i32) {
    %c0_i32 = arith.constant 0 : i32
    %c0_i32_0 = arith.constant 0 : i32
    %c0_i32_1 = arith.constant 0 : i32
    return %arg0, %c0_i32, %c0_i32_0 : i32, i32, i32
  }
  func.func @transform_11(%arg0: i32) -> (i32, i32, i32) {
    %c0_i32 = arith.constant 0 : i32
    %c0_i32_0 = arith.constant 0 : i32
    %c0_i32_1 = arith.constant 0 : i32
    return %arg0, %c0_i32, %c0_i32_0 : i32, i32, i32
  }
}

</mosaic_0001>

<bundles_post_ra>
// kernel: clip_heads_forward.1
= control target key start
LH: loop header
LB: loop body
LE: loop exit
PB: predicated region body
PF: predicated region fallthrough
CT: control target
= control target key end

     0   :  { %s4712_s17 = smov 0   ;;  %s6862_s0 = inlined_call_operand.vmem [shape: f32[8,768], index: 0, kind: input, shape index: {}]   ;;  %s6863_s1 = inlined_call_operand.vmem [shape: f32[2,1,512], index: 1, kind: input, shape index: {}]   ;;  %s6864_s2 = inlined_call_operand.vmem [shape: f32[2,768,936], index: 2, kind: input, shape index: {}]   ;;  %s6865_s3 = inlined_call_operand.vmem [shape: f32[2,512,936], index: 3, kind: input, shape index: {}]   ;;  %s6866_s4 = inlined_call_operand.vmem [shape: f32[2,1,936], index: 4, kind: input, shape index: {}]   ;;  %s6867_s5 = inlined_call_operand.vmem [shape: f32[2,1,936], index: 5, kind: input, shape index: {}]   ;;  %s6868_s6 = inlined_call_operand.vmem [shape: f32[2,1,936], index: 6, kind: input, shape index: {}]   ;;  %s6869_s7 = inlined_call_operand.vmem [shape: f32[2,768,8], index: 7, kind: input, shape index: {}]   ;;  %s6870_s8 = inlined_call_operand.vmem [shape: f32[2,512,8], index: 8, kind: input, shape index: {}]   ;;  %s6871_s9 = inlined_call_operand.vmem [shape: f32[2,936,8], index: 9, kind: input, shape index: {}]   ;;  %s6872_s10 = inlined_call_operand.vmem [shape: f32[2,1,8], index: 10, kind: input, shape index: {}]   ;;  %s6873_s11 = inlined_call_operand.vmem [shape: f32[2,8,8], index: 11, kind: output, shape index: {}]  }
   0x1 LB: > { %s4570_s18 = sadd.s32 4294967295, %s4649_s17   ;;  %p4574_p0 = scmp.ge.s32.totalorder %s4649_s17, 1  ;;  %s4649_s17 = sphi %s4712_s17, %s21_s17  }
   0x2   : > { %p421_p1 = scmp.lt.s32.totalorder %s4649_s17, 3 }
   0x4   : > { %p422_p2 = pnand %p4574_p0, %p421_p1 }
   0x5   : > { %p499_p3 = scmp.lt.s32.totalorder (!%p422_p2), %s4570_s18, 1 }
   0x6   : > { %425 = sbr.rel (%p422_p2) target bundleno = 1109 (0x455), region = 64 }
   0xb   : > { %s6887_s18 = smov (!%p499_p3, %s4570_s18), 1 }
   0xc   : > { %s4590_s19 = sshll.u32 %s6887_s18, 12  ;;  %s4575_s23 = sshll.u32 %s6887_s18, 2 }
   0xd   : > { %s4726_s22 = scalar_lea.vmem %s6865_s3, %s4590_s19  ;;  %s502_s26 = scalar_lea.vmem %s6863_s1, %s4575_s23 }
   0xe   : > { %v674_v0 = vld [vmem:[%s4726_s22 + $0x3c0] sm:$0xff]  ;;  %s5103_s27 = sshll.u32 %s6887_s18, 3  ;;  %s4592_s12 = smul.u32 6144, %s6887_s18 }
   0xf   : > { %v802_v1 = vld [vmem:[%s4726_s22 + $0x7c0] sm:$0xff]  ;;  %1093 = vmatpush.msra.mxu0 %v674_v0  ;;  %v675_v0 = vld [vmem:[%s4726_s22 + $0x3c8] sm:$0xff]  ;;  %s5115_s30 = scalar_lea.vmem %s6866_s4, %s5103_s27  ;;  %s4593_s24 = smul.u32 768, %s6887_s18 }
  0x10   : > { %v930_v2 = vld [vmem:[%s4726_s22 + $0xbc0] sm:$0xff]  ;;  %1113 = vmatpush.msra.mxu1 %v802_v1  ;;  %v803_v1 = vld [vmem:[%s4726_s22 + $0x7c8] sm:$0xff]  ;;  %s5297_s15 = scalar_lea.vmem %s6864_s2, %s4592_s12  ;;  %s6490_s16 = scalar_lea.vmem %s6867_s5, %s5103_s27 }
  0x11   : > { %v1058_v3 = vld [vmem:[%s4726_s22 + $0xfc0] sm:$0xff]  ;;  %1133 = vmatpush.msra.mxu2 %v930_v2  ;;  %v931_v2 = vld [vmem:[%s4726_s22 + $0xbc8] sm:$0xff]  ;;  %s6307_s28 = scalar_lea.vmem %s6869_s7, %s4593_s24  ;;  %s524_s21 = scalar_lea.vmem %s6868_s6, %s5103_s27 }
  0x12   : > { %v666_v4 = vld [vmem:[%s4726_s22 + $0x380] sm:$0xff]  ;;  %1153 = vmatpush.msra.mxu3 %v1058_v3  ;;  %v1059_v3 = vld [vmem:[%s4726_s22 + $0xfc8] sm:$0xff]  ;;  %s4591_s20 = sshll.u32 %s6887_s18, 9  ;;  %s542_s25 = scalar_lea.vmem %s6872_s10, %s6887_s18 }
  0x13   : > { %v794_v5 = vld [vmem:[%s4726_s22 + $0x780] sm:$0xff]  ;;  %1094 = vmatpush.msra.mxu0 %v666_v4  ;;  %v667_v4 = vld [vmem:[%s4726_s22 + $0x388] sm:$0xff]  ;;  %s6757_s23 = scalar_lea.vmem %s6870_s8, %s4591_s20 }
  0x14   : > { %v922_v6 = vld [vmem:[%s4726_s22 + $0xb80] sm:$0xff]  ;;  %1114 = vmatpush.msra.mxu1 %v794_v5  ;;  %v795_v5 = vld [vmem:[%s4726_s22 + $0x788] sm:$0xff] }
  0x15   : > { %v1050_v7 = vld [vmem:[%s4726_s22 + $0xf80] sm:$0xff]  ;;  %1134 = vmatpush.msra.mxu2 %v922_v6  ;;  %v923_v6 = vld [vmem:[%s4726_s22 + $0xb88] sm:$0xff] }
  0x16   : > { %v658_v8 = vld [vmem:[%s4726_s22 + $0x340] sm:$0xff]  ;;  %1154 = vmatpush.msra.mxu3 %v1050_v7  ;;  %v1051_v7 = vld [vmem:[%s4726_s22 + $0xf88] sm:$0xff] }
  0x17   : > { %v786_v9 = vld [vmem:[%s4726_s22 + $0x740] sm:$0xff]  ;;  %1095 = vmatpush.msra.mxu0 %v658_v8  ;;  %v659_v8 = vld [vmem:[%s4726_s22 + $0x348] sm:$0xff] }
  0x18   : > { %v914_v10 = vld [vmem:[%s4726_s22 + $0xb40] sm:$0xff]  ;;  %1115 = vmatpush.msra.mxu1 %v786_v9  ;;  %v787_v9 = vld [vmem:[%s4726_s22 + $0x748] sm:$0xff] }
  0x19   : > { %v1042_v11 = vld [vmem:[%s4726_s22 + $0xf40] sm:$0xff]  ;;  %1135 = vmatpush.msra.mxu2 %v914_v10  ;;  %v915_v10 = vld [vmem:[%s4726_s22 + $0xb48] sm:$0xff] }
  0x1a   : > { %v650_v12 = vld [vmem:[%s4726_s22 + $0x300] sm:$0xff]  ;;  %1155 = vmatpush.msra.mxu3 %v1042_v11  ;;  %v1043_v11 = vld [vmem:[%s4726_s22 + $0xf48] sm:$0xff] }
  0x1b   : > { %v778_v13 = vld [vmem:[%s4726_s22 + $0x700] sm:$0xff]  ;;  %1096 = vmatpush.msra.mxu0 %v650_v12  ;;  %v651_v12 = vld [vmem:[%s4726_s22 + $0x308] sm:$0xff] }
  0x1c   : > { %v906_v14 = vld [vmem:[%s4726_s22 + $0xb00] sm:$0xff]  ;;  %1116 = vmatpush.msra.mxu1 %v778_v13  ;;  %v779_v13 = vld [vmem:[%s4726_s22 + $0x708] sm:$0xff] }
  0x1d   : > { %v1034_v15 = vld [vmem:[%s4726_s22 + $0xf00] sm:$0xff]  ;;  %1136 = vmatpush.msra.mxu2 %v906_v14  ;;  %v907_v14 = vld [vmem:[%s4726_s22 + $0xb08] sm:$0xff] }
  0x1e   : > { %v642_v16 = vld [vmem:[%s4726_s22 + $0x2c0] sm:$0xff]  ;;  %1156 = vmatpush.msra.mxu3 %v1034_v15  ;;  %v1035_v15 = vld [vmem:[%s4726_s22 + $0xf08] sm:$0xff] }
  0x1f   : > { %v770_v17 = vld [vmem:[%s4726_s22 + $0x6c0] sm:$0xff]  ;;  %1097 = vmatpush.msra.mxu0 %v642_v16  ;;  %v643_v16 = vld [vmem:[%s4726_s22 + $0x2c8] sm:$0xff] }
  0x20   : > { %v898_v18 = vld [vmem:[%s4726_s22 + $0xac0] sm:$0xff]  ;;  %1117 = vmatpush.msra.mxu1 %v770_v17  ;;  %v771_v17 = vld [vmem:[%s4726_s22 + $0x6c8] sm:$0xff] }
  0x21   : > { %v1026_v19 = vld [vmem:[%s4726_s22 + $0xec0] sm:$0xff]  ;;  %1137 = vmatpush.msra.mxu2 %v898_v18  ;;  %v899_v18 = vld [vmem:[%s4726_s22 + $0xac8] sm:$0xff] }
  0x22   : > { %v634_v20 = vld [vmem:[%s4726_s22 + $0x280] sm:$0xff]  ;;  %1157 = vmatpush.msra.mxu3 %v1026_v19  ;;  %v1027_v19 = vld [vmem:[%s4726_s22 + $0xec8] sm:$0xff] }
  0x23   : > { %v762_v21 = vld [vmem:[%s4726_s22 + $0x680] sm:$0xff]  ;;  %1098 = vmatpush.msra.mxu0 %v634_v20  ;;  %v635_v20 = vld [vmem:[%s4726_s22 + $0x288] sm:$0xff] }
  0x24   : > { %v890_v22 = vld [vmem:[%s4726_s22 + $0xa80] sm:$0xff]  ;;  %1118 = vmatpush.msra.mxu1 %v762_v21  ;;  %v763_v21 = vld [vmem:[%s4726_s22 + $0x688] sm:$0xff] }
  0x25   : > { %v1018_v23 = vld [vmem:[%s4726_s22 + $0xe80] sm:$0xff]  ;;  %1138 = vmatpush.msra.mxu2 %v890_v22  ;;  %v891_v22 = vld [vmem:[%s4726_s22 + $0xa88] sm:$0xff] }
  0x26   : > { %v626_v24 = vld [vmem:[%s4726_s22 + $0x240] sm:$0xff]  ;;  %1158 = vmatpush.msra.mxu3 %v1018_v23  ;;  %v1019_v23 = vld [vmem:[%s4726_s22 + $0xe88] sm:$0xff] }
  0x27   : > { %v754_v25 = vld [vmem:[%s4726_s22 + $0x640] sm:$0xff]  ;;  %1099 = vmatpush.msra.mxu0 %v626_v24  ;;  %v627_v24 = vld [vmem:[%s4726_s22 + $0x248] sm:$0xff] }
  0x28   : > { %v882_v26 = vld [vmem:[%s4726_s22 + $0xa40] sm:$0xff]  ;;  %1119 = vmatpush.msra.mxu1 %v754_v25  ;;  %v755_v25 = vld [vmem:[%s4726_s22 + $0x648] sm:$0xff] }
  0x29   : > { %v1010_v27 = vld [vmem:[%s4726_s22 + $0xe40] sm:$0xff]  ;;  %1139 = vmatpush.msra.mxu2 %v882_v26  ;;  %v883_v26 = vld [vmem:[%s4726_s22 + $0xa48] sm:$0xff] }
  0x2a   : > { %v618_v28 = vld [vmem:[%s4726_s22 + $0x200] sm:$0xff]  ;;  %1159 = vmatpush.msra.mxu3 %v1010_v27  ;;  %v1011_v27 = vld [vmem:[%s4726_s22 + $0xe48] sm:$0xff] }
  0x2b   : > { %v746_v29 = vld [vmem:[%s4726_s22 + $0x600] sm:$0xff]  ;;  %1100 = vmatpush.msra.mxu0 %v618_v28  ;;  %v619_v28 = vld [vmem:[%s4726_s22 + $0x208] sm:$0xff] }
  0x2c   : > { %v874_v30 = vld [vmem:[%s4726_s22 + $0xa00] sm:$0xff]  ;;  %1120 = vmatpush.msra.mxu1 %v746_v29  ;;  %v747_v29 = vld [vmem:[%s4726_s22 + $0x608] sm:$0xff] }
  0x2d   : > { %v1002_v31 = vld [vmem:[%s4726_s22 + $0xe00] sm:$0xff]  ;;  %1140 = vmatpush.msra.mxu2 %v874_v30  ;;  %v875_v30 = vld [vmem:[%s4726_s22 + $0xa08] sm:$0xff] }
  0x2e   : > { %v610_v32 = vld [vmem:[%s4726_s22 + $0x1c0] sm:$0xff]  ;;  %1160 = vmatpush.msra.mxu3 %v1002_v31  ;;  %v1003_v31 = vld [vmem:[%s4726_s22 + $0xe08] sm:$0xff] }
  0x2f   : > { %v738_v33 = vld [vmem:[%s4726_s22 + $0x5c0] sm:$0xff]  ;;  %1101 = vmatpush.msra.mxu0 %v610_v32  ;;  %v611_v32 = vld [vmem:[%s4726_s22 + $0x1c8] sm:$0xff] }
  0x30   : > { %v866_v34 = vld [vmem:[%s4726_s22 + $0x9c0] sm:$0xff]  ;;  %1121 = vmatpush.msra.mxu1 %v738_v33  ;;  %v739_v33 = vld [vmem:[%s4726_s22 + $0x5c8] sm:$0xff] }
  0x31   : > { %v994_v35 = vld [vmem:[%s4726_s22 + $0xdc0] sm:$0xff]  ;;  %1141 = vmatpush.msra.mxu2 %v866_v34  ;;  %v867_v34 = vld [vmem:[%s4726_s22 + $0x9c8] sm:$0xff] }
  0x32   : > { %v602_v36 = vld [vmem:[%s4726_s22 + $0x180] sm:$0xff]  ;;  %1161 = vmatpush.msra.mxu3 %v994_v35  ;;  %v995_v35 = vld [vmem:[%s4726_s22 + $0xdc8] sm:$0xff] }
  0x33   : > { %v730_v37 = vld [vmem:[%s4726_s22 + $0x580] sm:$0xff]  ;;  %1102 = vmatpush.msra.mxu0 %v602_v36  ;;  %v603_v36 = vld [vmem:[%s4726_s22 + $0x188] sm:$0xff] }
  0x34   : > { %v858_v38 = vld [vmem:[%s4726_s22 + $0x980] sm:$0xff]  ;;  %1122 = vmatpush.msra.mxu1 %v730_v37  ;;  %v731_v37 = vld [vmem:[%s4726_s22 + $0x588] sm:$0xff] }
  0x35   : > { %v986_v39 = vld [vmem:[%s4726_s22 + $0xd80] sm:$0xff]  ;;  %1142 = vmatpush.msra.mxu2 %v858_v38  ;;  %v859_v38 = vld [vmem:[%s4726_s22 + $0x988] sm:$0xff] }
  0x36   : > { %v594_v40 = vld [vmem:[%s4726_s22 + $0x140] sm:$0xff]  ;;  %1162 = vmatpush.msra.mxu3 %v986_v39  ;;  %v987_v39 = vld [vmem:[%s4726_s22 + $0xd88] sm:$0xff] }
  0x37   : > { %v722_v41 = vld [vmem:[%s4726_s22 + $0x540] sm:$0xff]  ;;  %1103 = vmatpush.msra.mxu0 %v594_v40  ;;  %v595_v40 = vld [vmem:[%s4726_s22 + $0x148] sm:$0xff] }
  0x38   : > { %v850_v42 = vld [vmem:[%s4726_s22 + $0x940] sm:$0xff]  ;;  %1123 = vmatpush.msra.mxu1 %v722_v41  ;;  %v723_v41 = vld [vmem:[%s4726_s22 + $0x548] sm:$0xff] }
  0x39   : > { %v978_v43 = vld [vmem:[%s4726_s22 + $0xd40] sm:$0xff]  ;;  %1143 = vmatpush.msra.mxu2 %v850_v42  ;;  %v851_v42 = vld [vmem:[%s4726_s22 + $0x948] sm:$0xff] }
  0x3a   : > { %v586_v44 = vld [vmem:[%s4726_s22 + $0x100] sm:$0xff]  ;;  %1163 = vmatpush.msra.mxu3 %v978_v43  ;;  %v979_v43 = vld [vmem:[%s4726_s22 + $0xd48] sm:$0xff] }
  0x3b   : > { %v714_v45 = vld [vmem:[%s4726_s22 + $0x500] sm:$0xff]  ;;  %1104 = vmatpush.msra.mxu0 %v586_v44  ;;  %v587_v44 = vld [vmem:[%s4726_s22 + $0x108] sm:$0xff] }
  0x3c   : > { %v842_v46 = vld [vmem:[%s4726_s22 + $0x900] sm:$0xff]  ;;  %1124 = vmatpush.msra.mxu1 %v714_v45  ;;  %v715_v45 = vld [vmem:[%s4726_s22 + $0x508] sm:$0xff] }
  0x3d   : > { %v970_v47 = vld [vmem:[%s4726_s22 + $0xd00] sm:$0xff]  ;;  %1144 = vmatpush.msra.mxu2 %v842_v46  ;;  %v843_v46 = vld [vmem:[%s4726_s22 + $0x908] sm:$0xff] }
  0x3e   : > { %v578_v48 = vld [vmem:[%s4726_s22 + $0xc0] sm:$0xff]  ;;  %1164 = vmatpush.msra.mxu3 %v970_v47  ;;  %v971_v47 = vld [vmem:[%s4726_s22 + $0xd08] sm:$0xff] }
  0x3f   : > { %v706_v49 = vld [vmem:[%s4726_s22 + $0x4c0] sm:$0xff]  ;;  %1105 = vmatpush.msra.mxu0 %v578_v48  ;;  %v579_v48 = vld [vmem:[%s4726_s22 + $0xc8] sm:$0xff] }
  0x40   : > { %v834_v50 = vld [vmem:[%s4726_s22 + $0x8c0] sm:$0xff]  ;;  %1125 = vmatpush.msra.mxu1 %v706_v49  ;;  %v707_v49 = vld [vmem:[%s4726_s22 + $0x4c8] sm:$0xff] }
  0x41   : > { %v962_v51 = vld [vmem:[%s4726_s22 + $0xcc0] sm:$0xff]  ;;  %1145 = vmatpush.msra.mxu2 %v834_v50  ;;  %v835_v50 = vld [vmem:[%s4726_s22 + $0x8c8] sm:$0xff] }
  0x42   : > { %v570_v52 = vld [vmem:[%s4726_s22 + $0x80] sm:$0xff]  ;;  %1165 = vmatpush.msra.mxu3 %v962_v51  ;;  %v963_v51 = vld [vmem:[%s4726_s22 + $0xcc8] sm:$0xff] }
  0x43   : > { %v698_v53 = vld [vmem:[%s4726_s22 + $0x480] sm:$0xff]  ;;  %1106 = vmatpush.msra.mxu0 %v570_v52  ;;  %v571_v52 = vld [vmem:[%s4726_s22 + $0x88] sm:$0xff] }
  0x44   : > { %v826_v54 = vld [vmem:[%s4726_s22 + $0x880] sm:$0xff]  ;;  %1126 = vmatpush.msra.mxu1 %v698_v53  ;;  %v699_v53 = vld [vmem:[%s4726_s22 + $0x488] sm:$0xff] }
  0x45   : > { %v954_v55 = vld [vmem:[%s4726_s22 + $0xc80] sm:$0xff]  ;;  %1146 = vmatpush.msra.mxu2 %v826_v54  ;;  %v827_v54 = vld [vmem:[%s4726_s22 + $0x888] sm:$0xff] }
  0x46   : > { %v562_v56 = vld [vmem:[%s4726_s22 + $0x40] sm:$0xff]  ;;  %1166 = vmatpush.msra.mxu3 %v954_v55  ;;  %v955_v55 = vld [vmem:[%s4726_s22 + $0xc88] sm:$0xff] }
  0x47   : > { %v690_v57 = vld [vmem:[%s4726_s22 + $0x440] sm:$0xff]  ;;  %1107 = vmatpush.msra.mxu0 %v562_v56  ;;  %v563_v56 = vld [vmem:[%s4726_s22 + $0x48] sm:$0xff] }
  0x48   : > { %v818_v58 = vld [vmem:[%s4726_s22 + $0x840] sm:$0xff]  ;;  %1127 = vmatpush.msra.mxu1 %v690_v57  ;;  %v691_v57 = vld [vmem:[%s4726_s22 + $0x448] sm:$0xff] }
  0x49   : > { %v946_v59 = vld [vmem:[%s4726_s22 + $0xc40] sm:$0xff]  ;;  %1147 = vmatpush.msra.mxu2 %v818_v58 }
  0x4a   : > { %v554_v60 = vld [vmem:[%s4726_s22] sm:$0xff]  ;;  %1167 = vmatpush.msra.mxu3 %v946_v59  ;;  %v819_v59 = vld [vmem:[%s4726_s22 + $0x848] sm:$0xff] }
  0x4b   : > { %v682_v61 = vld [vmem:[%s4726_s22 + $0x400] sm:$0xff]  ;;  %1108 = vmatpush.msra.mxu0 %v554_v60  ;;  %v947_v60 = vld [vmem:[%s4726_s22 + $0xc48] sm:$0xff] }
  0x4c   : > { %v810_v62 = vld [vmem:[%s4726_s22 + $0x800] sm:$0xff]  ;;  %1128 = vmatpush.msra.mxu1 %v682_v61  ;;  %v555_v61 = vld [vmem:[%s4726_s22 + $0x8] sm:$0xff] }
  0x4d   : > { %v938_v63 = vld [vmem:[%s4726_s22 + $0xc00] sm:$0xff]  ;;  %1148 = vmatpush.msra.mxu2 %v810_v62  ;;  %1173 = vmatpush.msrb.mxu0 %v675_v0  ;;  %v683_v62 = vld [vmem:[%s4726_s22 + $0x408] sm:$0xff] }
  0x4e   : > { %1168 = vmatpush.msra.mxu3 %v938_v63  ;;  %1193 = vmatpush.msrb.mxu1 %v803_v1  ;;  %v553_v58 = vld [vmem:[%s502_s26] sm:$0xf]  ;;  %v811_v63 = vld [vmem:[%s4726_s22 + $0x808] sm:$0xff] }
  0x4f   : > { %1213 = vmatpush.msrb.mxu2 %v931_v2  ;;  %1174 = vmatpush.msrb.mxu0 %v667_v4  ;;  %v939_v0 = vld [vmem:[%s4726_s22 + $0xc08] sm:$0xff]  ;;  %v4860_v1 = vperm.slane %v553_v58, 0  ;;  %v4862_v2 = vperm.slane %v553_v58, 1  ;;  %v4866_v4 = vperm.slane %v553_v58, 3 }
  0x50   : > { %1233 = vmatpush.msrb.mxu3 %v1059_v3  ;;  %1194 = vmatpush.msrb.mxu1 %v795_v5  ;;  %v4864_v3 = vperm.slane %v553_v58, 2  ;;  %v676_v5 = vld [vmem:[%s4726_s22 + $0x3d0] sm:$0xff] }
  0x51   : > { %1214 = vmatpush.msrb.mxu2 %v923_v6  ;;  %1175 = vmatpush.msrb.mxu0 %v659_v8  ;;  %v804_v6 = vld [vmem:[%s4726_s22 + $0x7d0] sm:$0xff] }
  0x52   : > { %1234 = vmatpush.msrb.mxu3 %v1051_v7  ;;  %1195 = vmatpush.msrb.mxu1 %v787_v9  ;;  %v932_v7 = vld [vmem:[%s4726_s22 + $0xbd0] sm:$0xff] }
  0x53   : > { %1215 = vmatpush.msrb.mxu2 %v915_v10  ;;  %1176 = vmatpush.msrb.mxu0 %v651_v12  ;;  %v1060_v8 = vld [vmem:[%s4726_s22 + $0xfd0] sm:$0xff] }
  0x54   : > { %1235 = vmatpush.msrb.mxu3 %v1043_v11  ;;  %1196 = vmatpush.msrb.mxu1 %v779_v13  ;;  %v668_v9 = vld [vmem:[%s4726_s22 + $0x390] sm:$0xff] }
  0x55   : > { %1216 = vmatpush.msrb.mxu2 %v907_v14  ;;  %1177 = vmatpush.msrb.mxu0 %v643_v16  ;;  %v796_v10 = vld [vmem:[%s4726_s22 + $0x790] sm:$0xff] }
  0x56   : > { %1236 = vmatpush.msrb.mxu3 %v1035_v15  ;;  %1197 = vmatpush.msrb.mxu1 %v771_v17  ;;  %v924_v11 = vld [vmem:[%s4726_s22 + $0xb90] sm:$0xff] }
  0x57   : > { %1217 = vmatpush.msrb.mxu2 %v899_v18  ;;  %1178 = vmatpush.msrb.mxu0 %v635_v20  ;;  %v1052_v12 = vld [vmem:[%s4726_s22 + $0xf90] sm:$0xff] }
  0x58   : > { %1237 = vmatpush.msrb.mxu3 %v1027_v19  ;;  %1198 = vmatpush.msrb.mxu1 %v763_v21  ;;  %v660_v13 = vld [vmem:[%s4726_s22 + $0x350] sm:$0xff] }
  0x59   : > { %1218 = vmatpush.msrb.mxu2 %v891_v22  ;;  %1179 = vmatpush.msrb.mxu0 %v627_v24  ;;  %v788_v14 = vld [vmem:[%s4726_s22 + $0x750] sm:$0xff] }
  0x5a   : > { %1238 = vmatpush.msrb.mxu3 %v1019_v23  ;;  %1199 = vmatpush.msrb.mxu1 %v755_v25  ;;  %v916_v15 = vld [vmem:[%s4726_s22 + $0xb50] sm:$0xff] }
  0x5b   : > { %1219 = vmatpush.msrb.mxu2 %v883_v26  ;;  %1180 = vmatpush.msrb.mxu0 %v619_v28  ;;  %v1044_v16 = vld [vmem:[%s4726_s22 + $0xf50] sm:$0xff] }
  0x5c   : > { %1239 = vmatpush.msrb.mxu3 %v1011_v27  ;;  %1200 = vmatpush.msrb.mxu1 %v747_v29  ;;  %v652_v17 = vld [vmem:[%s4726_s22 + $0x310] sm:$0xff] }
  0x5d   : > { %1220 = vmatpush.msrb.mxu2 %v875_v30  ;;  %1181 = vmatpush.msrb.mxu0 %v611_v32  ;;  %v780_v18 = vld [vmem:[%s4726_s22 + $0x710] sm:$0xff] }
  0x5e   : > { %1240 = vmatpush.msrb.mxu3 %v1003_v31  ;;  %1201 = vmatpush.msrb.mxu1 %v739_v33  ;;  %v908_v19 = vld [vmem:[%s4726_s22 + $0xb10] sm:$0xff] }
  0x5f   : > { %1221 = vmatpush.msrb.mxu2 %v867_v34  ;;  %1182 = vmatpush.msrb.mxu0 %v603_v36  ;;  %v1036_v20 = vld [vmem:[%s4726_s22 + $0xf10] sm:$0xff] }
  0x60   : > { %1241 = vmatpush.msrb.mxu3 %v995_v35  ;;  %1202 = vmatpush.msrb.mxu1 %v731_v37  ;;  %v644_v21 = vld [vmem:[%s4726_s22 + $0x2d0] sm:$0xff] }
  0x61   : > { %1222 = vmatpush.msrb.mxu2 %v859_v38  ;;  %1183 = vmatpush.msrb.mxu0 %v595_v40  ;;  %v772_v22 = vld [vmem:[%s4726_s22 + $0x6d0] sm:$0xff] }
  0x62   : > { %1242 = vmatpush.msrb.mxu3 %v987_v39  ;;  %1203 = vmatpush.msrb.mxu1 %v723_v41  ;;  %v900_v23 = vld [vmem:[%s4726_s22 + $0xad0] sm:$0xff] }
  0x63   : > { %1223 = vmatpush.msrb.mxu2 %v851_v42  ;;  %1184 = vmatpush.msrb.mxu0 %v587_v44  ;;  %v1028_v24 = vld [vmem:[%s4726_s22 + $0xed0] sm:$0xff] }
  0x64   : > { %1243 = vmatpush.msrb.mxu3 %v979_v43  ;;  %1204 = vmatpush.msrb.mxu1 %v715_v45  ;;  %v636_v25 = vld [vmem:[%s4726_s22 + $0x290] sm:$0xff] }
  0x65   : > { %1224 = vmatpush.msrb.mxu2 %v843_v46  ;;  %1185 = vmatpush.msrb.mxu0 %v579_v48  ;;  %v764_v26 = vld [vmem:[%s4726_s22 + $0x690] sm:$0xff] }
  0x66   : > { %1244 = vmatpush.msrb.mxu3 %v971_v47  ;;  %1205 = vmatpush.msrb.mxu1 %v707_v49  ;;  %v892_v27 = vld [vmem:[%s4726_s22 + $0xa90] sm:$0xff] }
  0x67   : > { %1225 = vmatpush.msrb.mxu2 %v835_v50  ;;  %1186 = vmatpush.msrb.mxu0 %v571_v52  ;;  %v1020_v28 = vld [vmem:[%s4726_s22 + $0xe90] sm:$0xff] }
  0x68   : > { %1245 = vmatpush.msrb.mxu3 %v963_v51  ;;  %1206 = vmatpush.msrb.mxu1 %v699_v53  ;;  %v628_v29 = vld [vmem:[%s4726_s22 + $0x250] sm:$0xff] }
  0x69   : > { %1226 = vmatpush.msrb.mxu2 %v827_v54  ;;  %1187 = vmatpush.msrb.mxu0 %v563_v56  ;;  %v756_v30 = vld [vmem:[%s4726_s22 + $0x650] sm:$0xff] }
  0x6a   : > { %1246 = vmatpush.msrb.mxu3 %v955_v55  ;;  %1207 = vmatpush.msrb.mxu1 %v691_v57  ;;  %v884_v31 = vld [vmem:[%s4726_s22 + $0xa50] sm:$0xff] }
  0x6b   : > { %1227 = vmatpush.msrb.mxu2 %v819_v59  ;;  %1188 = vmatpush.msrb.mxu0 %v555_v61  ;;  %v1012_v32 = vld [vmem:[%s4726_s22 + $0xe50] sm:$0xff] }
  0x6c   : > { %1247 = vmatpush.msrb.mxu3 %v947_v60  ;;  %1208 = vmatpush.msrb.mxu1 %v683_v62  ;;  %v620_v33 = vld [vmem:[%s4726_s22 + $0x210] sm:$0xff] }
  0x6d   : > { %1228 = vmatpush.msrb.mxu2 %v811_v63  ;;  %1109 = vmatmul.f32.vlgmr.msra.gmra.mxu0 %v4860_v1  ;;  %v748_v34 = vld [vmem:[%s4726_s22 + $0x610] sm:$0xff] }
  0x6e   : > { %1248 = vmatpush.msrb.mxu3 %v939_v0  ;;  %1129 = vmatmul.f32.vlgmr.msra.gmra.mxu1 %v4862_v2  ;;  %v876_v35 = vld [vmem:[%s4726_s22 + $0xa10] sm:$0xff] }
  0x6f   : > { %1149 = vmatmul.f32.vlgmr.msra.gmra.mxu2 %v4864_v3  ;;  %1169 = vmatmul.f32.vlgmr.msra.gmra.mxu3 %v4866_v4  ;;  %v1004_v36 = vld [vmem:[%s4726_s22 + $0xe10] sm:$0xff] }
  0x70   : > { %1253 = vmatpush.msra.mxu0 %v676_v5  ;;  %1273 = vmatpush.msra.mxu1 %v804_v6  ;;  %v612_v37 = vld [vmem:[%s4726_s22 + $0x1d0] sm:$0xff] }
  0x71   : > { %1293 = vmatpush.msra.mxu2 %v932_v7  ;;  %1313 = vmatpush.msra.mxu3 %v1060_v8  ;;  %v740_v38 = vld [vmem:[%s4726_s22 + $0x5d0] sm:$0xff] }
  0x72   : > { %1254 = vmatpush.msra.mxu0 %v668_v9  ;;  %1274 = vmatpush.msra.mxu1 %v796_v10  ;;  %v868_v39 = vld [vmem:[%s4726_s22 + $0x9d0] sm:$0xff]  ;;  %v677_v9 = vld [vmem:[%s4726_s22 + $0x3d8] sm:$0xff] }
  0x73   : > { %1294 = vmatpush.msra.mxu2 %v924_v11  ;;  %1314 = vmatpush.msra.mxu3 %v1052_v12  ;;  %v996_v40 = vld [vmem:[%s4726_s22 + $0xdd0] sm:$0xff]  ;;  %v805_v10 = vld [vmem:[%s4726_s22 + $0x7d8] sm:$0xff] }
  0x74   : > { %1255 = vmatpush.msra.mxu0 %v660_v13  ;;  %1275 = vmatpush.msra.mxu1 %v788_v14  ;;  %v604_v41 = vld [vmem:[%s4726_s22 + $0x190] sm:$0xff]  ;;  %v933_v11 = vld [vmem:[%s4726_s22 + $0xbd8] sm:$0xff] }
  0x75   : > { %1295 = vmatpush.msra.mxu2 %v916_v15  ;;  %1315 = vmatpush.msra.mxu3 %v1044_v16  ;;  %v732_v42 = vld [vmem:[%s4726_s22 + $0x590] sm:$0xff]  ;;  %v1061_v12 = vld [vmem:[%s4726_s22 + $0xfd8] sm:$0xff] }
  0x76   : > { %1256 = vmatpush.msra.mxu0 %v652_v17  ;;  %1276 = vmatpush.msra.mxu1 %v780_v18  ;;  %v860_v43 = vld [vmem:[%s4726_s22 + $0x990] sm:$0xff]  ;;  %v669_v13 = vld [vmem:[%s4726_s22 + $0x398] sm:$0xff] }
  0x77   : > { %1296 = vmatpush.msra.mxu2 %v908_v19  ;;  %1316 = vmatpush.msra.mxu3 %v1036_v20  ;;  %v988_v44 = vld [vmem:[%s4726_s22 + $0xd90] sm:$0xff]  ;;  %v797_v14 = vld [vmem:[%s4726_s22 + $0x798] sm:$0xff] }
  0x78   : > { %1257 = vmatpush.msra.mxu0 %v644_v21  ;;  %1277 = vmatpush.msra.mxu1 %v772_v22  ;;  %v596_v45 = vld [vmem:[%s4726_s22 + $0x150] sm:$0xff]  ;;  %v925_v15 = vld [vmem:[%s4726_s22 + $0xb98] sm:$0xff] }
  0x79   : > { %1297 = vmatpush.msra.mxu2 %v900_v23  ;;  %1317 = vmatpush.msra.mxu3 %v1028_v24  ;;  %v724_v46 = vld [vmem:[%s4726_s22 + $0x550] sm:$0xff]  ;;  %v1053_v16 = vld [vmem:[%s4726_s22 + $0xf98] sm:$0xff] }
  0x7a   : > { %1258 = vmatpush.msra.mxu0 %v636_v25  ;;  %1278 = vmatpush.msra.mxu1 %v764_v26  ;;  %v852_v47 = vld [vmem:[%s4726_s22 + $0x950] sm:$0xff]  ;;  %v661_v17 = vld [vmem:[%s4726_s22 + $0x358] sm:$0xff] }
  0x7b   : > { %1298 = vmatpush.msra.mxu2 %v892_v27  ;;  %1318 = vmatpush.msra.mxu3 %v1020_v28  ;;  %v980_v48 = vld [vmem:[%s4726_s22 + $0xd50] sm:$0xff]  ;;  %v789_v18 = vld [vmem:[%s4726_s22 + $0x758] sm:$0xff] }
  0x7c   : > { %1259 = vmatpush.msra.mxu0 %v628_v29  ;;  %1279 = vmatpush.msra.mxu1 %v756_v30  ;;  %v588_v49 = vld [vmem:[%s4726_s22 + $0x110] sm:$0xff]  ;;  %v917_v19 = vld [vmem:[%s4726_s22 + $0xb58] sm:$0xff] }
  0x7d   : > { %1299 = vmatpush.msra.mxu2 %v884_v31  ;;  %1319 = vmatpush.msra.mxu3 %v1012_v32  ;;  %v716_v50 = vld [vmem:[%s4726_s22 + $0x510] sm:$0xff]  ;;  %v1045_v20 = vld [vmem:[%s4726_s22 + $0xf58] sm:$0xff] }
  0x7e   : > { %1260 = vmatpush.msra.mxu0 %v620_v33  ;;  %1280 = vmatpush.msra.mxu1 %v748_v34  ;;  %v844_v51 = vld [vmem:[%s4726_s22 + $0x910] sm:$0xff]  ;;  %v653_v21 = vld [vmem:[%s4726_s22 + $0x318] sm:$0xff] }
  0x7f   : > { %1300 = vmatpush.msra.mxu2 %v876_v35  ;;  %1320 = vmatpush.msra.mxu3 %v1004_v36  ;;  %v972_v52 = vld [vmem:[%s4726_s22 + $0xd10] sm:$0xff]  ;;  %v781_v22 = vld [vmem:[%s4726_s22 + $0x718] sm:$0xff] }
  0x80   : > { %1261 = vmatpush.msra.mxu0 %v612_v37  ;;  %1281 = vmatpush.msra.mxu1 %v740_v38  ;;  %v580_v53 = vld [vmem:[%s4726_s22 + $0xd0] sm:$0xff]  ;;  %v909_v23 = vld [vmem:[%s4726_s22 + $0xb18] sm:$0xff] }
  0x81   : > { %1301 = vmatpush.msra.mxu2 %v868_v39  ;;  %1321 = vmatpush.msra.mxu3 %v996_v40  ;;  %v708_v54 = vld [vmem:[%s4726_s22 + $0x4d0] sm:$0xff]  ;;  %v1037_v24 = vld [vmem:[%s4726_s22 + $0xf18] sm:$0xff] }
  0x82   : > { %1262 = vmatpush.msra.mxu0 %v604_v41  ;;  %1282 = vmatpush.msra.mxu1 %v732_v42  ;;  %v836_v55 = vld [vmem:[%s4726_s22 + $0x8d0] sm:$0xff]  ;;  %v645_v25 = vld [vmem:[%s4726_s22 + $0x2d8] sm:$0xff] }
  0x83   : > { %1302 = vmatpush.msra.mxu2 %v860_v43  ;;  %1322 = vmatpush.msra.mxu3 %v988_v44  ;;  %v964_v56 = vld [vmem:[%s4726_s22 + $0xcd0] sm:$0xff]  ;;  %v773_v26 = vld [vmem:[%s4726_s22 + $0x6d8] sm:$0xff] }
  0x84   : > { %1263 = vmatpush.msra.mxu0 %v596_v45  ;;  %1283 = vmatpush.msra.mxu1 %v724_v46  ;;  %v572_v57 = vld [vmem:[%s4726_s22 + $0x90] sm:$0xff]  ;;  %v901_v27 = vld [vmem:[%s4726_s22 + $0xad8] sm:$0xff] }
  0x85   : > { %1303 = vmatpush.msra.mxu2 %v852_v47  ;;  %1323 = vmatpush.msra.mxu3 %v980_v48  ;;  %v700_v58 = vld [vmem:[%s4726_s22 + $0x490] sm:$0xff]  ;;  %v1029_v28 = vld [vmem:[%s4726_s22 + $0xed8] sm:$0xff] }
  0x86   : > { %1264 = vmatpush.msra.mxu0 %v588_v49  ;;  %1284 = vmatpush.msra.mxu1 %v716_v50  ;;  %v828_v59 = vld [vmem:[%s4726_s22 + $0x890] sm:$0xff]  ;;  %v637_v29 = vld [vmem:[%s4726_s22 + $0x298] sm:$0xff] }
  0x87   : > { %1304 = vmatpush.msra.mxu2 %v844_v51  ;;  %1324 = vmatpush.msra.mxu3 %v972_v52  ;;  %v956_v60 = vld [vmem:[%s4726_s22 + $0xc90] sm:$0xff]  ;;  %v765_v30 = vld [vmem:[%s4726_s22 + $0x698] sm:$0xff] }
  0x88   : > { %1265 = vmatpush.msra.mxu0 %v580_v53  ;;  %1285 = vmatpush.msra.mxu1 %v708_v54  ;;  %v564_v61 = vld [vmem:[%s4726_s22 + $0x50] sm:$0xff]  ;;  %v893_v31 = vld [vmem:[%s4726_s22 + $0xa98] sm:$0xff] }
  0x89   : > { %1305 = vmatpush.msra.mxu2 %v836_v55  ;;  %1325 = vmatpush.msra.mxu3 %v964_v56  ;;  %v692_v62 = vld [vmem:[%s4726_s22 + $0x450] sm:$0xff]  ;;  %v1021_v32 = vld [vmem:[%s4726_s22 + $0xe98] sm:$0xff] }
  0x8a   : > { %1266 = vmatpush.msra.mxu0 %v572_v57  ;;  %1286 = vmatpush.msra.mxu1 %v700_v58  ;;  %v820_v63 = vld [vmem:[%s4726_s22 + $0x850] sm:$0xff]  ;;  %v629_v33 = vld [vmem:[%s4726_s22 + $0x258] sm:$0xff] }
  0x8b   : > { %v948_v0 = vld [vmem:[%s4726_s22 + $0xc50] sm:$0xff]  ;;  %1306 = vmatpush.msra.mxu2 %v828_v59  ;;  %1326 = vmatpush.msra.mxu3 %v956_v60  ;;  %v757_v34 = vld [vmem:[%s4726_s22 + $0x658] sm:$0xff] }
  0x8c   : > { %v556_v5 = vld [vmem:[%s4726_s22 + $0x10] sm:$0xff]  ;;  %1267 = vmatpush.msra.mxu0 %v564_v61  ;;  %1287 = vmatpush.msra.mxu1 %v692_v62  ;;  %v885_v35 = vld [vmem:[%s4726_s22 + $0xa58] sm:$0xff] }
  0x8d   : > { %v684_v6 = vld [vmem:[%s4726_s22 + $0x410] sm:$0xff]  ;;  %1307 = vmatpush.msra.mxu2 %v820_v63  ;;  %1327 = vmatpush.msra.mxu3 %v948_v0  ;;  %v1013_v36 = vld [vmem:[%s4726_s22 + $0xe58] sm:$0xff] }
  0x8e   : > { %v812_v7 = vld [vmem:[%s4726_s22 + $0x810] sm:$0xff]  ;;  %1268 = vmatpush.msra.mxu0 %v556_v5  ;;  %1288 = vmatpush.msra.mxu1 %v684_v6  ;;  %v621_v37 = vld [vmem:[%s4726_s22 + $0x218] sm:$0xff] }
  0x8f   : > { %v940_v8 = vld [vmem:[%s4726_s22 + $0xc10] sm:$0xff]  ;;  %1308 = vmatpush.msra.mxu2 %v812_v7  ;;  %1189 = vmatmul.f32.vlgmr.msrb.gmra.mxu0 %v4860_v1  ;;  %v749_v38 = vld [vmem:[%s4726_s22 + $0x618] sm:$0xff] }
  0x90   : > { %1328 = vmatpush.msra.mxu3 %v940_v8  ;;  %1209 = vmatmul.f32.vlgmr.msrb.gmra.mxu1 %v4862_v2  ;;  %v877_v39 = vld [vmem:[%s4726_s22 + $0xa18] sm:$0xff] }
  0x91   : > { %1229 = vmatmul.f32.vlgmr.msrb.gmra.mxu2 %v4864_v3  ;;  %1249 = vmatmul.f32.vlgmr.msrb.gmra.mxu3 %v4866_v4  ;;  %v1005_v40 = vld [vmem:[%s4726_s22 + $0xe18] sm:$0xff] }
  0x92   : > { %1333 = vmatpush.msrb.mxu0 %v677_v9  ;;  %1353 = vmatpush.msrb.mxu1 %v805_v10  ;;  %v613_v41 = vld [vmem:[%s4726_s22 + $0x1d8] sm:$0xff] }
  0x93   : > { %1373 = vmatpush.msrb.mxu2 %v933_v11  ;;  %1393 = vmatpush.msrb.mxu3 %v1061_v12  ;;  %v741_v42 = vld [vmem:[%s4726_s22 + $0x5d8] sm:$0xff] }
  0x94   : > { %1334 = vmatpush.msrb.mxu0 %v669_v13  ;;  %1354 = vmatpush.msrb.mxu1 %v797_v14  ;;  %v869_v43 = vld [vmem:[%s4726_s22 + $0x9d8] sm:$0xff]  ;;  %v678_v13 = vld [vmem:[%s4726_s22 + $0x3e0] sm:$0xff] }
  0x95   : > { %1374 = vmatpush.msrb.mxu2 %v925_v15  ;;  %1394 = vmatpush.msrb.mxu3 %v1053_v16  ;;  %v997_v44 = vld [vmem:[%s4726_s22 + $0xdd8] sm:$0xff]  ;;  %v806_v14 = vld [vmem:[%s4726_s22 + $0x7e0] sm:$0xff] }
  0x96   : > { %1335 = vmatpush.msrb.mxu0 %v661_v17  ;;  %1355 = vmatpush.msrb.mxu1 %v789_v18  ;;  %v605_v45 = vld [vmem:[%s4726_s22 + $0x198] sm:$0xff]  ;;  %v934_v15 = vld [vmem:[%s4726_s22 + $0xbe0] sm:$0xff] }
  0x97   : > { %1375 = vmatpush.msrb.mxu2 %v917_v19  ;;  %1395 = vmatpush.msrb.mxu3 %v1045_v20  ;;  %v733_v46 = vld [vmem:[%s4726_s22 + $0x598] sm:$0xff]  ;;  %v1062_v16 = vld [vmem:[%s4726_s22 + $0xfe0] sm:$0xff] }
  0x98   : > { %1336 = vmatpush.msrb.mxu0 %v653_v21  ;;  %1356 = vmatpush.msrb.mxu1 %v781_v22  ;;  %v861_v47 = vld [vmem:[%s4726_s22 + $0x998] sm:$0xff]  ;;  %v670_v17 = vld [vmem:[%s4726_s22 + $0x3a0] sm:$0xff] }
  0x99   : > { %1376 = vmatpush.msrb.mxu2 %v909_v23  ;;  %1396 = vmatpush.msrb.mxu3 %v1037_v24  ;;  %v989_v48 = vld [vmem:[%s4726_s22 + $0xd98] sm:$0xff]  ;;  %v798_v18 = vld [vmem:[%s4726_s22 + $0x7a0] sm:$0xff] }
  0x9a   : > { %1337 = vmatpush.msrb.mxu0 %v645_v25  ;;  %1357 = vmatpush.msrb.mxu1 %v773_v26  ;;  %v597_v49 = vld [vmem:[%s4726_s22 + $0x158] sm:$0xff]  ;;  %v926_v19 = vld [vmem:[%s4726_s22 + $0xba0] sm:$0xff] }
  0x9b   : > { %1377 = vmatpush.msrb.mxu2 %v901_v27  ;;  %1397 = vmatpush.msrb.mxu3 %v1029_v28  ;;  %v725_v50 = vld [vmem:[%s4726_s22 + $0x558] sm:$0xff]  ;;  %v1054_v20 = vld [vmem:[%s4726_s22 + $0xfa0] sm:$0xff] }
  0x9c   : > { %1338 = vmatpush.msrb.mxu0 %v637_v29  ;;  %1358 = vmatpush.msrb.mxu1 %v765_v30  ;;  %v853_v51 = vld [vmem:[%s4726_s22 + $0x958] sm:$0xff]  ;;  %v662_v21 = vld [vmem:[%s4726_s22 + $0x360] sm:$0xff] }
  0x9d   : > { %1378 = vmatpush.msrb.mxu2 %v893_v31  ;;  %1398 = vmatpush.msrb.mxu3 %v1021_v32  ;;  %v981_v52 = vld [vmem:[%s4726_s22 + $0xd58] sm:$0xff]  ;;  %v790_v22 = vld [vmem:[%s4726_s22 + $0x760] sm:$0xff] }
  0x9e   : > { %1339 = vmatpush.msrb.mxu0 %v629_v33  ;;  %1359 = vmatpush.msrb.mxu1 %v757_v34  ;;  %v589_v53 = vld [vmem:[%s4726_s22 + $0x118] sm:$0xff]  ;;  %v918_v23 = vld [vmem:[%s4726_s22 + $0xb60] sm:$0xff] }
  0x9f   : > { %1379 = vmatpush.msrb.mxu2 %v885_v35  ;;  %1399 = vmatpush.msrb.mxu3 %v1013_v36  ;;  %v717_v54 = vld [vmem:[%s4726_s22 + $0x518] sm:$0xff]  ;;  %v1046_v24 = vld [vmem:[%s4726_s22 + $0xf60] sm:$0xff] }
  0xa0   : > { %1340 = vmatpush.msrb.mxu0 %v621_v37  ;;  %1360 = vmatpush.msrb.mxu1 %v749_v38  ;;  %v845_v55 = vld [vmem:[%s4726_s22 + $0x918] sm:$0xff]  ;;  %v654_v25 = vld [vmem:[%s4726_s22 + $0x320] sm:$0xff] }
  0xa1   : > { %1380 = vmatpush.msrb.mxu2 %v877_v39  ;;  %1400 = vmatpush.msrb.mxu3 %v1005_v40  ;;  %v973_v56 = vld [vmem:[%s4726_s22 + $0xd18] sm:$0xff]  ;;  %v782_v26 = vld [vmem:[%s4726_s22 + $0x720] sm:$0xff] }
  0xa2   : > { %1341 = vmatpush.msrb.mxu0 %v613_v41  ;;  %1361 = vmatpush.msrb.mxu1 %v741_v42  ;;  %v581_v57 = vld [vmem:[%s4726_s22 + $0xd8] sm:$0xff]  ;;  %v910_v27 = vld [vmem:[%s4726_s22 + $0xb20] sm:$0xff] }
  0xa3   : > { %1381 = vmatpush.msrb.mxu2 %v869_v43  ;;  %1401 = vmatpush.msrb.mxu3 %v997_v44  ;;  %v709_v58 = vld [vmem:[%s4726_s22 + $0x4d8] sm:$0xff]  ;;  %v1038_v28 = vld [vmem:[%s4726_s22 + $0xf20] sm:$0xff] }
  0xa4   : > { %1342 = vmatpush.msrb.mxu0 %v605_v45  ;;  %1362 = vmatpush.msrb.mxu1 %v733_v46  ;;  %v837_v59 = vld [vmem:[%s4726_s22 + $0x8d8] sm:$0xff]  ;;  %v646_v29 = vld [vmem:[%s4726_s22 + $0x2e0] sm:$0xff] }
  0xa5   : > { %1382 = vmatpush.msrb.mxu2 %v861_v47  ;;  %1402 = vmatpush.msrb.mxu3 %v989_v48  ;;  %v965_v60 = vld [vmem:[%s4726_s22 + $0xcd8] sm:$0xff]  ;;  %v774_v30 = vld [vmem:[%s4726_s22 + $0x6e0] sm:$0xff] }
  0xa6   : > { %1343 = vmatpush.msrb.mxu0 %v597_v49  ;;  %1363 = vmatpush.msrb.mxu1 %v725_v50  ;;  %v573_v61 = vld [vmem:[%s4726_s22 + $0x98] sm:$0xff]  ;;  %v902_v31 = vld [vmem:[%s4726_s22 + $0xae0] sm:$0xff] }
  0xa7   : > { %1383 = vmatpush.msrb.mxu2 %v853_v51  ;;  %1403 = vmatpush.msrb.mxu3 %v981_v52  ;;  %v701_v62 = vld [vmem:[%s4726_s22 + $0x498] sm:$0xff]  ;;  %v1030_v32 = vld [vmem:[%s4726_s22 + $0xee0] sm:$0xff] }
  0xa8   : > { %1344 = vmatpush.msrb.mxu0 %v589_v53  ;;  %1364 = vmatpush.msrb.mxu1 %v717_v54  ;;  %v829_v63 = vld [vmem:[%s4726_s22 + $0x898] sm:$0xff]  ;;  %v638_v33 = vld [vmem:[%s4726_s22 + $0x2a0] sm:$0xff] }
  0xa9   : > { %1384 = vmatpush.msrb.mxu2 %v845_v55  ;;  %1404 = vmatpush.msrb.mxu3 %v973_v56  ;;  %v957_v0 = vld [vmem:[%s4726_s22 + $0xc98] sm:$0xff]  ;;  %v766_v34 = vld [vmem:[%s4726_s22 + $0x6a0] sm:$0xff] }
  0xaa   : > { %1345 = vmatpush.msrb.mxu0 %v581_v57  ;;  %1365 = vmatpush.msrb.mxu1 %v709_v58  ;;  %v565_v5 = vld [vmem:[%s4726_s22 + $0x58] sm:$0xff]  ;;  %v894_v35 = vld [vmem:[%s4726_s22 + $0xaa0] sm:$0xff] }
  0xab   : > { %1385 = vmatpush.msrb.mxu2 %v837_v59  ;;  %1405 = vmatpush.msrb.mxu3 %v965_v60  ;;  %v693_v6 = vld [vmem:[%s4726_s22 + $0x458] sm:$0xff]  ;;  %v1022_v36 = vld [vmem:[%s4726_s22 + $0xea0] sm:$0xff] }
  0xac   : > { %1346 = vmatpush.msrb.mxu0 %v573_v61  ;;  %1366 = vmatpush.msrb.mxu1 %v701_v62  ;;  %v821_v7 = vld [vmem:[%s4726_s22 + $0x858] sm:$0xff]  ;;  %v630_v37 = vld [vmem:[%s4726_s22 + $0x260] sm:$0xff] }
  0xad   : > { %v949_v8 = vld [vmem:[%s4726_s22 + $0xc58] sm:$0xff]  ;;  %1386 = vmatpush.msrb.mxu2 %v829_v63  ;;  %1406 = vmatpush.msrb.mxu3 %v957_v0  ;;  %v758_v38 = vld [vmem:[%s4726_s22 + $0x660] sm:$0xff] }
  0xae   : > { %v557_v9 = vld [vmem:[%s4726_s22 + $0x18] sm:$0xff]  ;;  %1347 = vmatpush.msrb.mxu0 %v565_v5  ;;  %1367 = vmatpush.msrb.mxu1 %v693_v6  ;;  %v886_v39 = vld [vmem:[%s4726_s22 + $0xa60] sm:$0xff] }
  0xaf   : > { %v685_v10 = vld [vmem:[%s4726_s22 + $0x418] sm:$0xff]  ;;  %1387 = vmatpush.msrb.mxu2 %v821_v7  ;;  %1407 = vmatpush.msrb.mxu3 %v949_v8  ;;  %v1014_v40 = vld [vmem:[%s4726_s22 + $0xe60] sm:$0xff] }
  0xb0   : > { %v813_v11 = vld [vmem:[%s4726_s22 + $0x818] sm:$0xff]  ;;  %1348 = vmatpush.msrb.mxu0 %v557_v9  ;;  %1368 = vmatpush.msrb.mxu1 %v685_v10  ;;  %v622_v41 = vld [vmem:[%s4726_s22 + $0x220] sm:$0xff] }
  0xb1   : > { %v941_v12 = vld [vmem:[%s4726_s22 + $0xc18] sm:$0xff]  ;;  %1388 = vmatpush.msrb.mxu2 %v813_v11  ;;  %1269 = vmatmul.f32.vlgmr.msra.gmra.mxu0 %v4860_v1  ;;  %v750_v42 = vld [vmem:[%s4726_s22 + $0x620] sm:$0xff] }
  0xb2   : > { %1408 = vmatpush.msrb.mxu3 %v941_v12  ;;  %1289 = vmatmul.f32.vlgmr.msra.gmra.mxu1 %v4862_v2  ;;  %v878_v43 = vld [vmem:[%s4726_s22 + $0xa20] sm:$0xff] }
  0xb3   : > { %1309 = vmatmul.f32.vlgmr.msra.gmra.mxu2 %v4864_v3  ;;  %1329 = vmatmul.f32.vlgmr.msra.gmra.mxu3 %v4866_v4  ;;  %v1006_v44 = vld [vmem:[%s4726_s22 + $0xe20] sm:$0xff] }
  0xb4   : > { %1413 = vmatpush.msra.mxu0 %v678_v13  ;;  %1433 = vmatpush.msra.mxu1 %v806_v14  ;;  %v614_v45 = vld [vmem:[%s4726_s22 + $0x1e0] sm:$0xff] }
  0xb5   : > { %1453 = vmatpush.msra.mxu2 %v934_v15  ;;  %1473 = vmatpush.msra.mxu3 %v1062_v16  ;;  %v742_v46 = vld [vmem:[%s4726_s22 + $0x5e0] sm:$0xff] }
  0xb6   : > { %1414 = vmatpush.msra.mxu0 %v670_v17  ;;  %1434 = vmatpush.msra.mxu1 %v798_v18  ;;  %v870_v47 = vld [vmem:[%s4726_s22 + $0x9e0] sm:$0xff]  ;;  %v679_v17 = vld [vmem:[%s4726_s22 + $0x3e8] sm:$0xff] }
  0xb7   : > { %1454 = vmatpush.msra.mxu2 %v926_v19  ;;  %1474 = vmatpush.msra.mxu3 %v1054_v20  ;;  %v998_v48 = vld [vmem:[%s4726_s22 + $0xde0] sm:$0xff]  ;;  %v807_v18 = vld [vmem:[%s4726_s22 + $0x7e8] sm:$0xff] }
  0xb8   : > { %1415 = vmatpush.msra.mxu0 %v662_v21  ;;  %1435 = vmatpush.msra.mxu1 %v790_v22  ;;  %v606_v49 = vld [vmem:[%s4726_s22 + $0x1a0] sm:$0xff]  ;;  %v935_v19 = vld [vmem:[%s4726_s22 + $0xbe8] sm:$0xff] }
  0xb9   : > { %1455 = vmatpush.msra.mxu2 %v918_v23  ;;  %1475 = vmatpush.msra.mxu3 %v1046_v24  ;;  %v734_v50 = vld [vmem:[%s4726_s22 + $0x5a0] sm:$0xff]  ;;  %v1063_v20 = vld [vmem:[%s4726_s22 + $0xfe8] sm:$0xff] }
  0xba   : > { %1416 = vmatpush.msra.mxu0 %v654_v25  ;;  %1436 = vmatpush.msra.mxu1 %v782_v26  ;;  %v862_v51 = vld [vmem:[%s4726_s22 + $0x9a0] sm:$0xff]  ;;  %v671_v21 = vld [vmem:[%s4726_s22 + $0x3a8] sm:$0xff] }
  0xbb   : > { %1456 = vmatpush.msra.mxu2 %v910_v27  ;;  %1476 = vmatpush.msra.mxu3 %v1038_v28  ;;  %v990_v52 = vld [vmem:[%s4726_s22 + $0xda0] sm:$0xff]  ;;  %v799_v22 = vld [vmem:[%s4726_s22 + $0x7a8] sm:$0xff] }
  0xbc   : > { %1417 = vmatpush.msra.mxu0 %v646_v29  ;;  %1437 = vmatpush.msra.mxu1 %v774_v30  ;;  %v598_v53 = vld [vmem:[%s4726_s22 + $0x160] sm:$0xff]  ;;  %v927_v23 = vld [vmem:[%s4726_s22 + $0xba8] sm:$0xff] }
  0xbd   : > { %1457 = vmatpush.msra.mxu2 %v902_v31  ;;  %1477 = vmatpush.msra.mxu3 %v1030_v32  ;;  %v726_v54 = vld [vmem:[%s4726_s22 + $0x560] sm:$0xff]  ;;  %v1055_v24 = vld [vmem:[%s4726_s22 + $0xfa8] sm:$0xff] }
  0xbe   : > { %1418 = vmatpush.msra.mxu0 %v638_v33  ;;  %1438 = vmatpush.msra.mxu1 %v766_v34  ;;  %v854_v55 = vld [vmem:[%s4726_s22 + $0x960] sm:$0xff]  ;;  %v663_v25 = vld [vmem:[%s4726_s22 + $0x368] sm:$0xff] }
  0xbf   : > { %1458 = vmatpush.msra.mxu2 %v894_v35  ;;  %1478 = vmatpush.msra.mxu3 %v1022_v36  ;;  %v982_v56 = vld [vmem:[%s4726_s22 + $0xd60] sm:$0xff]  ;;  %v791_v26 = vld [vmem:[%s4726_s22 + $0x768] sm:$0xff] }
  0xc0   : > { %1419 = vmatpush.msra.mxu0 %v630_v37  ;;  %1439 = vmatpush.msra.mxu1 %v758_v38  ;;  %v590_v57 = vld [vmem:[%s4726_s22 + $0x120] sm:$0xff]  ;;  %v919_v27 = vld [vmem:[%s4726_s22 + $0xb68] sm:$0xff] }
  0xc1   : > { %1459 = vmatpush.msra.mxu2 %v886_v39  ;;  %1479 = vmatpush.msra.mxu3 %v1014_v40  ;;  %v718_v58 = vld [vmem:[%s4726_s22 + $0x520] sm:$0xff]  ;;  %v1047_v28 = vld [vmem:[%s4726_s22 + $0xf68] sm:$0xff] }
  0xc2   : > { %1420 = vmatpush.msra.mxu0 %v622_v41  ;;  %1440 = vmatpush.msra.mxu1 %v750_v42  ;;  %v846_v59 = vld [vmem:[%s4726_s22 + $0x920] sm:$0xff]  ;;  %v655_v29 = vld [vmem:[%s4726_s22 + $0x328] sm:$0xff] }
  0xc3   : > { %1460 = vmatpush.msra.mxu2 %v878_v43  ;;  %1480 = vmatpush.msra.mxu3 %v1006_v44  ;;  %v974_v60 = vld [vmem:[%s4726_s22 + $0xd20] sm:$0xff]  ;;  %v783_v30 = vld [vmem:[%s4726_s22 + $0x728] sm:$0xff] }
  0xc4   : > { %1421 = vmatpush.msra.mxu0 %v614_v45  ;;  %1441 = vmatpush.msra.mxu1 %v742_v46  ;;  %v582_v61 = vld [vmem:[%s4726_s22 + $0xe0] sm:$0xff]  ;;  %v911_v31 = vld [vmem:[%s4726_s22 + $0xb28] sm:$0xff] }
  0xc5   : > { %1461 = vmatpush.msra.mxu2 %v870_v47  ;;  %1481 = vmatpush.msra.mxu3 %v998_v48  ;;  %v710_v62 = vld [vmem:[%s4726_s22 + $0x4e0] sm:$0xff]  ;;  %v1039_v32 = vld [vmem:[%s4726_s22 + $0xf28] sm:$0xff] }
  0xc6   : > { %1422 = vmatpush.msra.mxu0 %v606_v49  ;;  %1442 = vmatpush.msra.mxu1 %v734_v50  ;;  %v838_v63 = vld [vmem:[%s4726_s22 + $0x8e0] sm:$0xff]  ;;  %v647_v33 = vld [vmem:[%s4726_s22 + $0x2e8] sm:$0xff] }
  0xc7   : > { %1462 = vmatpush.msra.mxu2 %v862_v51  ;;  %1482 = vmatpush.msra.mxu3 %v990_v52  ;;  %v966_v0 = vld [vmem:[%s4726_s22 + $0xce0] sm:$0xff]  ;;  %v775_v34 = vld [vmem:[%s4726_s22 + $0x6e8] sm:$0xff] }
  0xc8   : > { %1423 = vmatpush.msra.mxu0 %v598_v53  ;;  %1443 = vmatpush.msra.mxu1 %v726_v54  ;;  %v574_v5 = vld [vmem:[%s4726_s22 + $0xa0] sm:$0xff]  ;;  %v903_v35 = vld [vmem:[%s4726_s22 + $0xae8] sm:$0xff] }
  0xc9   : > { %1463 = vmatpush.msra.mxu2 %v854_v55  ;;  %1483 = vmatpush.msra.mxu3 %v982_v56  ;;  %v702_v6 = vld [vmem:[%s4726_s22 + $0x4a0] sm:$0xff]  ;;  %v1031_v36 = vld [vmem:[%s4726_s22 + $0xee8] sm:$0xff] }
  0xca   : > { %1424 = vmatpush.msra.mxu0 %v590_v57  ;;  %1444 = vmatpush.msra.mxu1 %v718_v58  ;;  %v830_v7 = vld [vmem:[%s4726_s22 + $0x8a0] sm:$0xff]  ;;  %v639_v37 = vld [vmem:[%s4726_s22 + $0x2a8] sm:$0xff] }
  0xcb   : > { %1464 = vmatpush.msra.mxu2 %v846_v59  ;;  %1484 = vmatpush.msra.mxu3 %v974_v60  ;;  %v958_v8 = vld [vmem:[%s4726_s22 + $0xca0] sm:$0xff]  ;;  %v767_v38 = vld [vmem:[%s4726_s22 + $0x6a8] sm:$0xff] }
  0xcc   : > { %1425 = vmatpush.msra.mxu0 %v582_v61  ;;  %1445 = vmatpush.msra.mxu1 %v710_v62  ;;  %v566_v9 = vld [vmem:[%s4726_s22 + $0x60] sm:$0xff]  ;;  %v895_v39 = vld [vmem:[%s4726_s22 + $0xaa8] sm:$0xff] }
  0xcd   : > { %1465 = vmatpush.msra.mxu2 %v838_v63  ;;  %1485 = vmatpush.msra.mxu3 %v966_v0  ;;  %v694_v10 = vld [vmem:[%s4726_s22 + $0x460] sm:$0xff]  ;;  %v1023_v40 = vld [vmem:[%s4726_s22 + $0xea8] sm:$0xff] }
  0xce   : > { %1426 = vmatpush.msra.mxu0 %v574_v5  ;;  %1446 = vmatpush.msra.mxu1 %v702_v6  ;;  %v822_v11 = vld [vmem:[%s4726_s22 + $0x860] sm:$0xff]  ;;  %v631_v41 = vld [vmem:[%s4726_s22 + $0x268] sm:$0xff] }
  0xcf   : > { %v950_v12 = vld [vmem:[%s4726_s22 + $0xc60] sm:$0xff]  ;;  %1466 = vmatpush.msra.mxu2 %v830_v7  ;;  %1486 = vmatpush.msra.mxu3 %v958_v8  ;;  %v759_v42 = vld [vmem:[%s4726_s22 + $0x668] sm:$0xff] }
  0xd0   : > { %v558_v13 = vld [vmem:[%s4726_s22 + $0x20] sm:$0xff]  ;;  %1427 = vmatpush.msra.mxu0 %v566_v9  ;;  %1447 = vmatpush.msra.mxu1 %v694_v10  ;;  %v887_v43 = vld [vmem:[%s4726_s22 + $0xa68] sm:$0xff] }
  0xd1   : > { %v686_v14 = vld [vmem:[%s4726_s22 + $0x420] sm:$0xff]  ;;  %1467 = vmatpush.msra.mxu2 %v822_v11  ;;  %1487 = vmatpush.msra.mxu3 %v950_v12  ;;  %v1015_v44 = vld [vmem:[%s4726_s22 + $0xe68] sm:$0xff] }
  0xd2   : > { %v814_v15 = vld [vmem:[%s4726_s22 + $0x820] sm:$0xff]  ;;  %1428 = vmatpush.msra.mxu0 %v558_v13  ;;  %1448 = vmatpush.msra.mxu1 %v686_v14  ;;  %v623_v45 = vld [vmem:[%s4726_s22 + $0x228] sm:$0xff] }
  0xd3   : > { %v942_v16 = vld [vmem:[%s4726_s22 + $0xc20] sm:$0xff]  ;;  %1468 = vmatpush.msra.mxu2 %v814_v15  ;;  %1349 = vmatmul.f32.vlgmr.msrb.gmra.mxu0 %v4860_v1  ;;  %v751_v46 = vld [vmem:[%s4726_s22 + $0x628] sm:$0xff] }
  0xd4   : > { %1488 = vmatpush.msra.mxu3 %v942_v16  ;;  %1369 = vmatmul.f32.vlgmr.msrb.gmra.mxu1 %v4862_v2  ;;  %v879_v47 = vld [vmem:[%s4726_s22 + $0xa28] sm:$0xff]  ;;  %v5124_v55 = vld [vmem:[%s5115_s30] sm:$0xff] }
  0xd5   : > { %1389 = vmatmul.f32.vlgmr.msrb.gmra.mxu2 %v4864_v3  ;;  %1409 = vmatmul.f32.vlgmr.msrb.gmra.mxu3 %v4866_v4  ;;  %v1007_v48 = vld [vmem:[%s4726_s22 + $0xe28] sm:$0xff]  ;;  %v1077_v62 = vperm.slane %v5124_v55, 0 }
  0xd6   : > { %1493 = vmatpush.msrb.mxu0 %v679_v17  ;;  %1513 = vmatpush.msrb.mxu1 %v807_v18  ;;  %v615_v49 = vld [vmem:[%s4726_s22 + $0x1e8] sm:$0xff] }
  0xd7   : > { %1533 = vmatpush.msrb.mxu2 %v935_v19  ;;  %1553 = vmatpush.msrb.mxu3 %v1063_v20  ;;  %v743_v50 = vld [vmem:[%s4726_s22 + $0x5e8] sm:$0xff] }
  0xd8   : > { %1494 = vmatpush.msrb.mxu0 %v671_v21  ;;  %1514 = vmatpush.msrb.mxu1 %v799_v22  ;;  %v871_v51 = vld [vmem:[%s4726_s22 + $0x9e8] sm:$0xff] }
  0xd9   : > { %1534 = vmatpush.msrb.mxu2 %v927_v23  ;;  %1554 = vmatpush.msrb.mxu3 %v1055_v24  ;;  %v999_v52 = vld [vmem:[%s4726_s22 + $0xde8] sm:$0xff] }
  0xda   : > { %1495 = vmatpush.msrb.mxu0 %v663_v25  ;;  %1515 = vmatpush.msrb.mxu1 %v791_v26  ;;  %v607_v53 = vld [vmem:[%s4726_s22 + $0x1a8] sm:$0xff] }
  0xdb   : > { %1535 = vmatpush.msrb.mxu2 %v919_v27  ;;  %1555 = vmatpush.msrb.mxu3 %v1047_v28  ;;  %v735_v54 = vld [vmem:[%s4726_s22 + $0x5a8] sm:$0xff] }
  0xdc   : > { %1496 = vmatpush.msrb.mxu0 %v655_v29  ;;  %1516 = vmatpush.msrb.mxu1 %v783_v30  ;;  %v863_v56 = vld [vmem:[%s4726_s22 + $0x9a8] sm:$0xff]  ;;  %v680_v30 = vld [vmem:[%s4726_s22 + $0x3f0] sm:$0xff] }
  0xdd   : > { %1536 = vmatpush.msrb.mxu2 %v911_v31  ;;  %1556 = vmatpush.msrb.mxu3 %v1039_v32  ;;  %v991_v57 = vld [vmem:[%s4726_s22 + $0xda8] sm:$0xff]  ;;  %v808_v31 = vld [vmem:[%s4726_s22 + $0x7f0] sm:$0xff] }
  0xde   : > { %1497 = vmatpush.msrb.mxu0 %v647_v33  ;;  %1517 = vmatpush.msrb.mxu1 %v775_v34  ;;  %v599_v58 = vld [vmem:[%s4726_s22 + $0x168] sm:$0xff]  ;;  %v936_v33 = vld [vmem:[%s4726_s22 + $0xbf0] sm:$0xff] }
  0xdf   : > { %1537 = vmatpush.msrb.mxu2 %v903_v35  ;;  %1557 = vmatpush.msrb.mxu3 %v1031_v36  ;;  %v727_v59 = vld [vmem:[%s4726_s22 + $0x568] sm:$0xff]  ;;  %v1064_v34 = vld [vmem:[%s4726_s22 + $0xff0] sm:$0xff] }
  0xe0   : > { %1498 = vmatpush.msrb.mxu0 %v639_v37  ;;  %1518 = vmatpush.msrb.mxu1 %v767_v38  ;;  %v855_v60 = vld [vmem:[%s4726_s22 + $0x968] sm:$0xff]  ;;  %v672_v35 = vld [vmem:[%s4726_s22 + $0x3b0] sm:$0xff] }
  0xe1   : > { %1538 = vmatpush.msrb.mxu2 %v895_v39  ;;  %1558 = vmatpush.msrb.mxu3 %v1023_v40  ;;  %v983_v61 = vld [vmem:[%s4726_s22 + $0xd68] sm:$0xff]  ;;  %v800_v36 = vld [vmem:[%s4726_s22 + $0x7b0] sm:$0xff] }
  0xe2   : > { %1499 = vmatpush.msrb.mxu0 %v631_v41  ;;  %1519 = vmatpush.msrb.mxu1 %v759_v42  ;;  %v591_v63 = vld [vmem:[%s4726_s22 + $0x128] sm:$0xff]  ;;  %v928_v37 = vld [vmem:[%s4726_s22 + $0xbb0] sm:$0xff] }
  0xe3   : > { %1539 = vmatpush.msrb.mxu2 %v887_v43  ;;  %1559 = vmatpush.msrb.mxu3 %v1015_v44  ;;  %v719_v0 = vld [vmem:[%s4726_s22 + $0x528] sm:$0xff]  ;;  %v1056_v38 = vld [vmem:[%s4726_s22 + $0xfb0] sm:$0xff] }
  0xe4   : > { %1500 = vmatpush.msrb.mxu0 %v623_v45  ;;  %1520 = vmatpush.msrb.mxu1 %v751_v46  ;;  %v847_v5 = vld [vmem:[%s4726_s22 + $0x928] sm:$0xff]  ;;  %v664_v39 = vld [vmem:[%s4726_s22 + $0x370] sm:$0xff] }
  0xe5   : > { %1540 = vmatpush.msrb.mxu2 %v879_v47  ;;  %1560 = vmatpush.msrb.mxu3 %v1007_v48  ;;  %v975_v6 = vld [vmem:[%s4726_s22 + $0xd28] sm:$0xff]  ;;  %v792_v40 = vld [vmem:[%s4726_s22 + $0x770] sm:$0xff] }
  0xe6   : > { %1501 = vmatpush.msrb.mxu0 %v615_v49  ;;  %1521 = vmatpush.msrb.mxu1 %v743_v50  ;;  %v583_v7 = vld [vmem:[%s4726_s22 + $0xe8] sm:$0xff]  ;;  %v920_v41 = vld [vmem:[%s4726_s22 + $0xb70] sm:$0xff] }
  0xe7   : > { %1541 = vmatpush.msrb.mxu2 %v871_v51  ;;  %1561 = vmatpush.msrb.mxu3 %v999_v52  ;;  %v711_v8 = vld [vmem:[%s4726_s22 + $0x4e8] sm:$0xff]  ;;  %v1048_v42 = vld [vmem:[%s4726_s22 + $0xf70] sm:$0xff] }
  0xe8   : > { %1502 = vmatpush.msrb.mxu0 %v607_v53  ;;  %1522 = vmatpush.msrb.mxu1 %v735_v54  ;;  %v839_v10 = vld [vmem:[%s4726_s22 + $0x8e8] sm:$0xff]  ;;  %v656_v43 = vld [vmem:[%s4726_s22 + $0x330] sm:$0xff] }
  0xe9   : > { %1542 = vmatpush.msrb.mxu2 %v863_v56  ;;  %1562 = vmatpush.msrb.mxu3 %v991_v57  ;;  %v967_v11 = vld [vmem:[%s4726_s22 + $0xce8] sm:$0xff]  ;;  %v784_v44 = vld [vmem:[%s4726_s22 + $0x730] sm:$0xff] }
  0xea   : > { %1503 = vmatpush.msrb.mxu0 %v599_v58  ;;  %1523 = vmatpush.msrb.mxu1 %v727_v59  ;;  %v1110_v9 = vpop.f32.mrf.mxu0  ;;  %v575_v14 = vld [vmem:[%s4726_s22 + $0xa8] sm:$0xff]  ;;  %v912_v45 = vld [vmem:[%s4726_s22 + $0xb30] sm:$0xff] }
  0xeb   : > { %1543 = vmatpush.msrb.mxu2 %v855_v60  ;;  %1563 = vmatpush.msrb.mxu3 %v983_v61  ;;  %v1111_v12 = vadd.f32 %v1110_v9, %v1077_v62  ;;  %v1130_v13 = vpop.f32.mrf.mxu1  ;;  %v703_v15 = vld [vmem:[%s4726_s22 + $0x4a8] sm:$0xff]  ;;  %v1040_v46 = vld [vmem:[%s4726_s22 + $0xf30] sm:$0xff] }
  0xec   : > { %1504 = vmatpush.msrb.mxu0 %v591_v63  ;;  %1524 = vmatpush.msrb.mxu1 %v719_v0  ;;  %v831_v16 = vld [vmem:[%s4726_s22 + $0x8a8] sm:$0xff]  ;;  %v648_v47 = vld [vmem:[%s4726_s22 + $0x2f0] sm:$0xff] }
  0xed   : > { %1544 = vmatpush.msrb.mxu2 %v847_v5  ;;  %1564 = vmatpush.msrb.mxu3 %v975_v6  ;;  %v959_v17 = vld [vmem:[%s4726_s22 + $0xca8] sm:$0xff]  ;;  %v1131_v20 = vadd.f32 %v1130_v13, %v1111_v12  ;;  %v776_v48 = vld [vmem:[%s4726_s22 + $0x6f0] sm:$0xff] }
  0xee   : > { %1505 = vmatpush.msrb.mxu0 %v583_v7  ;;  %1525 = vmatpush.msrb.mxu1 %v711_v8  ;;  %v567_v18 = vld [vmem:[%s4726_s22 + $0x68] sm:$0xff]  ;;  %v904_v49 = vld [vmem:[%s4726_s22 + $0xaf0] sm:$0xff] }
  0xef   : > { %1545 = vmatpush.msrb.mxu2 %v839_v10  ;;  %1565 = vmatpush.msrb.mxu3 %v967_v11  ;;  %v695_v19 = vld [vmem:[%s4726_s22 + $0x468] sm:$0xff]  ;;  %v1032_v50 = vld [vmem:[%s4726_s22 + $0xef0] sm:$0xff] }
  0xf0   : > { %1506 = vmatpush.msrb.mxu0 %v575_v14  ;;  %1526 = vmatpush.msrb.mxu1 %v703_v15  ;;  %v823_v21 = vld [vmem:[%s4726_s22 + $0x868] sm:$0xff]  ;;  %v640_v51 = vld [vmem:[%s4726_s22 + $0x2b0] sm:$0xff] }
  0xf1   : > { %v951_v22 = vld [vmem:[%s4726_s22 + $0xc68] sm:$0xff]  ;;  %1546 = vmatpush.msrb.mxu2 %v831_v16  ;;  %1566 = vmatpush.msrb.mxu3 %v959_v17  ;;  %v768_v52 = vld [vmem:[%s4726_s22 + $0x6b0] sm:$0xff]  ;;  %v1078_v16 = vperm.slane %v5124_v55, 1 }
  0xf2   : > { %v559_v23 = vld [vmem:[%s4726_s22 + $0x28] sm:$0xff]  ;;  %1507 = vmatpush.msrb.mxu0 %v567_v18  ;;  %1527 = vmatpush.msrb.mxu1 %v695_v19  ;;  %v1150_v27 = vpop.f32.mrf.mxu2  ;;  %v1170_v28 = vpop.f32.mrf.mxu3  ;;  %v896_v53 = vld [vmem:[%s4726_s22 + $0xab0] sm:$0xff] }
  0xf3   : > { %v687_v24 = vld [vmem:[%s4726_s22 + $0x428] sm:$0xff]  ;;  %1547 = vmatpush.msrb.mxu2 %v823_v21  ;;  %1567 = vmatpush.msrb.mxu3 %v951_v22  ;;  %v1151_v29 = vadd.f32 %v1150_v27, %v1131_v20  ;;  %v1024_v54 = vld [vmem:[%s4726_s22 + $0xeb0] sm:$0xff] }
  0xf4   : > { %v815_v25 = vld [vmem:[%s4726_s22 + $0x828] sm:$0xff]  ;;  %1508 = vmatpush.msrb.mxu0 %v559_v23  ;;  %1528 = vmatpush.msrb.mxu1 %v687_v24  ;;  %v632_v56 = vld [vmem:[%s4726_s22 + $0x270] sm:$0xff] }
  0xf5   : > { %v943_v26 = vld [vmem:[%s4726_s22 + $0xc28] sm:$0xff]  ;;  %1548 = vmatpush.msrb.mxu2 %v815_v25  ;;  %v5155_v32 = vadd.f32 %v1170_v28, %v1151_v29  ;;  %1429 = vmatmul.f32.vlgmr.msra.gmra.mxu0 %v4860_v1  ;;  %v760_v57 = vld [vmem:[%s4726_s22 + $0x670] sm:$0xff] }
  0xf6   : > { %1568 = vmatpush.msrb.mxu3 %v943_v26  ;;  %1449 = vmatmul.f32.vlgmr.msra.gmra.mxu1 %v4862_v2  ;;  %v888_v58 = vld [vmem:[%s4726_s22 + $0xa70] sm:$0xff] }
  0xf7   : > { %1469 = vmatmul.f32.vlgmr.msra.gmra.mxu2 %v4864_v3  ;;  %1489 = vmatmul.f32.vlgmr.msra.gmra.mxu3 %v4866_v4  ;;  %v1016_v59 = vld [vmem:[%s4726_s22 + $0xe70] sm:$0xff] }
  0xf8   : > { %1573 = vmatpush.msra.mxu0 %v680_v30  ;;  %1593 = vmatpush.msra.mxu1 %v808_v31  ;;  %v624_v60 = vld [vmem:[%s4726_s22 + $0x230] sm:$0xff] }
  0xf9   : > { %1613 = vmatpush.msra.mxu2 %v936_v33  ;;  %1633 = vmatpush.msra.mxu3 %v1064_v34  ;;  %v752_v61 = vld [vmem:[%s4726_s22 + $0x630] sm:$0xff] }
  0xfa   : > { %1574 = vmatpush.msra.mxu0 %v672_v35  ;;  %1594 = vmatpush.msra.mxu1 %v800_v36  ;;  %v880_v62 = vld [vmem:[%s4726_s22 + $0xa30] sm:$0xff] }
  0xfb   : > { %1614 = vmatpush.msra.mxu2 %v928_v37  ;;  %1634 = vmatpush.msra.mxu3 %v1056_v38  ;;  %v1008_v63 = vld [vmem:[%s4726_s22 + $0xe30] sm:$0xff] }
  0xfc   : > { %1575 = vmatpush.msra.mxu0 %v664_v39  ;;  %1595 = vmatpush.msra.mxu1 %v792_v40  ;;  %v616_v0 = vld [vmem:[%s4726_s22 + $0x1f0] sm:$0xff] }
  0xfd   : > { %1615 = vmatpush.msra.mxu2 %v920_v41  ;;  %1635 = vmatpush.msra.mxu3 %v1048_v42  ;;  %v744_v5 = vld [vmem:[%s4726_s22 + $0x5f0] sm:$0xff] }
  0xfe   : > { %1576 = vmatpush.msra.mxu0 %v656_v43  ;;  %1596 = vmatpush.msra.mxu1 %v784_v44  ;;  %v872_v6 = vld [vmem:[%s4726_s22 + $0x9f0] sm:$0xff] }
  0xff   : > { %1616 = vmatpush.msra.mxu2 %v912_v45  ;;  %1636 = vmatpush.msra.mxu3 %v1040_v46  ;;  %v1000_v7 = vld [vmem:[%s4726_s22 + $0xdf0] sm:$0xff]  ;;  %v681_v45 = vld [vmem:[%s4726_s22 + $0x3f8] sm:$0xff] }
 0x100   : > { %1577 = vmatpush.msra.mxu0 %v648_v47  ;;  %1597 = vmatpush.msra.mxu1 %v776_v48  ;;  %v608_v8 = vld [vmem:[%s4726_s22 + $0x1b0] sm:$0xff]  ;;  %v809_v46 = vld [vmem:[%s4726_s22 + $0x7f8] sm:$0xff] }
 0x101   : > { %1617 = vmatpush.msra.mxu2 %v904_v49  ;;  %1637 = vmatpush.msra.mxu3 %v1032_v50  ;;  %v736_v9 = vld [vmem:[%s4726_s22 + $0x5b0] sm:$0xff]  ;;  %v937_v48 = vld [vmem:[%s4726_s22 + $0xbf8] sm:$0xff] }
 0x102   : > { %1578 = vmatpush.msra.mxu0 %v640_v51  ;;  %1598 = vmatpush.msra.mxu1 %v768_v52  ;;  %v864_v10 = vld [vmem:[%s4726_s22 + $0x9b0] sm:$0xff]  ;;  %v1065_v49 = vld [vmem:[%s4726_s22 + $0xff8] sm:$0xff] }
 0x103   : > { %1618 = vmatpush.msra.mxu2 %v896_v53  ;;  %1638 = vmatpush.msra.mxu3 %v1024_v54  ;;  %v992_v11 = vld [vmem:[%s4726_s22 + $0xdb0] sm:$0xff]  ;;  %v673_v50 = vld [vmem:[%s4726_s22 + $0x3b8] sm:$0xff] }
 0x104   : > { %1579 = vmatpush.msra.mxu0 %v632_v56  ;;  %1599 = vmatpush.msra.mxu1 %v760_v57  ;;  %v600_v12 = vld [vmem:[%s4726_s22 + $0x170] sm:$0xff]  ;;  %v801_v51 = vld [vmem:[%s4726_s22 + $0x7b8] sm:$0xff] }
 0x105   : > { %1619 = vmatpush.msra.mxu2 %v888_v58  ;;  %1639 = vmatpush.msra.mxu3 %v1016_v59  ;;  %v728_v13 = vld [vmem:[%s4726_s22 + $0x570] sm:$0xff]  ;;  %v929_v52 = vld [vmem:[%s4726_s22 + $0xbb8] sm:$0xff] }
 0x106   : > { %1580 = vmatpush.msra.mxu0 %v624_v60  ;;  %1600 = vmatpush.msra.mxu1 %v752_v61  ;;  %v856_v14 = vld [vmem:[%s4726_s22 + $0x970] sm:$0xff]  ;;  %v1057_v53 = vld [vmem:[%s4726_s22 + $0xfb8] sm:$0xff] }
 0x107   : > { %1620 = vmatpush.msra.mxu2 %v880_v62  ;;  %1640 = vmatpush.msra.mxu3 %v1008_v63  ;;  %v984_v15 = vld [vmem:[%s4726_s22 + $0xd70] sm:$0xff]  ;;  %v665_v54 = vld [vmem:[%s4726_s22 + $0x378] sm:$0xff] }
 0x108   : > { %1581 = vmatpush.msra.mxu0 %v616_v0  ;;  %1601 = vmatpush.msra.mxu1 %v744_v5  ;;  %v592_v17 = vld [vmem:[%s4726_s22 + $0x130] sm:$0xff]  ;;  %v793_v56 = vld [vmem:[%s4726_s22 + $0x778] sm:$0xff] }
 0x109   : > { %1621 = vmatpush.msra.mxu2 %v872_v6  ;;  %1641 = vmatpush.msra.mxu3 %v1000_v7  ;;  %v720_v18 = vld [vmem:[%s4726_s22 + $0x530] sm:$0xff]  ;;  %v921_v57 = vld [vmem:[%s4726_s22 + $0xb78] sm:$0xff] }
 0x10a   : > { %1582 = vmatpush.msra.mxu0 %v608_v8  ;;  %1602 = vmatpush.msra.mxu1 %v736_v9  ;;  %v848_v19 = vld [vmem:[%s4726_s22 + $0x930] sm:$0xff]  ;;  %v1049_v58 = vld [vmem:[%s4726_s22 + $0xf78] sm:$0xff] }
 0x10b   : > { %1622 = vmatpush.msra.mxu2 %v864_v10  ;;  %1642 = vmatpush.msra.mxu3 %v992_v11  ;;  %v976_v20 = vld [vmem:[%s4726_s22 + $0xd30] sm:$0xff]  ;;  %v657_v59 = vld [vmem:[%s4726_s22 + $0x338] sm:$0xff] }
 0x10c   : > { %1583 = vmatpush.msra.mxu0 %v600_v12  ;;  %1603 = vmatpush.msra.mxu1 %v728_v13  ;;  %v584_v21 = vld [vmem:[%s4726_s22 + $0xf0] sm:$0xff]  ;;  %v1190_v23 = vpop.f32.mrf.mxu0  ;;  %v785_v60 = vld [vmem:[%s4726_s22 + $0x738] sm:$0xff] }
 0x10d   : > { %1623 = vmatpush.msra.mxu2 %v856_v14  ;;  %1643 = vmatpush.msra.mxu3 %v984_v15  ;;  %v712_v22 = vld [vmem:[%s4726_s22 + $0x4f0] sm:$0xff]  ;;  %v1210_v24 = vpop.f32.mrf.mxu1  ;;  %v1191_v27 = vadd.f32 %v1190_v23, %v1078_v16  ;;  %v913_v61 = vld [vmem:[%s4726_s22 + $0xb38] sm:$0xff] }
 0x10e   : > { %1584 = vmatpush.msra.mxu0 %v592_v17  ;;  %1604 = vmatpush.msra.mxu1 %v720_v18  ;;  %v840_v25 = vld [vmem:[%s4726_s22 + $0x8f0] sm:$0xff]  ;;  %v1041_v62 = vld [vmem:[%s4726_s22 + $0xf38] sm:$0xff] }
 0x10f   : > { %v968_v26 = vld [vmem:[%s4726_s22 + $0xcf0] sm:$0xff]  ;;  %1624 = vmatpush.msra.mxu2 %v848_v19  ;;  %1644 = vmatpush.msra.mxu3 %v976_v20  ;;  %v1211_v33 = vadd.f32 %v1210_v24, %v1191_v27  ;;  %v649_v63 = vld [vmem:[%s4726_s22 + $0x2f8] sm:$0xff] }
 0x110   : > { %v576_v28 = vld [vmem:[%s4726_s22 + $0xb0] sm:$0xff]  ;;  %1585 = vmatpush.msra.mxu0 %v584_v21  ;;  %1605 = vmatpush.msra.mxu1 %v712_v22  ;;  %v777_v0 = vld [vmem:[%s4726_s22 + $0x6f8] sm:$0xff] }
 0x111   : > { %v704_v29 = vld [vmem:[%s4726_s22 + $0x4b0] sm:$0xff]  ;;  %1625 = vmatpush.msra.mxu2 %v840_v25  ;;  %1645 = vmatpush.msra.mxu3 %v968_v26  ;;  %v905_v5 = vld [vmem:[%s4726_s22 + $0xaf8] sm:$0xff] }
 0x112   : > { %v832_v30 = vld [vmem:[%s4726_s22 + $0x8b0] sm:$0xff]  ;;  %1586 = vmatpush.msra.mxu0 %v576_v28  ;;  %1606 = vmatpush.msra.mxu1 %v704_v29  ;;  %v1033_v6 = vld [vmem:[%s4726_s22 + $0xef8] sm:$0xff] }
 0x113   : > { %v960_v31 = vld [vmem:[%s4726_s22 + $0xcb0] sm:$0xff]  ;;  %1626 = vmatpush.msra.mxu2 %v832_v30  ;;  %1509 = vmatmul.f32.vlgmr.msrb.gmra.mxu0 %v4860_v1  ;;  %v641_v7 = vld [vmem:[%s4726_s22 + $0x2b8] sm:$0xff] }
 0x114   : > { %v568_v34 = vld [vmem:[%s4726_s22 + $0x70] sm:$0xff]  ;;  %1646 = vmatpush.msra.mxu3 %v960_v31  ;;  %v1230_v42 = vpop.f32.mrf.mxu2  ;;  %v1250_v43 = vpop.f32.mrf.mxu3  ;;  %1529 = vmatmul.f32.vlgmr.msrb.gmra.mxu1 %v4862_v2  ;;  %v769_v8 = vld [vmem:[%s4726_s22 + $0x6b8] sm:$0xff]  ;;  %v1079_v31 = vperm.slane %v5124_v55, 2 }
 0x115   : > { %v696_v35 = vld [vmem:[%s4726_s22 + $0x470] sm:$0xff]  ;;  %1587 = vmatpush.msra.mxu0 %v568_v34  ;;  %v1231_v44 = vadd.f32 %v1230_v42, %v1211_v33  ;;  %1549 = vmatmul.f32.vlgmr.msrb.gmra.mxu2 %v4864_v3  ;;  %v897_v9 = vld [vmem:[%s4726_s22 + $0xab8] sm:$0xff] }
 0x116   : > { %v824_v36 = vld [vmem:[%s4726_s22 + $0x870] sm:$0xff]  ;;  %1607 = vmatpush.msra.mxu1 %v696_v35  ;;  %1569 = vmatmul.f32.vlgmr.msrb.gmra.mxu3 %v4866_v4  ;;  %v1025_v10 = vld [vmem:[%s4726_s22 + $0xeb8] sm:$0xff] }
 0x117   : > { %v952_v37 = vld [vmem:[%s4726_s22 + $0xc70] sm:$0xff]  ;;  %1627 = vmatpush.msra.mxu2 %v824_v36  ;;  %v5226_v47 = vadd.f32 %v1250_v43, %v1231_v44  ;;  %v633_v11 = vld [vmem:[%s4726_s22 + $0x278] sm:$0xff] }
 0x118   : > { %v560_v38 = vld [vmem:[%s4726_s22 + $0x30] sm:$0xff]  ;;  %1647 = vmatpush.msra.mxu3 %v952_v37  ;;  %v761_v12 = vld [vmem:[%s4726_s22 + $0x678] sm:$0xff] }
 0x119   : > { %v688_v39 = vld [vmem:[%s4726_s22 + $0x430] sm:$0xff]  ;;  %1588 = vmatpush.msra.mxu0 %v560_v38  ;;  %v889_v13 = vld [vmem:[%s4726_s22 + $0xa78] sm:$0xff] }
 0x11a   : > { %v816_v40 = vld [vmem:[%s4726_s22 + $0x830] sm:$0xff]  ;;  %1608 = vmatpush.msra.mxu1 %v688_v39  ;;  %v1017_v14 = vld [vmem:[%s4726_s22 + $0xe78] sm:$0xff] }
 0x11b   : > { %v944_v41 = vld [vmem:[%s4726_s22 + $0xc30] sm:$0xff]  ;;  %1628 = vmatpush.msra.mxu2 %v816_v40  ;;  %1653 = vmatpush.msrb.mxu0 %v681_v45  ;;  %v625_v15 = vld [vmem:[%s4726_s22 + $0x238] sm:$0xff] }
 0x11c   : > { %1648 = vmatpush.msra.mxu3 %v944_v41  ;;  %1673 = vmatpush.msrb.mxu1 %v809_v46  ;;  %v753_v16 = vld [vmem:[%s4726_s22 + $0x638] sm:$0xff] }
 0x11d   : > { %1693 = vmatpush.msrb.mxu2 %v937_v48  ;;  %1654 = vmatpush.msrb.mxu0 %v673_v50  ;;  %v881_v17 = vld [vmem:[%s4726_s22 + $0xa38] sm:$0xff] }
 0x11e   : > { %1713 = vmatpush.msrb.mxu3 %v1065_v49  ;;  %1674 = vmatpush.msrb.mxu1 %v801_v51  ;;  %v1009_v18 = vld [vmem:[%s4726_s22 + $0xe38] sm:$0xff] }
 0x11f   : > { %1694 = vmatpush.msrb.mxu2 %v929_v52  ;;  %1655 = vmatpush.msrb.mxu0 %v665_v54  ;;  %v617_v19 = vld [vmem:[%s4726_s22 + $0x1f8] sm:$0xff] }
 0x120   : > { %1714 = vmatpush.msrb.mxu3 %v1057_v53  ;;  %1675 = vmatpush.msrb.mxu1 %v793_v56  ;;  %v745_v20 = vld [vmem:[%s4726_s22 + $0x5f8] sm:$0xff] }
 0x121   : > { %1695 = vmatpush.msrb.mxu2 %v921_v57  ;;  %1656 = vmatpush.msrb.mxu0 %v657_v59  ;;  %v873_v21 = vld [vmem:[%s4726_s22 + $0x9f8] sm:$0xff] }
 0x122   : > { %1715 = vmatpush.msrb.mxu3 %v1049_v58  ;;  %1676 = vmatpush.msrb.mxu1 %v785_v60  ;;  %v1001_v22 = vld [vmem:[%s4726_s22 + $0xdf8] sm:$0xff] }
 0x123   : > { %1696 = vmatpush.msrb.mxu2 %v913_v61  ;;  %1657 = vmatpush.msrb.mxu0 %v649_v63  ;;  %v609_v23 = vld [vmem:[%s4726_s22 + $0x1b8] sm:$0xff]  ;;  %v1981_v63 = vld [vmem:[%s5297_s15 + $0x7c0] sm:$0xff] }
 0x124   : > { %1716 = vmatpush.msrb.mxu3 %v1041_v62  ;;  %1677 = vmatpush.msrb.mxu1 %v777_v0  ;;  %v737_v24 = vld [vmem:[%s4726_s22 + $0x5b8] sm:$0xff]  ;;  %v1853_v62 = vld [vmem:[%s5297_s15 + $0x3c0] sm:$0xff] }
 0x125   : > { %1697 = vmatpush.msrb.mxu2 %v905_v5  ;;  %1658 = vmatpush.msrb.mxu0 %v641_v7  ;;  %v865_v25 = vld [vmem:[%s4726_s22 + $0x9b8] sm:$0xff]  ;;  %v2109_v5 = vld [vmem:[%s5297_s15 + $0xbc0] sm:$0xff] }
 0x126   : > { %1717 = vmatpush.msrb.mxu3 %v1033_v6  ;;  %1678 = vmatpush.msrb.mxu1 %v769_v8  ;;  %v993_v26 = vld [vmem:[%s4726_s22 + $0xdb8] sm:$0xff]  ;;  %v2237_v6 = vld [vmem:[%s5297_s15 + $0xfc0] sm:$0xff] }
 0x127   : > { %1698 = vmatpush.msrb.mxu2 %v897_v9  ;;  %1659 = vmatpush.msrb.mxu0 %v633_v11  ;;  %v601_v27 = vld [vmem:[%s4726_s22 + $0x178] sm:$0xff]  ;;  %v1845_v7 = vld [vmem:[%s5297_s15 + $0x380] sm:$0xff] }
 0x128   : > { %1718 = vmatpush.msrb.mxu3 %v1025_v10  ;;  %1679 = vmatpush.msrb.mxu1 %v761_v12  ;;  %v729_v28 = vld [vmem:[%s4726_s22 + $0x578] sm:$0xff]  ;;  %v1973_v8 = vld [vmem:[%s5297_s15 + $0x780] sm:$0xff] }
 0x129   : > { %1699 = vmatpush.msrb.mxu2 %v889_v13  ;;  %1660 = vmatpush.msrb.mxu0 %v625_v15  ;;  %v857_v29 = vld [vmem:[%s4726_s22 + $0x978] sm:$0xff]  ;;  %v2101_v9 = vld [vmem:[%s5297_s15 + $0xb80] sm:$0xff] }
 0x12a   : > { %1719 = vmatpush.msrb.mxu3 %v1017_v14  ;;  %1680 = vmatpush.msrb.mxu1 %v753_v16  ;;  %v985_v30 = vld [vmem:[%s4726_s22 + $0xd78] sm:$0xff]  ;;  %v2229_v10 = vld [vmem:[%s5297_s15 + $0xf80] sm:$0xff] }
 0x12b   : > { %1700 = vmatpush.msrb.mxu2 %v881_v17  ;;  %1661 = vmatpush.msrb.mxu0 %v617_v19  ;;  %v593_v33 = vld [vmem:[%s4726_s22 + $0x138] sm:$0xff]  ;;  %v1837_v11 = vld [vmem:[%s5297_s15 + $0x340] sm:$0xff] }
 0x12c   : > { %1720 = vmatpush.msrb.mxu3 %v1009_v18  ;;  %1681 = vmatpush.msrb.mxu1 %v745_v20  ;;  %v721_v34 = vld [vmem:[%s4726_s22 + $0x538] sm:$0xff]  ;;  %v1965_v12 = vld [vmem:[%s5297_s15 + $0x740] sm:$0xff] }
 0x12d   : > { %1701 = vmatpush.msrb.mxu2 %v873_v21  ;;  %1662 = vmatpush.msrb.mxu0 %v609_v23  ;;  %v849_v35 = vld [vmem:[%s4726_s22 + $0x938] sm:$0xff]  ;;  %v2093_v13 = vld [vmem:[%s5297_s15 + $0xb40] sm:$0xff] }
 0x12e   : > { %1721 = vmatpush.msrb.mxu3 %v1001_v22  ;;  %1682 = vmatpush.msrb.mxu1 %v737_v24  ;;  %v977_v36 = vld [vmem:[%s4726_s22 + $0xd38] sm:$0xff]  ;;  %v1270_v39 = vpop.f32.mrf.mxu0  ;;  %v2221_v14 = vld [vmem:[%s5297_s15 + $0xf40] sm:$0xff] }
 0x12f   : > { %1702 = vmatpush.msrb.mxu2 %v865_v25  ;;  %1663 = vmatpush.msrb.mxu0 %v601_v27  ;;  %v585_v37 = vld [vmem:[%s4726_s22 + $0xf8] sm:$0xff]  ;;  %v1290_v40 = vpop.f32.mrf.mxu1  ;;  %v1271_v43 = vadd.f32 %v1270_v39, %v1079_v31  ;;  %v1829_v15 = vld [vmem:[%s5297_s15 + $0x300] sm:$0xff] }
 0x130   : > { %1722 = vmatpush.msrb.mxu3 %v993_v26  ;;  %1683 = vmatpush.msrb.mxu1 %v729_v28  ;;  %v713_v38 = vld [vmem:[%s4726_s22 + $0x4f8] sm:$0xff]  ;;  %v1957_v16 = vld [vmem:[%s5297_s15 + $0x700] sm:$0xff] }
 0x131   : > { %1703 = vmatpush.msrb.mxu2 %v857_v29  ;;  %1664 = vmatpush.msrb.mxu0 %v593_v33  ;;  %v841_v41 = vld [vmem:[%s4726_s22 + $0x8f8] sm:$0xff]  ;;  %v1291_v49 = vadd.f32 %v1290_v40, %v1271_v43  ;;  %v2085_v17 = vld [vmem:[%s5297_s15 + $0xb00] sm:$0xff] }
 0x132   : > { %1723 = vmatpush.msrb.mxu3 %v985_v30  ;;  %1684 = vmatpush.msrb.mxu1 %v721_v34  ;;  %v969_v42 = vld [vmem:[%s4726_s22 + $0xcf8] sm:$0xff]  ;;  %v2213_v18 = vld [vmem:[%s5297_s15 + $0xf00] sm:$0xff] }
 0x133   : > { %1704 = vmatpush.msrb.mxu2 %v849_v35  ;;  %v577_v44 = vld [vmem:[%s4726_s22 + $0xb8] sm:$0xff]  ;;  %1665 = vmatpush.msrb.mxu0 %v585_v37  ;;  %v1821_v19 = vld [vmem:[%s5297_s15 + $0x2c0] sm:$0xff] }
 0x134   : > { %1724 = vmatpush.msrb.mxu3 %v977_v36  ;;  %v705_v45 = vld [vmem:[%s4726_s22 + $0x4b8] sm:$0xff]  ;;  %1685 = vmatpush.msrb.mxu1 %v713_v38  ;;  %v1949_v20 = vld [vmem:[%s5297_s15 + $0x6c0] sm:$0xff] }
 0x135   : > { %v833_v46 = vld [vmem:[%s4726_s22 + $0x8b8] sm:$0xff]  ;;  %1705 = vmatpush.msrb.mxu2 %v841_v41  ;;  %1666 = vmatpush.msrb.mxu0 %v577_v44  ;;  %v2077_v21 = vld [vmem:[%s5297_s15 + $0xac0] sm:$0xff] }
 0x136   : > { %v961_v48 = vld [vmem:[%s4726_s22 + $0xcb8] sm:$0xff]  ;;  %1725 = vmatpush.msrb.mxu3 %v969_v42  ;;  %1686 = vmatpush.msrb.mxu1 %v705_v45  ;;  %v1310_v59 = vpop.f32.mrf.mxu2  ;;  %v1330_v60 = vpop.f32.mrf.mxu3  ;;  %v2205_v22 = vld [vmem:[%s5297_s15 + $0xec0] sm:$0xff] }
 0x137   : > { %v569_v50 = vld [vmem:[%s4726_s22 + $0x78] sm:$0xff]  ;;  %1706 = vmatpush.msrb.mxu2 %v833_v46  ;;  %v1311_v61 = vadd.f32 %v1310_v59, %v1291_v49  ;;  %1589 = vmatmul.f32.vlgmr.msra.gmra.mxu0 %v4860_v1  ;;  %v1813_v23 = vld [vmem:[%s5297_s15 + $0x280] sm:$0xff]  ;;  %v1080_v49 = vperm.slane %v5124_v55, 3 }
 0x138   : > { %v697_v51 = vld [vmem:[%s4726_s22 + $0x478] sm:$0xff]  ;;  %1726 = vmatpush.msrb.mxu3 %v961_v48  ;;  %1667 = vmatpush.msrb.mxu0 %v569_v50  ;;  %v1941_v24 = vld [vmem:[%s5297_s15 + $0x680] sm:$0xff] }
 0x139   : > { %v825_v52 = vld [vmem:[%s4726_s22 + $0x878] sm:$0xff]  ;;  %1687 = vmatpush.msrb.mxu1 %v697_v51  ;;  %v5303_v0 = vadd.f32 %v1330_v60, %v1311_v61  ;;  %1629 = vmatmul.f32.vlgmr.msra.gmra.mxu2 %v4864_v3  ;;  %v2069_v25 = vld [vmem:[%s5297_s15 + $0xa80] sm:$0xff] }
 0x13a   : > { %v953_v53 = vld [vmem:[%s4726_s22 + $0xc78] sm:$0xff]  ;;  %1707 = vmatpush.msrb.mxu2 %v825_v52  ;;  %1609 = vmatmul.f32.vlgmr.msra.gmra.mxu1 %v4862_v2  ;;  %v2197_v26 = vld [vmem:[%s5297_s15 + $0xe80] sm:$0xff] }
 0x13b   : > { %v561_v54 = vld [vmem:[%s4726_s22 + $0x38] sm:$0xff]  ;;  %1727 = vmatpush.msrb.mxu3 %v953_v53  ;;  %v1805_v27 = vld [vmem:[%s5297_s15 + $0x240] sm:$0xff] }
 0x13c   : > { %v689_v56 = vld [vmem:[%s4726_s22 + $0x438] sm:$0xff]  ;;  %1668 = vmatpush.msrb.mxu0 %v561_v54  ;;  %1649 = vmatmul.f32.vlgmr.msra.gmra.mxu3 %v4866_v4  ;;  %v1933_v28 = vld [vmem:[%s5297_s15 + $0x640] sm:$0xff] }
 0x13d   : > { %v817_v57 = vld [vmem:[%s4726_s22 + $0x838] sm:$0xff]  ;;  %1688 = vmatpush.msrb.mxu1 %v689_v56  ;;  %v2061_v29 = vld [vmem:[%s5297_s15 + $0xa40] sm:$0xff] }
 0x13e   : > { %v945_v58 = vld [vmem:[%s4726_s22 + $0xc38] sm:$0xff]  ;;  %1708 = vmatpush.msrb.mxu2 %v817_v57  ;;  %2509 = vmatpush.msra.mxu0 %v1853_v62  ;;  %v2189_v30 = vld [vmem:[%s5297_s15 + $0xe40] sm:$0xff] }
 0x13f   : > { %1728 = vmatpush.msrb.mxu3 %v945_v58  ;;  %2529 = vmatpush.msra.mxu1 %v1981_v63  ;;  %v1797_v31 = vld [vmem:[%s5297_s15 + $0x200] sm:$0xff] }
 0x140   : > { %2549 = vmatpush.msra.mxu2 %v2109_v5  ;;  %2510 = vmatpush.msra.mxu0 %v1845_v7  ;;  %v1925_v33 = vld [vmem:[%s5297_s15 + $0x600] sm:$0xff] }
 0x141   : > { %2569 = vmatpush.msra.mxu3 %v2237_v6  ;;  %2530 = vmatpush.msra.mxu1 %v1973_v8  ;;  %v2053_v34 = vld [vmem:[%s5297_s15 + $0xa00] sm:$0xff] }
 0x142   : > { %2550 = vmatpush.msra.mxu2 %v2101_v9  ;;  %2511 = vmatpush.msra.mxu0 %v1837_v11  ;;  %v2181_v35 = vld [vmem:[%s5297_s15 + $0xe00] sm:$0xff] }
 0x143   : > { %2570 = vmatpush.msra.mxu3 %v2229_v10  ;;  %2531 = vmatpush.msra.mxu1 %v1965_v12  ;;  %v1789_v36 = vld [vmem:[%s5297_s15 + $0x1c0] sm:$0xff] }
 0x144   : > { %2551 = vmatpush.msra.mxu2 %v2093_v13  ;;  %2512 = vmatpush.msra.mxu0 %v1829_v15  ;;  %v1917_v37 = vld [vmem:[%s5297_s15 + $0x5c0] sm:$0xff] }
 0x145   : > { %2571 = vmatpush.msra.mxu3 %v2221_v14  ;;  %2532 = vmatpush.msra.mxu1 %v1957_v16  ;;  %v2045_v38 = vld [vmem:[%s5297_s15 + $0x9c0] sm:$0xff] }
 0x146   : > { %2552 = vmatpush.msra.mxu2 %v2085_v17  ;;  %2513 = vmatpush.msra.mxu0 %v1821_v19  ;;  %v2173_v39 = vld [vmem:[%s5297_s15 + $0xdc0] sm:$0xff]  ;;  %v5384_v19 = vld [vmem:[%s6862_s0 + $0x10] sm:$0xff] }
 0x147   : > { %2572 = vmatpush.msra.mxu3 %v2213_v18  ;;  %2533 = vmatpush.msra.mxu1 %v1949_v20  ;;  %v1781_v40 = vld [vmem:[%s5297_s15 + $0x180] sm:$0xff] }
 0x148   : > { %2553 = vmatpush.msra.mxu2 %v2077_v21  ;;  %2514 = vmatpush.msra.mxu0 %v1813_v23  ;;  %v1909_v41 = vld [vmem:[%s5297_s15 + $0x580] sm:$0xff]  ;;  %v1854_v23 = vld [vmem:[%s5297_s15 + $0x3c8] sm:$0xff] }
 0x149   : > { %2573 = vmatpush.msra.mxu3 %v2205_v22  ;;  %2534 = vmatpush.msra.mxu1 %v1941_v24  ;;  %v2037_v42 = vld [vmem:[%s5297_s15 + $0x980] sm:$0xff]  ;;  %v1982_v24 = vld [vmem:[%s5297_s15 + $0x7c8] sm:$0xff] }
 0x14a   : > { %2554 = vmatpush.msra.mxu2 %v2069_v25  ;;  %2515 = vmatpush.msra.mxu0 %v1805_v27  ;;  %v2165_v43 = vld [vmem:[%s5297_s15 + $0xd80] sm:$0xff]  ;;  %v5397_v25 = vld [vmem:[%s6862_s0 + $0x8] sm:$0xff] }
 0x14b   : > { %2574 = vmatpush.msra.mxu3 %v2197_v26  ;;  %2535 = vmatpush.msra.mxu1 %v1933_v28  ;;  %v1773_v44 = vld [vmem:[%s5297_s15 + $0x140] sm:$0xff]  ;;  %v5402_v26 = vld [vmem:[%s6862_s0 + $0x18] sm:$0xff] }
 0x14c   : > { %2555 = vmatpush.msra.mxu2 %v2061_v29  ;;  %2516 = vmatpush.msra.mxu0 %v1797_v31  ;;  %v1901_v45 = vld [vmem:[%s5297_s15 + $0x540] sm:$0xff]  ;;  %v1846_v29 = vld [vmem:[%s5297_s15 + $0x388] sm:$0xff] }
 0x14d   : > { %2575 = vmatpush.msra.mxu3 %v2189_v30  ;;  %2536 = vmatpush.msra.mxu1 %v1925_v33  ;;  %v2029_v46 = vld [vmem:[%s5297_s15 + $0x940] sm:$0xff]  ;;  %v1974_v30 = vld [vmem:[%s5297_s15 + $0x788] sm:$0xff] }
 0x14e   : > { %2556 = vmatpush.msra.mxu2 %v2053_v34  ;;  %2517 = vmatpush.msra.mxu0 %v1789_v36  ;;  %v2157_v48 = vld [vmem:[%s5297_s15 + $0xd40] sm:$0xff]  ;;  %v1838_v34 = vld [vmem:[%s5297_s15 + $0x348] sm:$0xff] }
 0x14f   : > { %2576 = vmatpush.msra.mxu3 %v2181_v35  ;;  %2537 = vmatpush.msra.mxu1 %v1917_v37  ;;  %v1765_v50 = vld [vmem:[%s5297_s15 + $0x100] sm:$0xff]  ;;  %v1966_v35 = vld [vmem:[%s5297_s15 + $0x748] sm:$0xff] }
 0x150   : > { %2557 = vmatpush.msra.mxu2 %v2045_v38  ;;  %2518 = vmatpush.msra.mxu0 %v1781_v40  ;;  %v1893_v51 = vld [vmem:[%s5297_s15 + $0x500] sm:$0xff]  ;;  %v1350_v54 = vpop.f32.mrf.mxu0  ;;  %v1830_v38 = vld [vmem:[%s5297_s15 + $0x308] sm:$0xff] }
 0x151   : > { %2577 = vmatpush.msra.mxu3 %v2173_v39  ;;  %2538 = vmatpush.msra.mxu1 %v1909_v41  ;;  %v2021_v52 = vld [vmem:[%s5297_s15 + $0x900] sm:$0xff]  ;;  %v1370_v56 = vpop.f32.mrf.mxu1  ;;  %v1351_v58 = vadd.f32 %v1350_v54, %v1080_v49  ;;  %v1958_v39 = vld [vmem:[%s5297_s15 + $0x708] sm:$0xff] }
 0x152   : > { %2558 = vmatpush.msra.mxu2 %v2037_v42  ;;  %2519 = vmatpush.msra.mxu0 %v1773_v44  ;;  %v2149_v53 = vld [vmem:[%s5297_s15 + $0xd00] sm:$0xff]  ;;  %v1822_v42 = vld [vmem:[%s5297_s15 + $0x2c8] sm:$0xff] }
 0x153   : > { %2578 = vmatpush.msra.mxu3 %v2165_v43  ;;  %2539 = vmatpush.msra.mxu1 %v1901_v45  ;;  %v1757_v55 = vld [vmem:[%s5297_s15 + $0xc0] sm:$0xff]  ;;  %v1371_v61 = vadd.f32 %v1370_v56, %v1351_v58  ;;  %v1950_v43 = vld [vmem:[%s5297_s15 + $0x6c8] sm:$0xff] }
 0x154   : > { %2559 = vmatpush.msra.mxu2 %v2029_v46  ;;  %2520 = vmatpush.msra.mxu0 %v1765_v50  ;;  %v1885_v57 = vld [vmem:[%s5297_s15 + $0x4c0] sm:$0xff]  ;;  %v1814_v46 = vld [vmem:[%s5297_s15 + $0x288] sm:$0xff] }
 0x155   : > { %2579 = vmatpush.msra.mxu3 %v2157_v48  ;;  %2540 = vmatpush.msra.mxu1 %v1893_v51  ;;  %v2013_v59 = vld [vmem:[%s5297_s15 + $0x8c0] sm:$0xff]  ;;  %v1942_v48 = vld [vmem:[%s5297_s15 + $0x688] sm:$0xff] }
 0x156   : > { %2560 = vmatpush.msra.mxu2 %v2021_v52  ;;  %v2141_v60 = vld [vmem:[%s5297_s15 + $0xcc0] sm:$0xff]  ;;  %1669 = vmatmul.f32.vlgmr.msrb.gmra.mxu0 %v4860_v1  ;;  %v1806_v51 = vld [vmem:[%s5297_s15 + $0x248] sm:$0xff] }
 0x157   : > { %2580 = vmatpush.msra.mxu3 %v2149_v53  ;;  %1709 = vmatmul.f32.vlgmr.msrb.gmra.mxu2 %v4864_v3  ;;  %v1749_v62 = vld [vmem:[%s5297_s15 + $0x80] sm:$0xff]  ;;  %v1934_v52 = vld [vmem:[%s5297_s15 + $0x648] sm:$0xff] }
 0x158   : > { %2521 = vmatpush.msra.mxu0 %v1757_v55  ;;  %2541 = vmatpush.msra.mxu1 %v1885_v57  ;;  %v1877_v63 = vld [vmem:[%s5297_s15 + $0x480] sm:$0xff]  ;;  %v1390_v11 = vpop.f32.mrf.mxu2  ;;  %v1410_v12 = vpop.f32.mrf.mxu3  ;;  %v1798_v56 = vld [vmem:[%s5297_s15 + $0x208] sm:$0xff] }
 0x159   : > { %2561 = vmatpush.msra.mxu2 %v2013_v59  ;;  %2581 = vmatpush.msra.mxu3 %v2141_v60  ;;  %v2005_v5 = vld [vmem:[%s5297_s15 + $0x880] sm:$0xff]  ;;  %v1391_v15 = vadd.f32 %v1390_v11, %v1371_v61  ;;  %v1926_v55 = vld [vmem:[%s5297_s15 + $0x608] sm:$0xff] }
 0x15a   : > { %v2133_v6 = vld [vmem:[%s5297_s15 + $0xc80] sm:$0xff]  ;;  %1689 = vmatmul.f32.vlgmr.msrb.gmra.mxu1 %v4862_v2  ;;  %1729 = vmatmul.f32.vlgmr.msrb.gmra.mxu3 %v4866_v4  ;;  %v1790_v59 = vld [vmem:[%s5297_s15 + $0x1c8] sm:$0xff] }
 0x15b   : > { %v1741_v7 = vld [vmem:[%s5297_s15 + $0x40] sm:$0xff]  ;;  %2522 = vmatpush.msra.mxu0 %v1749_v62  ;;  %2542 = vmatpush.msra.mxu1 %v1877_v63  ;;  %v5386_v20 = vadd.f32 %v1410_v12, %v1391_v15  ;;  %v1918_v60 = vld [vmem:[%s5297_s15 + $0x5c8] sm:$0xff] }
 0x15c   : > { %v1869_v8 = vld [vmem:[%s5297_s15 + $0x440] sm:$0xff]  ;;  %2562 = vmatpush.msra.mxu2 %v2005_v5  ;;  %2582 = vmatpush.msra.mxu3 %v2133_v6  ;;  %v1782_v63 = vld [vmem:[%s5297_s15 + $0x188] sm:$0xff] }
 0x15d   : > { %v1997_v9 = vld [vmem:[%s5297_s15 + $0x840] sm:$0xff]  ;;  %2523 = vmatpush.msra.mxu0 %v1741_v7  ;;  %2543 = vmatpush.msra.mxu1 %v1869_v8  ;;  %v1910_v5 = vld [vmem:[%s5297_s15 + $0x588] sm:$0xff] }
 0x15e   : > { %v2125_v10 = vld [vmem:[%s5297_s15 + $0xc40] sm:$0xff]  ;;  %2563 = vmatpush.msra.mxu2 %v1997_v9  ;;  %v1902_v11 = vld [vmem:[%s5297_s15 + $0x548] sm:$0xff] }
 0x15f   : > { %v1733_v13 = vld [vmem:[%s5297_s15] sm:$0xff]  ;;  %2583 = vmatpush.msra.mxu3 %v2125_v10  ;;  %v1774_v10 = vld [vmem:[%s5297_s15 + $0x148] sm:$0xff] }
 0x160   : > { %v1861_v14 = vld [vmem:[%s5297_s15 + $0x400] sm:$0xff]  ;;  %2524 = vmatpush.msra.mxu0 %v1733_v13 }
 0x161   : > { %v1989_v16 = vld [vmem:[%s5297_s15 + $0x800] sm:$0xff]  ;;  %2544 = vmatpush.msra.mxu1 %v1861_v14 }
 0x162   : > { %v2117_v17 = vld [vmem:[%s5297_s15 + $0xc00] sm:$0xff]  ;;  %2564 = vmatpush.msra.mxu2 %v1989_v16  ;;  %2545 = vmatmul.f32.vlgmr.msra.gmra.mxu1 %v5397_v25  ;;  %v1766_v16 = vld [vmem:[%s5297_s15 + $0x108] sm:$0xff] }
 0x163   : > { %v5379_v18 = vld [vmem:[%s6862_s0] sm:$0xff]  ;;  %2584 = vmatpush.msra.mxu3 %v2117_v17  ;;  %2565 = vmatmul.f32.vlgmr.msra.gmra.mxu2 %v5384_v19  ;;  %v1894_v17 = vld [vmem:[%s5297_s15 + $0x508] sm:$0xff] }
 0x164   : > { %v2365_v21 = vld [vmem:[%s5297_s15 + $0x13c0] sm:$0xff]  ;;  %2525 = vmatmul.f32.vlgmr.msra.gmra.mxu0 %v5379_v18  ;;  %2629 = vmatpush.msrb.mxu2 %v1854_v23 }
 0x165   : > { %v2493_v22 = vld [vmem:[%s5297_s15 + $0x17c0] sm:$0xff]  ;;  %2589 = vmatpush.msrb.mxu0 %v2365_v21  ;;  %2649 = vmatpush.msrb.mxu3 %v1982_v24  ;;  %v1758_v24 = vld [vmem:[%s5297_s15 + $0xc8] sm:$0xff] }
 0x166   : > { %2609 = vmatpush.msrb.mxu1 %v2493_v22  ;;  %v2357_v27 = vld [vmem:[%s5297_s15 + $0x1380] sm:$0xff]  ;;  %2585 = vmatmul.f32.vlgmr.msra.gmra.mxu3 %v5402_v26 }
 0x167   : > { %v2485_v28 = vld [vmem:[%s5297_s15 + $0x1780] sm:$0xff]  ;;  %2590 = vmatpush.msrb.mxu0 %v2357_v27  ;;  %2630 = vmatpush.msrb.mxu2 %v1846_v29  ;;  %v1886_v27 = vld [vmem:[%s5297_s15 + $0x4c8] sm:$0xff] }
 0x168   : > { %v2349_v31 = vld [vmem:[%s5297_s15 + $0x1340] sm:$0xff]  ;;  %2610 = vmatpush.msrb.mxu1 %v2485_v28  ;;  %2650 = vmatpush.msrb.mxu3 %v1974_v30 }
 0x169   : > { %v2477_v33 = vld [vmem:[%s5297_s15 + $0x1740] sm:$0xff]  ;;  %2591 = vmatpush.msrb.mxu0 %v2349_v31  ;;  %2631 = vmatpush.msrb.mxu2 %v1838_v34  ;;  %v1750_v31 = vld [vmem:[%s5297_s15 + $0x88] sm:$0xff] }
 0x16a   : > { %v2341_v36 = vld [vmem:[%s5297_s15 + $0x1300] sm:$0xff]  ;;  %2611 = vmatpush.msrb.mxu1 %v2477_v33  ;;  %2651 = vmatpush.msrb.mxu3 %v1966_v35  ;;  %v1878_v33 = vld [vmem:[%s5297_s15 + $0x488] sm:$0xff] }
 0x16b   : > { %v2469_v37 = vld [vmem:[%s5297_s15 + $0x1700] sm:$0xff]  ;;  %2592 = vmatpush.msrb.mxu0 %v2341_v36  ;;  %2632 = vmatpush.msrb.mxu2 %v1830_v38  ;;  %v1742_v36 = vld [vmem:[%s5297_s15 + $0x48] sm:$0xff] }
 0x16c   : > { %v2333_v40 = vld [vmem:[%s5297_s15 + $0x12c0] sm:$0xff]  ;;  %2612 = vmatpush.msrb.mxu1 %v2469_v37  ;;  %2652 = vmatpush.msrb.mxu3 %v1958_v39  ;;  %v1870_v37 = vld [vmem:[%s5297_s15 + $0x448] sm:$0xff] }
 0x16d   : > { %v2461_v41 = vld [vmem:[%s5297_s15 + $0x16c0] sm:$0xff]  ;;  %2593 = vmatpush.msrb.mxu0 %v2333_v40  ;;  %2633 = vmatpush.msrb.mxu2 %v1822_v42 }
 0x16e   : > { %v2325_v44 = vld [vmem:[%s5297_s15 + $0x1280] sm:$0xff]  ;;  %2613 = vmatpush.msrb.mxu1 %v2461_v41  ;;  %2653 = vmatpush.msrb.mxu3 %v1950_v43  ;;  %v1734_v43 = vld [vmem:[%s5297_s15 + $0x8] sm:$0xff] }
 0x16f   : > { %v2453_v45 = vld [vmem:[%s5297_s15 + $0x1680] sm:$0xff]  ;;  %2594 = vmatpush.msrb.mxu0 %v2325_v44  ;;  %2634 = vmatpush.msrb.mxu2 %v1814_v46  ;;  %v1862_v44 = vld [vmem:[%s5297_s15 + $0x408] sm:$0xff] }
 0x170   : > { %v2317_v49 = vld [vmem:[%s5297_s15 + $0x1240] sm:$0xff]  ;;  %2614 = vmatpush.msrb.mxu1 %v2453_v45  ;;  %2654 = vmatpush.msrb.mxu3 %v1942_v48  ;;  %v2110_v48 = vld [vmem:[%s5297_s15 + $0xbc8] sm:$0xff] }
 0x171   : > { %v2445_v50 = vld [vmem:[%s5297_s15 + $0x1640] sm:$0xff]  ;;  %2595 = vmatpush.msrb.mxu0 %v2317_v49  ;;  %2635 = vmatpush.msrb.mxu2 %v1806_v51  ;;  %v2238_v49 = vld [vmem:[%s5297_s15 + $0xfc8] sm:$0xff] }
 0x172   : > { %v2309_v53 = vld [vmem:[%s5297_s15 + $0x1200] sm:$0xff]  ;;  %2615 = vmatpush.msrb.mxu1 %v2445_v50  ;;  %2655 = vmatpush.msrb.mxu3 %v1934_v52  ;;  %v1430_v14 = vpop.f32.mrf.mxu0  ;;  %v2366_v50 = vld [vmem:[%s5297_s15 + $0x13c8] sm:$0xff] }
 0x173   : > { %v2437_v54 = vld [vmem:[%s5297_s15 + $0x1600] sm:$0xff]  ;;  %2596 = vmatpush.msrb.mxu0 %v2309_v53  ;;  %2636 = vmatpush.msrb.mxu2 %v1798_v56  ;;  %v1450_v15 = vpop.f32.mrf.mxu1  ;;  %v2494_v51 = vld [vmem:[%s5297_s15 + $0x17c8] sm:$0xff] }
 0x174   : > { %v2301_v57 = vld [vmem:[%s5297_s15 + $0x11c0] sm:$0xff]  ;;  %2616 = vmatpush.msrb.mxu1 %v2437_v54  ;;  %2656 = vmatpush.msrb.mxu3 %v1926_v55  ;;  %v5486_v52 = vld [vmem:[%s6862_s0 + $0x28] sm:$0xff] }
 0x175   : > { %v2429_v58 = vld [vmem:[%s5297_s15 + $0x15c0] sm:$0xff]  ;;  %2597 = vmatpush.msrb.mxu0 %v2301_v57  ;;  %2637 = vmatpush.msrb.mxu2 %v1790_v59  ;;  %v2102_v53 = vld [vmem:[%s5297_s15 + $0xb88] sm:$0xff] }
 0x176   : > { %v2293_v61 = vld [vmem:[%s5297_s15 + $0x1180] sm:$0xff]  ;;  %2617 = vmatpush.msrb.mxu1 %v2429_v58  ;;  %2657 = vmatpush.msrb.mxu3 %v1918_v60  ;;  %v2230_v54 = vld [vmem:[%s5297_s15 + $0xf88] sm:$0xff] }
 0x177   : > { %v2421_v62 = vld [vmem:[%s5297_s15 + $0x1580] sm:$0xff]  ;;  %2598 = vmatpush.msrb.mxu0 %v2293_v61  ;;  %2638 = vmatpush.msrb.mxu2 %v1782_v63  ;;  %v2358_v56 = vld [vmem:[%s5297_s15 + $0x1388] sm:$0xff] }
 0x178   : > { %v5443_v6 = vld [vmem:[%s5115_s30] sm:$0xff]  ;;  %2618 = vmatpush.msrb.mxu1 %v2421_v62  ;;  %2658 = vmatpush.msrb.mxu3 %v1910_v5  ;;  %v2486_v55 = vld [vmem:[%s5297_s15 + $0x1788] sm:$0xff]  ;;  %s546_s30 = scalar_lea.vmem %s6873_s11, %s5103_s27 }
 0x179   : > { %v1081_v7 = vperm.slane %v5443_v6, 4  ;;  %v2285_v8 = vld [vmem:[%s5297_s15 + $0x1140] sm:$0xff]  ;;  %2639 = vmatpush.msrb.mxu2 %v1774_v10  ;;  %v2094_v57 = vld [vmem:[%s5297_s15 + $0xb48] sm:$0xff] }
 0x17a   : > { %v2413_v9 = vld [vmem:[%s5297_s15 + $0x1540] sm:$0xff]  ;;  %2599 = vmatpush.msrb.mxu0 %v2285_v8  ;;  %2659 = vmatpush.msrb.mxu3 %v1902_v11  ;;  %v1470_v38 = vpop.f32.mrf.mxu2  ;;  %v1490_v39 = vpop.f32.mrf.mxu3  ;;  %v2222_v58 = vld [vmem:[%s5297_s15 + $0xf48] sm:$0xff] }
 0x17b   : > { %v2277_v12 = vld [vmem:[%s5297_s15 + $0x1100] sm:$0xff]  ;;  %2619 = vmatpush.msrb.mxu1 %v2413_v9  ;;  %v1431_v21 = vadd.f32 %v1430_v14, %v1081_v7  ;;  %2640 = vmatpush.msrb.mxu2 %v1766_v16  ;;  %v2350_v59 = vld [vmem:[%s5297_s15 + $0x1348] sm:$0xff] }
 0x17c   : > { %v2405_v13 = vld [vmem:[%s5297_s15 + $0x1500] sm:$0xff]  ;;  %2600 = vmatpush.msrb.mxu0 %v2277_v12  ;;  %2660 = vmatpush.msrb.mxu3 %v1894_v17  ;;  %v2478_v60 = vld [vmem:[%s5297_s15 + $0x1748] sm:$0xff] }
 0x17d   : > { %v2269_v22 = vld [vmem:[%s5297_s15 + $0x10c0] sm:$0xff]  ;;  %2620 = vmatpush.msrb.mxu1 %v2405_v13  ;;  %v1451_v28 = vadd.f32 %v1450_v15, %v1431_v21  ;;  %2641 = vmatpush.msrb.mxu2 %v1758_v24  ;;  %v2086_v61 = vld [vmem:[%s5297_s15 + $0xb08] sm:$0xff] }
 0x17e   : > { %v2397_v23 = vld [vmem:[%s5297_s15 + $0x14c0] sm:$0xff]  ;;  %2601 = vmatpush.msrb.mxu0 %v2269_v22  ;;  %2661 = vmatpush.msrb.mxu3 %v1886_v27  ;;  %v2214_v62 = vld [vmem:[%s5297_s15 + $0xf08] sm:$0xff] }
 0x17f   : > { %v2261_v29 = vld [vmem:[%s5297_s15 + $0x1080] sm:$0xff]  ;;  %2621 = vmatpush.msrb.mxu1 %v2397_v23  ;;  %2642 = vmatpush.msrb.mxu2 %v1750_v31  ;;  %v1471_v42 = vadd.f32 %v1470_v38, %v1451_v28  ;;  %v2342_v63 = vld [vmem:[%s5297_s15 + $0x1308] sm:$0xff] }
 0x180   : > { %v2389_v30 = vld [vmem:[%s5297_s15 + $0x1480] sm:$0xff]  ;;  %2602 = vmatpush.msrb.mxu0 %v2261_v29  ;;  %2662 = vmatpush.msrb.mxu3 %v1878_v33  ;;  %v2470_v5 = vld [vmem:[%s5297_s15 + $0x1708] sm:$0xff] }
 0x181   : > { %v2253_v34 = vld [vmem:[%s5297_s15 + $0x1040] sm:$0xff]  ;;  %2622 = vmatpush.msrb.mxu1 %v2389_v30  ;;  %2643 = vmatpush.msrb.mxu2 %v1742_v36  ;;  %v5475_v46 = vadd.f32 %v1490_v39, %v1471_v42  ;;  %v2078_v7 = vld [vmem:[%s5297_s15 + $0xac8] sm:$0xff] }
 0x182   : > { %v2381_v35 = vld [vmem:[%s5297_s15 + $0x1440] sm:$0xff]  ;;  %2603 = vmatpush.msrb.mxu0 %v2253_v34  ;;  %2663 = vmatpush.msrb.mxu3 %v1870_v37  ;;  %v2206_v8 = vld [vmem:[%s5297_s15 + $0xec8] sm:$0xff]  ;;  %v1082_v37 = vperm.slane %v5443_v6, 5 }
 0x183   : > { %v2245_v40 = vld [vmem:[%s5297_s15 + $0x1000] sm:$0xff]  ;;  %2623 = vmatpush.msrb.mxu1 %v2381_v35  ;;  %2644 = vmatpush.msrb.mxu2 %v1734_v43  ;;  %v2334_v9 = vld [vmem:[%s5297_s15 + $0x12c8] sm:$0xff] }
 0x184   : > { %v2373_v41 = vld [vmem:[%s5297_s15 + $0x1400] sm:$0xff]  ;;  %2604 = vmatpush.msrb.mxu0 %v2245_v40  ;;  %2664 = vmatpush.msrb.mxu3 %v1862_v44  ;;  %v2462_v10 = vld [vmem:[%s5297_s15 + $0x16c8] sm:$0xff] }
 0x185   : > { %v5473_v45 = vld [vmem:[%s6862_s0 + $0x20] sm:$0xff]  ;;  %2624 = vmatpush.msrb.mxu1 %v2373_v41  ;;  %2645 = vmatmul.f32.vlgmr.msrb.gmra.mxu2 %v5379_v18  ;;  %v2070_v11 = vld [vmem:[%s5297_s15 + $0xa88] sm:$0xff] }
 0x186   : > { %2605 = vmatmul.f32.vlgmr.msrb.gmra.mxu0 %v5473_v45  ;;  %2709 = vmatpush.msra.mxu2 %v2366_v50  ;;  %v2198_v12 = vld [vmem:[%s5297_s15 + $0xe88] sm:$0xff] }
 0x187   : > { %2669 = vmatpush.msra.mxu0 %v2110_v48  ;;  %2689 = vmatpush.msra.mxu1 %v2238_v49  ;;  %v2326_v13 = vld [vmem:[%s5297_s15 + $0x1288] sm:$0xff] }
 0x188   : > { %2729 = vmatpush.msra.mxu3 %v2494_v51  ;;  %2625 = vmatmul.f32.vlgmr.msrb.gmra.mxu1 %v5486_v52  ;;  %v2454_v14 = vld [vmem:[%s5297_s15 + $0x1688] sm:$0xff] }
 0x189   : > { %2665 = vmatmul.f32.vlgmr.msrb.gmra.mxu3 %v5397_v25  ;;  %2670 = vmatpush.msra.mxu0 %v2102_v53  ;;  %v2062_v15 = vld [vmem:[%s5297_s15 + $0xa48] sm:$0xff] }
 0x18a   : > { %2690 = vmatpush.msra.mxu1 %v2230_v54  ;;  %2710 = vmatpush.msra.mxu2 %v2358_v56  ;;  %v2190_v16 = vld [vmem:[%s5297_s15 + $0xe48] sm:$0xff] }
 0x18b   : > { %2730 = vmatpush.msra.mxu3 %v2486_v55  ;;  %2671 = vmatpush.msra.mxu0 %v2094_v57  ;;  %v2318_v17 = vld [vmem:[%s5297_s15 + $0x1248] sm:$0xff] }
 0x18c   : > { %2691 = vmatpush.msra.mxu1 %v2222_v58  ;;  %2711 = vmatpush.msra.mxu2 %v2350_v59  ;;  %v2446_v21 = vld [vmem:[%s5297_s15 + $0x1648] sm:$0xff] }
 0x18d   : > { %2731 = vmatpush.msra.mxu3 %v2478_v60  ;;  %2672 = vmatpush.msra.mxu0 %v2086_v61  ;;  %v2054_v22 = vld [vmem:[%s5297_s15 + $0xa08] sm:$0xff] }
 0x18e   : > { %2692 = vmatpush.msra.mxu1 %v2214_v62  ;;  %2712 = vmatpush.msra.mxu2 %v2342_v63  ;;  %v2182_v23 = vld [vmem:[%s5297_s15 + $0xe08] sm:$0xff] }
 0x18f   : > { %2732 = vmatpush.msra.mxu3 %v2470_v5  ;;  %2673 = vmatpush.msra.mxu0 %v2078_v7  ;;  %v2310_v24 = vld [vmem:[%s5297_s15 + $0x1208] sm:$0xff] }
 0x190   : > { %2693 = vmatpush.msra.mxu1 %v2206_v8  ;;  %2713 = vmatpush.msra.mxu2 %v2334_v9  ;;  %v2438_v27 = vld [vmem:[%s5297_s15 + $0x1608] sm:$0xff]  ;;  %v1510_v44 = vpop.f32.mrf.mxu0 }
 0x191   : > { %2733 = vmatpush.msra.mxu3 %v2462_v10  ;;  %2674 = vmatpush.msra.mxu0 %v2070_v11  ;;  %v2046_v28 = vld [vmem:[%s5297_s15 + $0x9c8] sm:$0xff]  ;;  %v1530_v48 = vpop.f32.mrf.mxu1  ;;  %v1511_v51 = vadd.f32 %v1510_v44, %v1082_v37  ;;  %v2215_v37 = vld [vmem:[%s5297_s15 + $0xf10] sm:$0xff] }
 0x192   : > { %2694 = vmatpush.msra.mxu1 %v2198_v12  ;;  %2714 = vmatpush.msra.mxu2 %v2326_v13  ;;  %v2174_v29 = vld [vmem:[%s5297_s15 + $0xdc8] sm:$0xff]  ;;  %v2071_v44 = vld [vmem:[%s5297_s15 + $0xa90] sm:$0xff] }
 0x193   : > { %2734 = vmatpush.msra.mxu3 %v2454_v14  ;;  %2675 = vmatpush.msra.mxu0 %v2062_v15  ;;  %v2302_v30 = vld [vmem:[%s5297_s15 + $0x11c8] sm:$0xff]  ;;  %v1531_v57 = vadd.f32 %v1530_v48, %v1511_v51  ;;  %v2199_v48 = vld [vmem:[%s5297_s15 + $0xe90] sm:$0xff] }
 0x194   : > { %2695 = vmatpush.msra.mxu1 %v2190_v16  ;;  %2715 = vmatpush.msra.mxu2 %v2318_v17  ;;  %v2430_v31 = vld [vmem:[%s5297_s15 + $0x15c8] sm:$0xff]  ;;  %v1855_v16 = vld [vmem:[%s5297_s15 + $0x3d0] sm:$0xff] }
 0x195   : > { %2735 = vmatpush.msra.mxu3 %v2446_v21  ;;  %2676 = vmatpush.msra.mxu0 %v2054_v22  ;;  %v2038_v33 = vld [vmem:[%s5297_s15 + $0x988] sm:$0xff]  ;;  %v1983_v17 = vld [vmem:[%s5297_s15 + $0x7d0] sm:$0xff] }
 0x196   : > { %2696 = vmatpush.msra.mxu1 %v2182_v23  ;;  %2716 = vmatpush.msra.mxu2 %v2310_v24  ;;  %v2166_v34 = vld [vmem:[%s5297_s15 + $0xd88] sm:$0xff]  ;;  %v2111_v21 = vld [vmem:[%s5297_s15 + $0xbd0] sm:$0xff] }
 0x197   : > { %2736 = vmatpush.msra.mxu3 %v2438_v27  ;;  %2677 = vmatpush.msra.mxu0 %v2046_v28  ;;  %v2294_v35 = vld [vmem:[%s5297_s15 + $0x1188] sm:$0xff]  ;;  %v2239_v22 = vld [vmem:[%s5297_s15 + $0xfd0] sm:$0xff] }
 0x198   : > { %2697 = vmatpush.msra.mxu1 %v2174_v29  ;;  %v2422_v36 = vld [vmem:[%s5297_s15 + $0x1588] sm:$0xff]  ;;  %2717 = vmatpush.msra.mxu2 %v2302_v30  ;;  %v1550_v8 = vpop.f32.mrf.mxu2  ;;  %v1847_v23 = vld [vmem:[%s5297_s15 + $0x390] sm:$0xff] }
 0x199   : > { %2737 = vmatpush.msra.mxu3 %v2430_v31  ;;  %v2030_v38 = vld [vmem:[%s5297_s15 + $0x948] sm:$0xff]  ;;  %2678 = vmatpush.msra.mxu0 %v2038_v33  ;;  %v1570_v9 = vpop.f32.mrf.mxu3  ;;  %v1551_v12 = vadd.f32 %v1550_v8, %v1531_v57  ;;  %v1975_v24 = vld [vmem:[%s5297_s15 + $0x790] sm:$0xff]  ;;  %v1083_v8 = vperm.slane %v5443_v6, 6 }
 0x19a   : > { %v2158_v39 = vld [vmem:[%s5297_s15 + $0xd48] sm:$0xff]  ;;  %2698 = vmatpush.msra.mxu1 %v2166_v34  ;;  %2718 = vmatpush.msra.mxu2 %v2294_v35  ;;  %v2103_v27 = vld [vmem:[%s5297_s15 + $0xb90] sm:$0xff] }
 0x19b   : > { %v2286_v40 = vld [vmem:[%s5297_s15 + $0x1148] sm:$0xff]  ;;  %2738 = vmatpush.msra.mxu3 %v2422_v36  ;;  %2679 = vmatpush.msra.mxu0 %v2030_v38  ;;  %v5551_v15 = vadd.f32 %v1570_v9, %v1551_v12  ;;  %v2231_v28 = vld [vmem:[%s5297_s15 + $0xf90] sm:$0xff] }
 0x19c   : > { %v2414_v41 = vld [vmem:[%s5297_s15 + $0x1548] sm:$0xff]  ;;  %2699 = vmatpush.msra.mxu1 %v2158_v39  ;;  %2719 = vmatpush.msra.mxu2 %v2286_v40  ;;  %v1839_v29 = vld [vmem:[%s5297_s15 + $0x350] sm:$0xff] }
 0x19d   : > { %v2022_v42 = vld [vmem:[%s5297_s15 + $0x908] sm:$0xff]  ;;  %2739 = vmatpush.msra.mxu3 %v2414_v41  ;;  %v1967_v30 = vld [vmem:[%s5297_s15 + $0x750] sm:$0xff] }
 0x19e   : > { %v2150_v43 = vld [vmem:[%s5297_s15 + $0xd08] sm:$0xff]  ;;  %2680 = vmatpush.msra.mxu0 %v2022_v42  ;;  %v2095_v31 = vld [vmem:[%s5297_s15 + $0xb50] sm:$0xff] }
 0x19f   : > { %v2278_v49 = vld [vmem:[%s5297_s15 + $0x1108] sm:$0xff]  ;;  %2700 = vmatpush.msra.mxu1 %v2150_v43  ;;  %v2223_v33 = vld [vmem:[%s5297_s15 + $0xf50] sm:$0xff] }
 0x1a0   : > { %v2406_v50 = vld [vmem:[%s5297_s15 + $0x1508] sm:$0xff]  ;;  %2720 = vmatpush.msra.mxu2 %v2278_v49  ;;  %v1831_v34 = vld [vmem:[%s5297_s15 + $0x310] sm:$0xff] }
 0x1a1   : > { %v2014_v53 = vld [vmem:[%s5297_s15 + $0x8c8] sm:$0xff]  ;;  %2740 = vmatpush.msra.mxu3 %v2406_v50  ;;  %v1959_v35 = vld [vmem:[%s5297_s15 + $0x710] sm:$0xff] }
 0x1a2   : > { %v2142_v54 = vld [vmem:[%s5297_s15 + $0xcc8] sm:$0xff]  ;;  %2681 = vmatpush.msra.mxu0 %v2014_v53  ;;  %v2087_v36 = vld [vmem:[%s5297_s15 + $0xb10] sm:$0xff] }
 0x1a3   : > { %v2270_v56 = vld [vmem:[%s5297_s15 + $0x10c8] sm:$0xff]  ;;  %2701 = vmatpush.msra.mxu1 %v2142_v54  ;;  %v1823_v38 = vld [vmem:[%s5297_s15 + $0x2d0] sm:$0xff] }
 0x1a4   : > { %v2398_v55 = vld [vmem:[%s5297_s15 + $0x14c8] sm:$0xff]  ;;  %2721 = vmatpush.msra.mxu2 %v2270_v56  ;;  %v1951_v39 = vld [vmem:[%s5297_s15 + $0x6d0] sm:$0xff] }
 0x1a5   : > { %v2006_v58 = vld [vmem:[%s5297_s15 + $0x888] sm:$0xff]  ;;  %2741 = vmatpush.msra.mxu3 %v2398_v55  ;;  %v2079_v40 = vld [vmem:[%s5297_s15 + $0xad0] sm:$0xff] }
 0x1a6   : > { %v2134_v59 = vld [vmem:[%s5297_s15 + $0xc88] sm:$0xff]  ;;  %2682 = vmatpush.msra.mxu0 %v2006_v58  ;;  %v2207_v41 = vld [vmem:[%s5297_s15 + $0xed0] sm:$0xff] }
 0x1a7   : > { %v2262_v60 = vld [vmem:[%s5297_s15 + $0x1088] sm:$0xff]  ;;  %2702 = vmatpush.msra.mxu1 %v2134_v59  ;;  %v1815_v42 = vld [vmem:[%s5297_s15 + $0x290] sm:$0xff] }
 0x1a8   : > { %v2390_v61 = vld [vmem:[%s5297_s15 + $0x1488] sm:$0xff]  ;;  %2722 = vmatpush.msra.mxu2 %v2262_v60  ;;  %v1943_v43 = vld [vmem:[%s5297_s15 + $0x690] sm:$0xff] }
 0x1a9   : > { %v1998_v62 = vld [vmem:[%s5297_s15 + $0x848] sm:$0xff]  ;;  %2742 = vmatpush.msra.mxu3 %v2390_v61  ;;  %v1807_v49 = vld [vmem:[%s5297_s15 + $0x250] sm:$0xff] }
 0x1aa   : > { %v2126_v63 = vld [vmem:[%s5297_s15 + $0xc48] sm:$0xff]  ;;  %2683 = vmatpush.msra.mxu0 %v1998_v62  ;;  %v1935_v50 = vld [vmem:[%s5297_s15 + $0x650] sm:$0xff] }
 0x1ab   : > { %v2254_v5 = vld [vmem:[%s5297_s15 + $0x1048] sm:$0xff]  ;;  %2703 = vmatpush.msra.mxu1 %v2126_v63  ;;  %v2063_v51 = vld [vmem:[%s5297_s15 + $0xa50] sm:$0xff] }
 0x1ac   : > { %v2382_v7 = vld [vmem:[%s5297_s15 + $0x1448] sm:$0xff]  ;;  %2723 = vmatpush.msra.mxu2 %v2254_v5  ;;  %v2191_v53 = vld [vmem:[%s5297_s15 + $0xe50] sm:$0xff] }
 0x1ad   : > { %v1990_v10 = vld [vmem:[%s5297_s15 + $0x808] sm:$0xff]  ;;  %2743 = vmatpush.msra.mxu3 %v2382_v7  ;;  %v1799_v54 = vld [vmem:[%s5297_s15 + $0x210] sm:$0xff] }
 0x1ae   : > { %v2118_v11 = vld [vmem:[%s5297_s15 + $0xc08] sm:$0xff]  ;;  %2684 = vmatpush.msra.mxu0 %v1990_v10  ;;  %v1927_v56 = vld [vmem:[%s5297_s15 + $0x610] sm:$0xff] }
 0x1af   : > { %v2246_v13 = vld [vmem:[%s5297_s15 + $0x1008] sm:$0xff]  ;;  %2704 = vmatpush.msra.mxu1 %v2118_v11  ;;  %2685 = vmatmul.f32.vlgmr.msra.gmra.mxu0 %v5384_v19  ;;  %v2055_v55 = vld [vmem:[%s5297_s15 + $0xa10] sm:$0xff] }
 0x1b0   : > { %v2374_v14 = vld [vmem:[%s5297_s15 + $0x1408] sm:$0xff]  ;;  %2724 = vmatpush.msra.mxu2 %v2246_v13  ;;  %2749 = vmatpush.msrb.mxu0 %v1855_v16  ;;  %v2183_v57 = vld [vmem:[%s5297_s15 + $0xe10] sm:$0xff] }
 0x1b1   : > { %2744 = vmatpush.msra.mxu3 %v2374_v14  ;;  %2725 = vmatmul.f32.vlgmr.msra.gmra.mxu2 %v5473_v45  ;;  %v1791_v58 = vld [vmem:[%s5297_s15 + $0x1d0] sm:$0xff] }
 0x1b2   : > { %2769 = vmatpush.msrb.mxu1 %v1983_v17  ;;  %2789 = vmatpush.msrb.mxu2 %v2111_v21  ;;  %v1919_v59 = vld [vmem:[%s5297_s15 + $0x5d0] sm:$0xff] }
 0x1b3   : > { %2809 = vmatpush.msrb.mxu3 %v2239_v22  ;;  %2705 = vmatmul.f32.vlgmr.msra.gmra.mxu1 %v5402_v26  ;;  %v2047_v60 = vld [vmem:[%s5297_s15 + $0x9d0] sm:$0xff] }
 0x1b4   : > { %2745 = vmatmul.f32.vlgmr.msra.gmra.mxu3 %v5486_v52  ;;  %2750 = vmatpush.msrb.mxu0 %v1847_v23  ;;  %v2175_v61 = vld [vmem:[%s5297_s15 + $0xdd0] sm:$0xff]  ;;  %v1590_v16 = vpop.f32.mrf.mxu0 }
 0x1b5   : > { %2770 = vmatpush.msrb.mxu1 %v1975_v24  ;;  %2790 = vmatpush.msrb.mxu2 %v2103_v27  ;;  %v1783_v62 = vld [vmem:[%s5297_s15 + $0x190] sm:$0xff]  ;;  %v1591_v23 = vadd.f32 %v1590_v16, %v1083_v8  ;;  %v1824_v8 = vld [vmem:[%s5297_s15 + $0x2d8] sm:$0xff] }
 0x1b6   : > { %2810 = vmatpush.msrb.mxu3 %v2231_v28  ;;  %2751 = vmatpush.msrb.mxu0 %v1839_v29  ;;  %v1911_v63 = vld [vmem:[%s5297_s15 + $0x590] sm:$0xff] }
 0x1b7   : > { %2771 = vmatpush.msrb.mxu1 %v1967_v30  ;;  %2791 = vmatpush.msrb.mxu2 %v2095_v31  ;;  %v2039_v5 = vld [vmem:[%s5297_s15 + $0x990] sm:$0xff]  ;;  %v1610_v17 = vpop.f32.mrf.mxu1 }
 0x1b8   : > { %2811 = vmatpush.msrb.mxu3 %v2223_v33  ;;  %2752 = vmatpush.msrb.mxu0 %v1831_v34  ;;  %v2167_v7 = vld [vmem:[%s5297_s15 + $0xd90] sm:$0xff]  ;;  %v1611_v30 = vadd.f32 %v1610_v17, %v1591_v23 }
 0x1b9   : > { %2772 = vmatpush.msrb.mxu1 %v1959_v35  ;;  %2792 = vmatpush.msrb.mxu2 %v2087_v36  ;;  %v1775_v9 = vld [vmem:[%s5297_s15 + $0x150] sm:$0xff] }
 0x1ba   : > { %2812 = vmatpush.msrb.mxu3 %v2215_v37  ;;  %2753 = vmatpush.msrb.mxu0 %v1823_v38  ;;  %v1903_v10 = vld [vmem:[%s5297_s15 + $0x550] sm:$0xff] }
 0x1bb   : > { %2773 = vmatpush.msrb.mxu1 %v1951_v39  ;;  %2793 = vmatpush.msrb.mxu2 %v2079_v40  ;;  %v2031_v11 = vld [vmem:[%s5297_s15 + $0x950] sm:$0xff] }
 0x1bc   : > { %2813 = vmatpush.msrb.mxu3 %v2207_v41  ;;  %2754 = vmatpush.msrb.mxu0 %v1815_v42  ;;  %v2159_v12 = vld [vmem:[%s5297_s15 + $0xd50] sm:$0xff]  ;;  %v1630_v40 = vpop.f32.mrf.mxu2 }
 0x1bd   : > { %2774 = vmatpush.msrb.mxu1 %v1943_v43  ;;  %2794 = vmatpush.msrb.mxu2 %v2071_v44  ;;  %v1767_v13 = vld [vmem:[%s5297_s15 + $0x110] sm:$0xff]  ;;  %v1631_v44 = vadd.f32 %v1630_v40, %v1611_v30  ;;  %v1912_v40 = vld [vmem:[%s5297_s15 + $0x598] sm:$0xff] }
 0x1be   : > { %2814 = vmatpush.msrb.mxu3 %v2199_v48  ;;  %2755 = vmatpush.msrb.mxu0 %v1807_v49  ;;  %v1895_v14 = vld [vmem:[%s5297_s15 + $0x510] sm:$0xff] }
 0x1bf   : > { %2775 = vmatpush.msrb.mxu1 %v1935_v50  ;;  %2795 = vmatpush.msrb.mxu2 %v2063_v51  ;;  %v2023_v21 = vld [vmem:[%s5297_s15 + $0x910] sm:$0xff]  ;;  %v1650_v41 = vpop.f32.mrf.mxu3 }
 0x1c0   : > { %2815 = vmatpush.msrb.mxu3 %v2191_v53  ;;  %2756 = vmatpush.msrb.mxu0 %v1799_v54  ;;  %v2151_v22 = vld [vmem:[%s5297_s15 + $0xd10] sm:$0xff]  ;;  %v5622_v50 = vadd.f32 %v1650_v41, %v1631_v44  ;;  %v1856_v54 = vld [vmem:[%s5297_s15 + $0x3d8] sm:$0xff] }
 0x1c1   : > { %2776 = vmatpush.msrb.mxu1 %v1927_v56  ;;  %2796 = vmatpush.msrb.mxu2 %v2055_v55  ;;  %v1759_v24 = vld [vmem:[%s5297_s15 + $0xd0] sm:$0xff]  ;;  %v1984_v56 = vld [vmem:[%s5297_s15 + $0x7d8] sm:$0xff] }
 0x1c2   : > { %2816 = vmatpush.msrb.mxu3 %v2183_v57  ;;  %2757 = vmatpush.msrb.mxu0 %v1791_v58  ;;  %v1887_v27 = vld [vmem:[%s5297_s15 + $0x4d0] sm:$0xff]  ;;  %v1848_v58 = vld [vmem:[%s5297_s15 + $0x398] sm:$0xff] }
 0x1c3   : > { %2777 = vmatpush.msrb.mxu1 %v1919_v59  ;;  %2797 = vmatpush.msrb.mxu2 %v2047_v60  ;;  %v2015_v28 = vld [vmem:[%s5297_s15 + $0x8d0] sm:$0xff]  ;;  %v1976_v59 = vld [vmem:[%s5297_s15 + $0x798] sm:$0xff] }
 0x1c4   : > { %2817 = vmatpush.msrb.mxu3 %v2175_v61  ;;  %2758 = vmatpush.msrb.mxu0 %v1783_v62  ;;  %v2143_v29 = vld [vmem:[%s5297_s15 + $0xcd0] sm:$0xff]  ;;  %v1840_v60 = vld [vmem:[%s5297_s15 + $0x358] sm:$0xff] }
 0x1c5   : > { %2778 = vmatpush.msrb.mxu1 %v1911_v63  ;;  %2798 = vmatpush.msrb.mxu2 %v2039_v5  ;;  %v1751_v31 = vld [vmem:[%s5297_s15 + $0x90] sm:$0xff]  ;;  %v1968_v61 = vld [vmem:[%s5297_s15 + $0x758] sm:$0xff] }
 0x1c6   : > { %2818 = vmatpush.msrb.mxu3 %v2167_v7  ;;  %2759 = vmatpush.msrb.mxu0 %v1775_v9  ;;  %v1879_v33 = vld [vmem:[%s5297_s15 + $0x490] sm:$0xff]  ;;  %v1952_v9 = vld [vmem:[%s5297_s15 + $0x6d8] sm:$0xff] }
 0x1c7   : > { %2779 = vmatpush.msrb.mxu1 %v1903_v10  ;;  %2799 = vmatpush.msrb.mxu2 %v2031_v11  ;;  %v2007_v34 = vld [vmem:[%s5297_s15 + $0x890] sm:$0xff]  ;;  %v1776_v44 = vld [vmem:[%s5297_s15 + $0x158] sm:$0xff] }
 0x1c8   : > { %2819 = vmatpush.msrb.mxu3 %v2159_v12  ;;  %2760 = vmatpush.msrb.mxu0 %v1767_v13  ;;  %v2135_v35 = vld [vmem:[%s5297_s15 + $0xc90] sm:$0xff]  ;;  %v1816_v12 = vld [vmem:[%s5297_s15 + $0x298] sm:$0xff] }
 0x1c9   : > { %2780 = vmatpush.msrb.mxu1 %v1895_v14  ;;  %2800 = vmatpush.msrb.mxu2 %v2023_v21  ;;  %v1743_v36 = vld [vmem:[%s5297_s15 + $0x50] sm:$0xff]  ;;  %v1944_v13 = vld [vmem:[%s5297_s15 + $0x698] sm:$0xff]  ;;  %v1084_v14 = vperm.slane %v5443_v6, 7 }
 0x1ca   : > { %2820 = vmatpush.msrb.mxu3 %v2151_v22  ;;  %2761 = vmatpush.msrb.mxu0 %v1759_v24  ;;  %v1871_v37 = vld [vmem:[%s5297_s15 + $0x450] sm:$0xff]  ;;  %v1808_v21 = vld [vmem:[%s5297_s15 + $0x258] sm:$0xff] }
 0x1cb   : > { %2781 = vmatpush.msrb.mxu1 %v1887_v27  ;;  %2801 = vmatpush.msrb.mxu2 %v2015_v28  ;;  %v1999_v38 = vld [vmem:[%s5297_s15 + $0x850] sm:$0xff]  ;;  %v1936_v22 = vld [vmem:[%s5297_s15 + $0x658] sm:$0xff] }
 0x1cc   : > { %2821 = vmatpush.msrb.mxu3 %v2143_v29  ;;  %2762 = vmatpush.msrb.mxu0 %v1751_v31  ;;  %v2127_v39 = vld [vmem:[%s5297_s15 + $0xc50] sm:$0xff]  ;;  %v1800_v6 = vld [vmem:[%s5297_s15 + $0x218] sm:$0xff] }
 0x1cd   : > { %2782 = vmatpush.msrb.mxu1 %v1879_v33  ;;  %2802 = vmatpush.msrb.mxu2 %v2007_v34  ;;  %v1735_v42 = vld [vmem:[%s5297_s15 + $0x10] sm:$0xff]  ;;  %v1928_v28 = vld [vmem:[%s5297_s15 + $0x618] sm:$0xff] }
 0x1ce   : > { %2822 = vmatpush.msrb.mxu3 %v2135_v35  ;;  %v1863_v43 = vld [vmem:[%s5297_s15 + $0x410] sm:$0xff]  ;;  %2763 = vmatpush.msrb.mxu0 %v1743_v36  ;;  %v1792_v33 = vld [vmem:[%s5297_s15 + $0x1d8] sm:$0xff] }
 0x1cf   : > { %2783 = vmatpush.msrb.mxu1 %v1871_v37  ;;  %v1991_v48 = vld [vmem:[%s5297_s15 + $0x810] sm:$0xff]  ;;  %2803 = vmatpush.msrb.mxu2 %v1999_v38  ;;  %v1920_v34 = vld [vmem:[%s5297_s15 + $0x5d8] sm:$0xff] }
 0x1d0   : > { %v2119_v49 = vld [vmem:[%s5297_s15 + $0xc10] sm:$0xff]  ;;  %2823 = vmatpush.msrb.mxu3 %v2127_v39  ;;  %2764 = vmatpush.msrb.mxu0 %v1735_v42  ;;  %v1784_v39 = vld [vmem:[%s5297_s15 + $0x198] sm:$0xff] }
 0x1d1   : > { %2784 = vmatpush.msrb.mxu1 %v1863_v43  ;;  %v2367_v51 = vld [vmem:[%s5297_s15 + $0x13d0] sm:$0xff]  ;;  %2804 = vmatpush.msrb.mxu2 %v1991_v48  ;;  %v1904_v48 = vld [vmem:[%s5297_s15 + $0x558] sm:$0xff] }
 0x1d2   : > { %v2495_v53 = vld [vmem:[%s5297_s15 + $0x17d0] sm:$0xff]  ;;  %2824 = vmatpush.msrb.mxu3 %v2119_v49  ;;  %2765 = vmatmul.f32.vlgmr.msrb.gmra.mxu0 %v5379_v18 }
 0x1d3   : > { %2805 = vmatmul.f32.vlgmr.msrb.gmra.mxu2 %v5384_v19  ;;  %2829 = vmatpush.msra.mxu0 %v2367_v51  ;;  %v2359_v55 = vld [vmem:[%s5297_s15 + $0x1390] sm:$0xff]  ;;  %v1670_v27 = vpop.f32.mrf.mxu0 }
 0x1d4   : > { %2849 = vmatpush.msra.mxu1 %v2495_v53  ;;  %v2487_v57 = vld [vmem:[%s5297_s15 + $0x1790] sm:$0xff]  ;;  %2869 = vmatpush.msra.mxu2 %v1856_v54  ;;  %v1671_v29 = vadd.f32 %v1670_v27, %v1084_v14  ;;  %v1768_v54 = vld [vmem:[%s5297_s15 + $0x118] sm:$0xff] }
 0x1d5   : > { %2889 = vmatpush.msra.mxu3 %v1984_v56  ;;  %2785 = vmatmul.f32.vlgmr.msrb.gmra.mxu1 %v5397_v25  ;;  %v2351_v18 = vld [vmem:[%s5297_s15 + $0x1350] sm:$0xff]  ;;  %v1832_v25 = vld [vmem:[%s5297_s15 + $0x318] sm:$0xff] }
 0x1d6   : > { %2825 = vmatmul.f32.vlgmr.msrb.gmra.mxu3 %v5402_v26  ;;  %v2479_v19 = vld [vmem:[%s5297_s15 + $0x1750] sm:$0xff]  ;;  %2830 = vmatpush.msra.mxu0 %v2359_v55  ;;  %v1960_v26 = vld [vmem:[%s5297_s15 + $0x718] sm:$0xff] }
 0x1d7   : > { %2850 = vmatpush.msra.mxu1 %v2487_v57  ;;  %2870 = vmatpush.msra.mxu2 %v1848_v58  ;;  %v2343_v62 = vld [vmem:[%s5297_s15 + $0x1310] sm:$0xff]  ;;  %v1690_v35 = vpop.f32.mrf.mxu1  ;;  %v1896_v56 = vld [vmem:[%s5297_s15 + $0x518] sm:$0xff] }
 0x1d8   : > { %2890 = vmatpush.msra.mxu3 %v1976_v59  ;;  %v2471_v63 = vld [vmem:[%s5297_s15 + $0x1710] sm:$0xff]  ;;  %2831 = vmatpush.msra.mxu0 %v2351_v18  ;;  %v1691_v38 = vadd.f32 %v1690_v35, %v1671_v29  ;;  %v1760_v18 = vld [vmem:[%s5297_s15 + $0xd8] sm:$0xff] }
 0x1d9   : > { %2851 = vmatpush.msra.mxu1 %v2479_v19  ;;  %2871 = vmatpush.msra.mxu2 %v1840_v60  ;;  %v2335_v5 = vld [vmem:[%s5297_s15 + $0x12d0] sm:$0xff]  ;;  %v1888_v19 = vld [vmem:[%s5297_s15 + $0x4d8] sm:$0xff] }
 0x1da   : > { %2891 = vmatpush.msra.mxu3 %v1968_v61  ;;  %v2463_v7 = vld [vmem:[%s5297_s15 + $0x16d0] sm:$0xff]  ;;  %2832 = vmatpush.msra.mxu0 %v2343_v62  ;;  %v1710_v43 = vpop.f32.mrf.mxu2  ;;  %v1752_v62 = vld [vmem:[%s5297_s15 + $0x98] sm:$0xff] }
 0x1db   : > { %2852 = vmatpush.msra.mxu1 %v2471_v63  ;;  %2872 = vmatpush.msra.mxu2 %v1832_v25  ;;  %v2327_v10 = vld [vmem:[%s5297_s15 + $0x1290] sm:$0xff]  ;;  %v1711_v49 = vadd.f32 %v1710_v43, %v1691_v38  ;;  %v1880_v63 = vld [vmem:[%s5297_s15 + $0x498] sm:$0xff] }
 0x1dc   : > { %2892 = vmatpush.msra.mxu3 %v1960_v26  ;;  %v2455_v11 = vld [vmem:[%s5297_s15 + $0x1690] sm:$0xff]  ;;  %2833 = vmatpush.msra.mxu0 %v2335_v5  ;;  %v1744_v5 = vld [vmem:[%s5297_s15 + $0x58] sm:$0xff] }
 0x1dd   : > { %2853 = vmatpush.msra.mxu1 %v2463_v7  ;;  %2873 = vmatpush.msra.mxu2 %v1824_v8  ;;  %v2319_v16 = vld [vmem:[%s5297_s15 + $0x1250] sm:$0xff]  ;;  %v1730_v55 = vpop.f32.mrf.mxu3  ;;  %v1872_v7 = vld [vmem:[%s5297_s15 + $0x458] sm:$0xff] }
 0x1de   : > { %2893 = vmatpush.msra.mxu3 %v1952_v9  ;;  %v2447_v17 = vld [vmem:[%s5297_s15 + $0x1650] sm:$0xff]  ;;  %2834 = vmatpush.msra.mxu0 %v2327_v10  ;;  %v5679_v59 = vadd.f32 %v1730_v55, %v1711_v49  ;;  %v1736_v10 = vld [vmem:[%s5297_s15 + $0x18] sm:$0xff] }
 0x1df   : > { %2854 = vmatpush.msra.mxu1 %v2455_v11  ;;  %2874 = vmatpush.msra.mxu2 %v1816_v12  ;;  %v2311_v23 = vld [vmem:[%s5297_s15 + $0x1210] sm:$0xff]  ;;  %v1864_v11 = vld [vmem:[%s5297_s15 + $0x418] sm:$0xff] }
 0x1e0   : > { %2894 = vmatpush.msra.mxu3 %v1944_v13  ;;  %v2439_v24 = vld [vmem:[%s5297_s15 + $0x1610] sm:$0xff]  ;;  %2835 = vmatpush.msra.mxu0 %v2319_v16  ;;  %v2112_v12 = vld [vmem:[%s5297_s15 + $0xbd8] sm:$0xff] }
 0x1e1   : > { %2855 = vmatpush.msra.mxu1 %v2447_v17  ;;  %2875 = vmatpush.msra.mxu2 %v1808_v21  ;;  %v2303_v30 = vld [vmem:[%s5297_s15 + $0x11d0] sm:$0xff]  ;;  %v2240_v13 = vld [vmem:[%s5297_s15 + $0xfd8] sm:$0xff]  ;;  %v5703_v17 = vld [vmem:[%s6862_s0] sm:$0xff] }
 0x1e2   : > { %2895 = vmatpush.msra.mxu3 %v1936_v22  ;;  %v2431_v31 = vld [vmem:[%s5297_s15 + $0x15d0] sm:$0xff]  ;;  %2836 = vmatpush.msra.mxu0 %v2311_v23  ;;  %v2368_v14 = vld [vmem:[%s5297_s15 + $0x13d8] sm:$0xff] }
 0x1e3   : > { %2856 = vmatpush.msra.mxu1 %v2439_v24  ;;  %2876 = vmatpush.msra.mxu2 %v1800_v6  ;;  %v2295_v36 = vld [vmem:[%s5297_s15 + $0x1190] sm:$0xff]  ;;  %v2496_v16 = vld [vmem:[%s5297_s15 + $0x17d8] sm:$0xff] }
 0x1e4   : > { %2896 = vmatpush.msra.mxu3 %v1928_v28  ;;  %v2423_v37 = vld [vmem:[%s5297_s15 + $0x1590] sm:$0xff]  ;;  %2837 = vmatpush.msra.mxu0 %v2303_v30  ;;  %v2104_v21 = vld [vmem:[%s5297_s15 + $0xb98] sm:$0xff] }
 0x1e5   : > { %2857 = vmatpush.msra.mxu1 %v2431_v31  ;;  %2877 = vmatpush.msra.mxu2 %v1792_v33  ;;  %v2287_v41 = vld [vmem:[%s5297_s15 + $0x1150] sm:$0xff]  ;;  %v2232_v22 = vld [vmem:[%s5297_s15 + $0xf98] sm:$0xff] }
 0x1e6   : > { %2897 = vmatpush.msra.mxu3 %v1920_v34  ;;  %v2415_v42 = vld [vmem:[%s5297_s15 + $0x1550] sm:$0xff]  ;;  %2838 = vmatpush.msra.mxu0 %v2295_v36  ;;  %v2360_v23 = vld [vmem:[%s5297_s15 + $0x1398] sm:$0xff] }
 0x1e7   : > { %2858 = vmatpush.msra.mxu1 %v2423_v37  ;;  %2878 = vmatpush.msra.mxu2 %v1784_v39  ;;  %v2279_v51 = vld [vmem:[%s5297_s15 + $0x1110] sm:$0xff]  ;;  %v2488_v24 = vld [vmem:[%s5297_s15 + $0x1798] sm:$0xff] }
 0x1e8   : > { %2898 = vmatpush.msra.mxu3 %v1912_v40  ;;  %v2407_v53 = vld [vmem:[%s5297_s15 + $0x1510] sm:$0xff]  ;;  %2839 = vmatpush.msra.mxu0 %v2287_v41  ;;  %v2096_v27 = vld [vmem:[%s5297_s15 + $0xb58] sm:$0xff] }
 0x1e9   : > { %2859 = vmatpush.msra.mxu1 %v2415_v42  ;;  %2879 = vmatpush.msra.mxu2 %v1776_v44  ;;  %v2271_v57 = vld [vmem:[%s5297_s15 + $0x10d0] sm:$0xff]  ;;  %v2224_v6 = vld [vmem:[%s5297_s15 + $0xf58] sm:$0xff] }
 0x1ea   : > { %2899 = vmatpush.msra.mxu3 %v1904_v48  ;;  %v2399_v58 = vld [vmem:[%s5297_s15 + $0x14d0] sm:$0xff]  ;;  %2840 = vmatpush.msra.mxu0 %v2279_v51  ;;  %v2352_v28 = vld [vmem:[%s5297_s15 + $0x1358] sm:$0xff] }
 0x1eb   : > { %2860 = vmatpush.msra.mxu1 %v2407_v53  ;;  %2880 = vmatpush.msra.mxu2 %v1768_v54  ;;  %v2263_v60 = vld [vmem:[%s5297_s15 + $0x1090] sm:$0xff]  ;;  %v2480_v29 = vld [vmem:[%s5297_s15 + $0x1758] sm:$0xff] }
 0x1ec   : > { %2900 = vmatpush.msra.mxu3 %v1896_v56  ;;  %v2391_v61 = vld [vmem:[%s5297_s15 + $0x1490] sm:$0xff]  ;;  %2841 = vmatpush.msra.mxu0 %v2271_v57  ;;  %v2216_v30 = vld [vmem:[%s5297_s15 + $0xf18] sm:$0xff] }
 0x1ed   : > { %2861 = vmatpush.msra.mxu1 %v2399_v58  ;;  %2881 = vmatpush.msra.mxu2 %v1760_v18  ;;  %v2255_v25 = vld [vmem:[%s5297_s15 + $0x1050] sm:$0xff]  ;;  %v2344_v31 = vld [vmem:[%s5297_s15 + $0x1318] sm:$0xff] }
 0x1ee   : > { %2901 = vmatpush.msra.mxu3 %v1888_v19  ;;  %v2383_v26 = vld [vmem:[%s5297_s15 + $0x1450] sm:$0xff]  ;;  %2842 = vmatpush.msra.mxu0 %v2263_v60  ;;  %v2472_v33 = vld [vmem:[%s5297_s15 + $0x1718] sm:$0xff] }
 0x1ef   : > { %2862 = vmatpush.msra.mxu1 %v2391_v61  ;;  %2882 = vmatpush.msra.mxu2 %v1752_v62  ;;  %v2247_v8 = vld [vmem:[%s5297_s15 + $0x1010] sm:$0xff]  ;;  %v2080_v34 = vld [vmem:[%s5297_s15 + $0xad8] sm:$0xff] }
 0x1f0   : > { %2902 = vmatpush.msra.mxu3 %v1880_v63  ;;  %v2375_v9 = vld [vmem:[%s5297_s15 + $0x1410] sm:$0xff]  ;;  %2843 = vmatpush.msra.mxu0 %v2255_v25  ;;  %v2208_v35 = vld [vmem:[%s5297_s15 + $0xed8] sm:$0xff] }
 0x1f1   : > { %2863 = vmatpush.msra.mxu1 %v2383_v26  ;;  %2883 = vmatpush.msra.mxu2 %v1744_v5  ;;  %v2336_v36 = vld [vmem:[%s5297_s15 + $0x12d8] sm:$0xff] }
 0x1f2   : > { %2903 = vmatpush.msra.mxu3 %v1872_v7  ;;  %2844 = vmatpush.msra.mxu0 %v2247_v8  ;;  %v2464_v37 = vld [vmem:[%s5297_s15 + $0x16d8] sm:$0xff] }
 0x1f3   : > { %2864 = vmatpush.msra.mxu1 %v2375_v9  ;;  %2884 = vmatpush.msra.mxu2 %v1736_v10  ;;  %v2072_v38 = vld [vmem:[%s5297_s15 + $0xa98] sm:$0xff] }
 0x1f4   : > { %2904 = vmatpush.msra.mxu3 %v1864_v11  ;;  %2845 = vmatmul.f32.vlgmr.msra.gmra.mxu0 %v5473_v45  ;;  %v5714_v45 = vld [vmem:[%s6862_s0 + $0x8] sm:$0xff]  ;;  %v2200_v39 = vld [vmem:[%s5297_s15 + $0xe98] sm:$0xff] }
 0x1f5   : > { %2885 = vmatmul.f32.vlgmr.msra.gmra.mxu2 %v5703_v17  ;;  %2909 = vmatpush.msrb.mxu0 %v2112_v12  ;;  %v2328_v40 = vld [vmem:[%s5297_s15 + $0x1298] sm:$0xff] }
 0x1f6   : > { %2929 = vmatpush.msrb.mxu1 %v2240_v13  ;;  %2949 = vmatpush.msrb.mxu2 %v2368_v14  ;;  %v2456_v41 = vld [vmem:[%s5297_s15 + $0x1698] sm:$0xff] }
 0x1f7   : > { %2969 = vmatpush.msrb.mxu3 %v2496_v16  ;;  %2865 = vmatmul.f32.vlgmr.msra.gmra.mxu1 %v5486_v52  ;;  %v2088_v52 = vld [vmem:[%s5297_s15 + $0xb18] sm:$0xff] }
 0x1f8   : > { %2905 = vmatmul.f32.vlgmr.msra.gmra.mxu3 %v5714_v45  ;;  %2910 = vmatpush.msrb.mxu0 %v2104_v21  ;;  %v2064_v42 = vld [vmem:[%s5297_s15 + $0xa58] sm:$0xff] }
 0x1f9   : > { %2930 = vmatpush.msrb.mxu1 %v2232_v22  ;;  %2950 = vmatpush.msrb.mxu2 %v2360_v23  ;;  %v2192_v43 = vld [vmem:[%s5297_s15 + $0xe58] sm:$0xff] }
 0x1fa   : > { %2970 = vmatpush.msrb.mxu3 %v2488_v24  ;;  %2911 = vmatpush.msrb.mxu0 %v2096_v27  ;;  %v2320_v44 = vld [vmem:[%s5297_s15 + $0x1258] sm:$0xff] }
 0x1fb   : > { %2931 = vmatpush.msrb.mxu1 %v2224_v6  ;;  %2951 = vmatpush.msrb.mxu2 %v2352_v28  ;;  %v2448_v48 = vld [vmem:[%s5297_s15 + $0x1658] sm:$0xff] }
 0x1fc   : > { %2971 = vmatpush.msrb.mxu3 %v2480_v29  ;;  %2912 = vmatpush.msrb.mxu0 %v2088_v52  ;;  %v2056_v49 = vld [vmem:[%s5297_s15 + $0xa18] sm:$0xff] }
 0x1fd   : > { %2932 = vmatpush.msrb.mxu1 %v2216_v30  ;;  %2952 = vmatpush.msrb.mxu2 %v2344_v31  ;;  %v2184_v51 = vld [vmem:[%s5297_s15 + $0xe18] sm:$0xff]  ;;  %v1857_v31 = vld [vmem:[%s5297_s15 + $0x3e0] sm:$0xff] }
 0x1fe   : > { %2972 = vmatpush.msrb.mxu3 %v2472_v33  ;;  %2913 = vmatpush.msrb.mxu0 %v2080_v34  ;;  %v2312_v53 = vld [vmem:[%s5297_s15 + $0x1218] sm:$0xff]  ;;  %v1985_v33 = vld [vmem:[%s5297_s15 + $0x7e0] sm:$0xff] }
 0x1ff   : > { %2933 = vmatpush.msrb.mxu1 %v2208_v35  ;;  %2953 = vmatpush.msrb.mxu2 %v2336_v36  ;;  %v2440_v54 = vld [vmem:[%s5297_s15 + $0x1618] sm:$0xff]  ;;  %v2113_v34 = vld [vmem:[%s5297_s15 + $0xbe0] sm:$0xff]  ;;  %v5780_v36 = vld [vmem:[%s6862_s0 + $0x10] sm:$0xff] }
 0x200   : > { %2973 = vmatpush.msrb.mxu3 %v2464_v37  ;;  %2914 = vmatpush.msrb.mxu0 %v2072_v38  ;;  %v2048_v56 = vld [vmem:[%s5297_s15 + $0x9d8] sm:$0xff]  ;;  %v2241_v35 = vld [vmem:[%s5297_s15 + $0xfe0] sm:$0xff] }
 0x201   : > { %2934 = vmatpush.msrb.mxu1 %v2200_v39  ;;  %2954 = vmatpush.msrb.mxu2 %v2328_v40  ;;  %v2176_v55 = vld [vmem:[%s5297_s15 + $0xdd8] sm:$0xff]  ;;  %v5786_v37 = vld [vmem:[%s6862_s0 + $0x20] sm:$0xff] }
 0x202   : > { %2974 = vmatpush.msrb.mxu3 %v2456_v41  ;;  %2915 = vmatpush.msrb.mxu0 %v2064_v42  ;;  %v2304_v57 = vld [vmem:[%s5297_s15 + $0x11d8] sm:$0xff]  ;;  %v1849_v38 = vld [vmem:[%s5297_s15 + $0x3a0] sm:$0xff] }
 0x203   : > { %2935 = vmatpush.msrb.mxu1 %v2192_v43  ;;  %2955 = vmatpush.msrb.mxu2 %v2320_v44  ;;  %v2432_v58 = vld [vmem:[%s5297_s15 + $0x15d8] sm:$0xff]  ;;  %v1977_v39 = vld [vmem:[%s5297_s15 + $0x7a0] sm:$0xff]  ;;  %v5802_v43 = vld [vmem:[%s6862_s0 + $0x28] sm:$0xff] }
 0x204   : > { %2975 = vmatpush.msrb.mxu3 %v2448_v48  ;;  %2916 = vmatpush.msrb.mxu0 %v2056_v49  ;;  %v2040_v18 = vld [vmem:[%s5297_s15 + $0x998] sm:$0xff]  ;;  %v2105_v40 = vld [vmem:[%s5297_s15 + $0xba0] sm:$0xff] }
 0x205   : > { %2936 = vmatpush.msrb.mxu1 %v2184_v51  ;;  %2956 = vmatpush.msrb.mxu2 %v2312_v53  ;;  %v2168_v19 = vld [vmem:[%s5297_s15 + $0xd98] sm:$0xff]  ;;  %v2233_v41 = vld [vmem:[%s5297_s15 + $0xfa0] sm:$0xff] }
 0x206   : > { %2976 = vmatpush.msrb.mxu3 %v2440_v54  ;;  %2917 = vmatpush.msrb.mxu0 %v2048_v56  ;;  %v2296_v60 = vld [vmem:[%s5297_s15 + $0x1198] sm:$0xff]  ;;  %v1841_v44 = vld [vmem:[%s5297_s15 + $0x360] sm:$0xff] }
 0x207   : > { %2937 = vmatpush.msrb.mxu1 %v2176_v55  ;;  %v2424_v61 = vld [vmem:[%s5297_s15 + $0x1598] sm:$0xff]  ;;  %2957 = vmatpush.msrb.mxu2 %v2304_v57  ;;  %v1969_v48 = vld [vmem:[%s5297_s15 + $0x760] sm:$0xff] }
 0x208   : > { %2977 = vmatpush.msrb.mxu3 %v2432_v58  ;;  %v2032_v62 = vld [vmem:[%s5297_s15 + $0x958] sm:$0xff]  ;;  %2918 = vmatpush.msrb.mxu0 %v2040_v18  ;;  %v2097_v49 = vld [vmem:[%s5297_s15 + $0xb60] sm:$0xff] }
 0x209   : > { %v2160_v63 = vld [vmem:[%s5297_s15 + $0xd58] sm:$0xff]  ;;  %2938 = vmatpush.msrb.mxu1 %v2168_v19  ;;  %2958 = vmatpush.msrb.mxu2 %v2296_v60  ;;  %v2225_v51 = vld [vmem:[%s5297_s15 + $0xf60] sm:$0xff] }
 0x20a   : > { %v2288_v25 = vld [vmem:[%s5297_s15 + $0x1158] sm:$0xff]  ;;  %2978 = vmatpush.msrb.mxu3 %v2424_v61  ;;  %2919 = vmatpush.msrb.mxu0 %v2032_v62  ;;  %v1833_v53 = vld [vmem:[%s5297_s15 + $0x320] sm:$0xff] }
 0x20b   : > { %v2416_v26 = vld [vmem:[%s5297_s15 + $0x1558] sm:$0xff]  ;;  %2939 = vmatpush.msrb.mxu1 %v2160_v63  ;;  %2959 = vmatpush.msrb.mxu2 %v2288_v25  ;;  %v1961_v54 = vld [vmem:[%s5297_s15 + $0x720] sm:$0xff] }
 0x20c   : > { %v2024_v5 = vld [vmem:[%s5297_s15 + $0x918] sm:$0xff]  ;;  %2979 = vmatpush.msrb.mxu3 %v2416_v26  ;;  %v2089_v56 = vld [vmem:[%s5297_s15 + $0xb20] sm:$0xff] }
 0x20d   : > { %v2152_v7 = vld [vmem:[%s5297_s15 + $0xd18] sm:$0xff]  ;;  %2920 = vmatpush.msrb.mxu0 %v2024_v5  ;;  %v2217_v55 = vld [vmem:[%s5297_s15 + $0xf20] sm:$0xff] }
 0x20e   : > { %v2280_v8 = vld [vmem:[%s5297_s15 + $0x1118] sm:$0xff]  ;;  %2940 = vmatpush.msrb.mxu1 %v2152_v7  ;;  %v1825_v57 = vld [vmem:[%s5297_s15 + $0x2e0] sm:$0xff] }
 0x20f   : > { %v2408_v9 = vld [vmem:[%s5297_s15 + $0x1518] sm:$0xff]  ;;  %2960 = vmatpush.msrb.mxu2 %v2280_v8  ;;  %v1953_v58 = vld [vmem:[%s5297_s15 + $0x6e0] sm:$0xff] }
 0x210   : > { %v2016_v10 = vld [vmem:[%s5297_s15 + $0x8d8] sm:$0xff]  ;;  %2980 = vmatpush.msrb.mxu3 %v2408_v9  ;;  %v2081_v18 = vld [vmem:[%s5297_s15 + $0xae0] sm:$0xff] }
 0x211   : > { %v2144_v11 = vld [vmem:[%s5297_s15 + $0xcd8] sm:$0xff]  ;;  %2921 = vmatpush.msrb.mxu0 %v2016_v10  ;;  %v2209_v19 = vld [vmem:[%s5297_s15 + $0xee0] sm:$0xff] }
 0x212   : > { %v2272_v12 = vld [vmem:[%s5297_s15 + $0x10d8] sm:$0xff]  ;;  %2941 = vmatpush.msrb.mxu1 %v2144_v11  ;;  %v1817_v60 = vld [vmem:[%s5297_s15 + $0x2a0] sm:$0xff] }
 0x213   : > { %v2400_v13 = vld [vmem:[%s5297_s15 + $0x14d8] sm:$0xff]  ;;  %2961 = vmatpush.msrb.mxu2 %v2272_v12  ;;  %v1945_v61 = vld [vmem:[%s5297_s15 + $0x6a0] sm:$0xff] }
 0x214   : > { %v2008_v14 = vld [vmem:[%s5297_s15 + $0x898] sm:$0xff]  ;;  %2981 = vmatpush.msrb.mxu3 %v2400_v13  ;;  %v2073_v62 = vld [vmem:[%s5297_s15 + $0xaa0] sm:$0xff] }
 0x215   : > { %v2136_v16 = vld [vmem:[%s5297_s15 + $0xc98] sm:$0xff]  ;;  %2922 = vmatpush.msrb.mxu0 %v2008_v14  ;;  %v2201_v63 = vld [vmem:[%s5297_s15 + $0xea0] sm:$0xff] }
 0x216   : > { %v2264_v21 = vld [vmem:[%s5297_s15 + $0x1098] sm:$0xff]  ;;  %2942 = vmatpush.msrb.mxu1 %v2136_v16  ;;  %v1809_v25 = vld [vmem:[%s5297_s15 + $0x260] sm:$0xff] }
 0x217   : > { %v2392_v22 = vld [vmem:[%s5297_s15 + $0x1498] sm:$0xff]  ;;  %2962 = vmatpush.msrb.mxu2 %v2264_v21  ;;  %v1937_v26 = vld [vmem:[%s5297_s15 + $0x660] sm:$0xff] }
 0x218   : > { %v2000_v23 = vld [vmem:[%s5297_s15 + $0x858] sm:$0xff]  ;;  %2982 = vmatpush.msrb.mxu3 %v2392_v22  ;;  %v2065_v5 = vld [vmem:[%s5297_s15 + $0xa60] sm:$0xff] }
 0x219   : > { %v2128_v24 = vld [vmem:[%s5297_s15 + $0xc58] sm:$0xff]  ;;  %2923 = vmatpush.msrb.mxu0 %v2000_v23  ;;  %v2193_v7 = vld [vmem:[%s5297_s15 + $0xe60] sm:$0xff] }
 0x21a   : > { %v2256_v27 = vld [vmem:[%s5297_s15 + $0x1058] sm:$0xff]  ;;  %2943 = vmatpush.msrb.mxu1 %v2128_v24  ;;  %v1801_v8 = vld [vmem:[%s5297_s15 + $0x220] sm:$0xff] }
 0x21b   : > { %v2384_v6 = vld [vmem:[%s5297_s15 + $0x1458] sm:$0xff]  ;;  %2963 = vmatpush.msrb.mxu2 %v2256_v27  ;;  %v1929_v9 = vld [vmem:[%s5297_s15 + $0x620] sm:$0xff] }
 0x21c   : > { %v1992_v28 = vld [vmem:[%s5297_s15 + $0x818] sm:$0xff]  ;;  %2983 = vmatpush.msrb.mxu3 %v2384_v6  ;;  %v2057_v10 = vld [vmem:[%s5297_s15 + $0xa20] sm:$0xff] }
 0x21d   : > { %v2120_v29 = vld [vmem:[%s5297_s15 + $0xc18] sm:$0xff]  ;;  %2924 = vmatpush.msrb.mxu0 %v1992_v28  ;;  %v2185_v11 = vld [vmem:[%s5297_s15 + $0xe20] sm:$0xff] }
 0x21e   : > { %v2248_v52 = vld [vmem:[%s5297_s15 + $0x1018] sm:$0xff]  ;;  %2944 = vmatpush.msrb.mxu1 %v2120_v29  ;;  %2925 = vmatmul.f32.vlgmr.msrb.gmra.mxu0 %v5780_v36  ;;  %v1793_v12 = vld [vmem:[%s5297_s15 + $0x1e0] sm:$0xff] }
 0x21f   : > { %v2376_v30 = vld [vmem:[%s5297_s15 + $0x1418] sm:$0xff]  ;;  %2964 = vmatpush.msrb.mxu2 %v2248_v52  ;;  %2989 = vmatpush.msra.mxu0 %v1857_v31  ;;  %v1921_v13 = vld [vmem:[%s5297_s15 + $0x5e0] sm:$0xff] }
 0x220   : > { %2984 = vmatpush.msrb.mxu3 %v2376_v30  ;;  %2965 = vmatmul.f32.vlgmr.msrb.gmra.mxu2 %v5786_v37  ;;  %v5796_v42 = vld [vmem:[%s6862_s0 + $0x18] sm:$0xff]  ;;  %v2049_v14 = vld [vmem:[%s5297_s15 + $0x9e0] sm:$0xff] }
 0x221   : > { %3009 = vmatpush.msra.mxu1 %v1985_v33  ;;  %3029 = vmatpush.msra.mxu2 %v2113_v34  ;;  %v2177_v16 = vld [vmem:[%s5297_s15 + $0xde0] sm:$0xff] }
 0x222   : > { %3049 = vmatpush.msra.mxu3 %v2241_v35  ;;  %2945 = vmatmul.f32.vlgmr.msrb.gmra.mxu1 %v5796_v42  ;;  %v1785_v21 = vld [vmem:[%s5297_s15 + $0x1a0] sm:$0xff] }
 0x223   : > { %2985 = vmatmul.f32.vlgmr.msrb.gmra.mxu3 %v5802_v43  ;;  %2990 = vmatpush.msra.mxu0 %v1849_v38  ;;  %v1913_v22 = vld [vmem:[%s5297_s15 + $0x5a0] sm:$0xff] }
 0x224   : > { %3010 = vmatpush.msra.mxu1 %v1977_v39  ;;  %3030 = vmatpush.msra.mxu2 %v2105_v40  ;;  %v2041_v23 = vld [vmem:[%s5297_s15 + $0x9a0] sm:$0xff] }
 0x225   : > { %3050 = vmatpush.msra.mxu3 %v2233_v41  ;;  %2991 = vmatpush.msra.mxu0 %v1841_v44  ;;  %v2169_v24 = vld [vmem:[%s5297_s15 + $0xda0] sm:$0xff] }
 0x226   : > { %3011 = vmatpush.msra.mxu1 %v1969_v48  ;;  %3031 = vmatpush.msra.mxu2 %v2097_v49  ;;  %v1777_v27 = vld [vmem:[%s5297_s15 + $0x160] sm:$0xff] }
 0x227   : > { %3051 = vmatpush.msra.mxu3 %v2225_v51  ;;  %2992 = vmatpush.msra.mxu0 %v1833_v53  ;;  %v1905_v6 = vld [vmem:[%s5297_s15 + $0x560] sm:$0xff] }
 0x228   : > { %3012 = vmatpush.msra.mxu1 %v1961_v54  ;;  %3032 = vmatpush.msra.mxu2 %v2089_v56  ;;  %v2033_v28 = vld [vmem:[%s5297_s15 + $0x960] sm:$0xff] }
 0x229   : > { %3052 = vmatpush.msra.mxu3 %v2217_v55  ;;  %2993 = vmatpush.msra.mxu0 %v1825_v57  ;;  %v2161_v29 = vld [vmem:[%s5297_s15 + $0xd60] sm:$0xff] }
 0x22a   : > { %3013 = vmatpush.msra.mxu1 %v1953_v58  ;;  %3033 = vmatpush.msra.mxu2 %v2081_v18  ;;  %v1769_v52 = vld [vmem:[%s5297_s15 + $0x120] sm:$0xff] }
 0x22b   : > { %3053 = vmatpush.msra.mxu3 %v2209_v19  ;;  %2994 = vmatpush.msra.mxu0 %v1817_v60  ;;  %v1897_v30 = vld [vmem:[%s5297_s15 + $0x520] sm:$0xff]  ;;  %v1858_v60 = vld [vmem:[%s5297_s15 + $0x3e8] sm:$0xff] }
 0x22c   : > { %3014 = vmatpush.msra.mxu1 %v1945_v61  ;;  %3034 = vmatpush.msra.mxu2 %v2073_v62  ;;  %v2025_v31 = vld [vmem:[%s5297_s15 + $0x920] sm:$0xff]  ;;  %v1986_v61 = vld [vmem:[%s5297_s15 + $0x7e8] sm:$0xff] }
 0x22d   : > { %3054 = vmatpush.msra.mxu3 %v2201_v63  ;;  %2995 = vmatpush.msra.mxu0 %v1809_v25  ;;  %v2153_v33 = vld [vmem:[%s5297_s15 + $0xd20] sm:$0xff]  ;;  %v1850_v25 = vld [vmem:[%s5297_s15 + $0x3a8] sm:$0xff] }
 0x22e   : > { %3015 = vmatpush.msra.mxu1 %v1937_v26  ;;  %3035 = vmatpush.msra.mxu2 %v2065_v5  ;;  %v1761_v34 = vld [vmem:[%s5297_s15 + $0xe0] sm:$0xff]  ;;  %v1978_v26 = vld [vmem:[%s5297_s15 + $0x7a8] sm:$0xff] }
 0x22f   : > { %3055 = vmatpush.msra.mxu3 %v2193_v7  ;;  %2996 = vmatpush.msra.mxu0 %v1801_v8  ;;  %v1889_v35 = vld [vmem:[%s5297_s15 + $0x4e0] sm:$0xff]  ;;  %v1842_v8 = vld [vmem:[%s5297_s15 + $0x368] sm:$0xff] }
 0x230   : > { %3016 = vmatpush.msra.mxu1 %v1929_v9  ;;  %3036 = vmatpush.msra.mxu2 %v2057_v10  ;;  %v2017_v38 = vld [vmem:[%s5297_s15 + $0x8e0] sm:$0xff]  ;;  %v1970_v9 = vld [vmem:[%s5297_s15 + $0x768] sm:$0xff] }
 0x231   : > { %3056 = vmatpush.msra.mxu3 %v2185_v11  ;;  %2997 = vmatpush.msra.mxu0 %v1793_v12  ;;  %v2145_v39 = vld [vmem:[%s5297_s15 + $0xce0] sm:$0xff]  ;;  %v1834_v12 = vld [vmem:[%s5297_s15 + $0x328] sm:$0xff] }
 0x232   : > { %3017 = vmatpush.msra.mxu1 %v1921_v13  ;;  %3037 = vmatpush.msra.mxu2 %v2049_v14  ;;  %v1753_v40 = vld [vmem:[%s5297_s15 + $0xa0] sm:$0xff]  ;;  %v1962_v13 = vld [vmem:[%s5297_s15 + $0x728] sm:$0xff] }
 0x233   : > { %3057 = vmatpush.msra.mxu3 %v2177_v16  ;;  %2998 = vmatpush.msra.mxu0 %v1785_v21  ;;  %v1881_v41 = vld [vmem:[%s5297_s15 + $0x4a0] sm:$0xff]  ;;  %v1826_v21 = vld [vmem:[%s5297_s15 + $0x2e8] sm:$0xff] }
 0x234   : > { %3018 = vmatpush.msra.mxu1 %v1913_v22  ;;  %3038 = vmatpush.msra.mxu2 %v2041_v23  ;;  %v2009_v44 = vld [vmem:[%s5297_s15 + $0x8a0] sm:$0xff]  ;;  %v1954_v22 = vld [vmem:[%s5297_s15 + $0x6e8] sm:$0xff] }
 0x235   : > { %3058 = vmatpush.msra.mxu3 %v2169_v24  ;;  %2999 = vmatpush.msra.mxu0 %v1777_v27  ;;  %v2137_v48 = vld [vmem:[%s5297_s15 + $0xca0] sm:$0xff]  ;;  %v1818_v27 = vld [vmem:[%s5297_s15 + $0x2a8] sm:$0xff] }
 0x236   : > { %3019 = vmatpush.msra.mxu1 %v1905_v6  ;;  %3039 = vmatpush.msra.mxu2 %v2033_v28  ;;  %v1745_v49 = vld [vmem:[%s5297_s15 + $0x60] sm:$0xff]  ;;  %v1946_v6 = vld [vmem:[%s5297_s15 + $0x6a8] sm:$0xff] }
 0x237   : > { %3059 = vmatpush.msra.mxu3 %v2161_v29  ;;  %3000 = vmatpush.msra.mxu0 %v1769_v52  ;;  %v1873_v51 = vld [vmem:[%s5297_s15 + $0x460] sm:$0xff]  ;;  %v1810_v52 = vld [vmem:[%s5297_s15 + $0x268] sm:$0xff] }
 0x238   : > { %3020 = vmatpush.msra.mxu1 %v1897_v30  ;;  %3040 = vmatpush.msra.mxu2 %v2025_v31  ;;  %v2001_v53 = vld [vmem:[%s5297_s15 + $0x860] sm:$0xff]  ;;  %v1938_v30 = vld [vmem:[%s5297_s15 + $0x668] sm:$0xff] }
 0x239   : > { %3060 = vmatpush.msra.mxu3 %v2153_v33  ;;  %3001 = vmatpush.msra.mxu0 %v1761_v34  ;;  %v2129_v54 = vld [vmem:[%s5297_s15 + $0xc60] sm:$0xff]  ;;  %v1802_v34 = vld [vmem:[%s5297_s15 + $0x228] sm:$0xff] }
 0x23a   : > { %3021 = vmatpush.msra.mxu1 %v1889_v35  ;;  %3041 = vmatpush.msra.mxu2 %v2017_v38  ;;  %v1737_v56 = vld [vmem:[%s5297_s15 + $0x20] sm:$0xff]  ;;  %v1930_v35 = vld [vmem:[%s5297_s15 + $0x628] sm:$0xff] }
 0x23b   : > { %3061 = vmatpush.msra.mxu3 %v2145_v39  ;;  %3002 = vmatpush.msra.mxu0 %v1753_v40  ;;  %v1865_v55 = vld [vmem:[%s5297_s15 + $0x420] sm:$0xff]  ;;  %v1794_v40 = vld [vmem:[%s5297_s15 + $0x1e8] sm:$0xff] }
 0x23c   : > { %3022 = vmatpush.msra.mxu1 %v1881_v41  ;;  %3042 = vmatpush.msra.mxu2 %v2009_v44  ;;  %v1993_v57 = vld [vmem:[%s5297_s15 + $0x820] sm:$0xff]  ;;  %v1922_v41 = vld [vmem:[%s5297_s15 + $0x5e8] sm:$0xff] }
 0x23d   : > { %3062 = vmatpush.msra.mxu3 %v2137_v48  ;;  %3003 = vmatpush.msra.mxu0 %v1745_v49  ;;  %v2121_v58 = vld [vmem:[%s5297_s15 + $0xc20] sm:$0xff]  ;;  %v1786_v49 = vld [vmem:[%s5297_s15 + $0x1a8] sm:$0xff] }
 0x23e   : > { %3023 = vmatpush.msra.mxu1 %v1873_v51  ;;  %3043 = vmatpush.msra.mxu2 %v2001_v53  ;;  %v2369_v18 = vld [vmem:[%s5297_s15 + $0x13e0] sm:$0xff]  ;;  %v1914_v51 = vld [vmem:[%s5297_s15 + $0x5a8] sm:$0xff] }
 0x23f   : > { %3063 = vmatpush.msra.mxu3 %v2129_v54  ;;  %3004 = vmatpush.msra.mxu0 %v1737_v56  ;;  %v2497_v19 = vld [vmem:[%s5297_s15 + $0x17e0] sm:$0xff]  ;;  %v1778_v56 = vld [vmem:[%s5297_s15 + $0x168] sm:$0xff] }
 0x240   : > { %3024 = vmatpush.msra.mxu1 %v1865_v55  ;;  %3044 = vmatpush.msra.mxu2 %v1993_v57  ;;  %v2361_v62 = vld [vmem:[%s5297_s15 + $0x13a0] sm:$0xff]  ;;  %v1906_v55 = vld [vmem:[%s5297_s15 + $0x568] sm:$0xff] }
 0x241   : > { %3064 = vmatpush.msra.mxu3 %v2121_v58  ;;  %3005 = vmatmul.f32.vlgmr.msra.gmra.mxu0 %v5703_v17  ;;  %v2489_v63 = vld [vmem:[%s5297_s15 + $0x17a0] sm:$0xff] }
 0x242   : > { %3045 = vmatmul.f32.vlgmr.msra.gmra.mxu2 %v5780_v36  ;;  %3069 = vmatpush.msrb.mxu0 %v2369_v18  ;;  %v2353_v5 = vld [vmem:[%s5297_s15 + $0x1360] sm:$0xff]  ;;  %v1770_v18 = vld [vmem:[%s5297_s15 + $0x128] sm:$0xff] }
 0x243   : > { %3089 = vmatpush.msrb.mxu1 %v2497_v19  ;;  %3109 = vmatpush.msrb.mxu2 %v1858_v60  ;;  %v2481_v7 = vld [vmem:[%s5297_s15 + $0x1760] sm:$0xff]  ;;  %v1898_v19 = vld [vmem:[%s5297_s15 + $0x528] sm:$0xff] }
 0x244   : > { %3129 = vmatpush.msrb.mxu3 %v1986_v61  ;;  %3025 = vmatmul.f32.vlgmr.msra.gmra.mxu1 %v5714_v45  ;;  %v2345_v10 = vld [vmem:[%s5297_s15 + $0x1320] sm:$0xff] }
 0x245   : > { %3065 = vmatmul.f32.vlgmr.msra.gmra.mxu3 %v5796_v42  ;;  %3070 = vmatpush.msrb.mxu0 %v2361_v62  ;;  %v2473_v11 = vld [vmem:[%s5297_s15 + $0x1720] sm:$0xff]  ;;  %v1762_v62 = vld [vmem:[%s5297_s15 + $0xe8] sm:$0xff] }
 0x246   : > { %3090 = vmatpush.msrb.mxu1 %v2489_v63  ;;  %3110 = vmatpush.msrb.mxu2 %v1850_v25  ;;  %v2337_v14 = vld [vmem:[%s5297_s15 + $0x12e0] sm:$0xff]  ;;  %v1890_v63 = vld [vmem:[%s5297_s15 + $0x4e8] sm:$0xff] }
 0x247   : > { %3130 = vmatpush.msrb.mxu3 %v1978_v26  ;;  %3071 = vmatpush.msrb.mxu0 %v2353_v5  ;;  %v2465_v16 = vld [vmem:[%s5297_s15 + $0x16e0] sm:$0xff]  ;;  %v1754_v5 = vld [vmem:[%s5297_s15 + $0xa8] sm:$0xff] }
 0x248   : > { %3091 = vmatpush.msrb.mxu1 %v2481_v7  ;;  %3111 = vmatpush.msrb.mxu2 %v1842_v8  ;;  %v2329_v23 = vld [vmem:[%s5297_s15 + $0x12a0] sm:$0xff]  ;;  %v1882_v7 = vld [vmem:[%s5297_s15 + $0x4a8] sm:$0xff] }
 0x249   : > { %3131 = vmatpush.msrb.mxu3 %v1970_v9  ;;  %3072 = vmatpush.msrb.mxu0 %v2345_v10  ;;  %v2457_v24 = vld [vmem:[%s5297_s15 + $0x16a0] sm:$0xff]  ;;  %v1746_v10 = vld [vmem:[%s5297_s15 + $0x68] sm:$0xff] }
 0x24a   : > { %3092 = vmatpush.msrb.mxu1 %v2473_v11  ;;  %3112 = vmatpush.msrb.mxu2 %v1834_v12  ;;  %v2321_v28 = vld [vmem:[%s5297_s15 + $0x1260] sm:$0xff]  ;;  %v1874_v11 = vld [vmem:[%s5297_s15 + $0x468] sm:$0xff] }
 0x24b   : > { %3132 = vmatpush.msrb.mxu3 %v1962_v13  ;;  %3073 = vmatpush.msrb.mxu0 %v2337_v14  ;;  %v2449_v29 = vld [vmem:[%s5297_s15 + $0x1660] sm:$0xff]  ;;  %v1738_v14 = vld [vmem:[%s5297_s15 + $0x28] sm:$0xff] }
 0x24c   : > { %3093 = vmatpush.msrb.mxu1 %v2465_v16  ;;  %3113 = vmatpush.msrb.mxu2 %v1826_v21  ;;  %v2313_v31 = vld [vmem:[%s5297_s15 + $0x1220] sm:$0xff]  ;;  %v1866_v16 = vld [vmem:[%s5297_s15 + $0x428] sm:$0xff] }
 0x24d   : > { %3133 = vmatpush.msrb.mxu3 %v1954_v22  ;;  %3074 = vmatpush.msrb.mxu0 %v2329_v23  ;;  %v2441_v33 = vld [vmem:[%s5297_s15 + $0x1620] sm:$0xff]  ;;  %v2114_v21 = vld [vmem:[%s5297_s15 + $0xbe8] sm:$0xff] }
 0x24e   : > { %3094 = vmatpush.msrb.mxu1 %v2457_v24  ;;  %3114 = vmatpush.msrb.mxu2 %v1818_v27  ;;  %v2305_v38 = vld [vmem:[%s5297_s15 + $0x11e0] sm:$0xff]  ;;  %v2242_v22 = vld [vmem:[%s5297_s15 + $0xfe8] sm:$0xff] }
 0x24f   : > { %3134 = vmatpush.msrb.mxu3 %v1946_v6  ;;  %3075 = vmatpush.msrb.mxu0 %v2321_v28  ;;  %v2433_v39 = vld [vmem:[%s5297_s15 + $0x15e0] sm:$0xff]  ;;  %v2370_v23 = vld [vmem:[%s5297_s15 + $0x13e8] sm:$0xff] }
 0x250   : > { %3095 = vmatpush.msrb.mxu1 %v2449_v29  ;;  %3115 = vmatpush.msrb.mxu2 %v1810_v52  ;;  %v2297_v44 = vld [vmem:[%s5297_s15 + $0x11a0] sm:$0xff]  ;;  %v2498_v24 = vld [vmem:[%s5297_s15 + $0x17e8] sm:$0xff] }
 0x251   : > { %3135 = vmatpush.msrb.mxu3 %v1938_v30  ;;  %3076 = vmatpush.msrb.mxu0 %v2313_v31  ;;  %v2425_v48 = vld [vmem:[%s5297_s15 + $0x15a0] sm:$0xff]  ;;  %v2106_v27 = vld [vmem:[%s5297_s15 + $0xba8] sm:$0xff] }
 0x252   : > { %3096 = vmatpush.msrb.mxu1 %v2441_v33  ;;  %3116 = vmatpush.msrb.mxu2 %v1802_v34  ;;  %v2289_v53 = vld [vmem:[%s5297_s15 + $0x1160] sm:$0xff]  ;;  %v2234_v6 = vld [vmem:[%s5297_s15 + $0xfa8] sm:$0xff] }
 0x253   : > { %3136 = vmatpush.msrb.mxu3 %v1930_v35  ;;  %3077 = vmatpush.msrb.mxu0 %v2305_v38  ;;  %v2417_v54 = vld [vmem:[%s5297_s15 + $0x1560] sm:$0xff]  ;;  %v2362_v28 = vld [vmem:[%s5297_s15 + $0x13a8] sm:$0xff] }
 0x254   : > { %3097 = vmatpush.msrb.mxu1 %v2433_v39  ;;  %3117 = vmatpush.msrb.mxu2 %v1794_v40  ;;  %v2281_v57 = vld [vmem:[%s5297_s15 + $0x1120] sm:$0xff]  ;;  %v2490_v29 = vld [vmem:[%s5297_s15 + $0x17a8] sm:$0xff] }
 0x255   : > { %3137 = vmatpush.msrb.mxu3 %v1922_v41  ;;  %3078 = vmatpush.msrb.mxu0 %v2297_v44  ;;  %v2409_v58 = vld [vmem:[%s5297_s15 + $0x1520] sm:$0xff]  ;;  %v2098_v52 = vld [vmem:[%s5297_s15 + $0xb68] sm:$0xff] }
 0x256   : > { %3098 = vmatpush.msrb.mxu1 %v2425_v48  ;;  %3118 = vmatpush.msrb.mxu2 %v1786_v49  ;;  %v2273_v60 = vld [vmem:[%s5297_s15 + $0x10e0] sm:$0xff]  ;;  %v2354_v30 = vld [vmem:[%s5297_s15 + $0x1368] sm:$0xff] }
 0x257   : > { %3138 = vmatpush.msrb.mxu3 %v1914_v51  ;;  %3079 = vmatpush.msrb.mxu0 %v2289_v53  ;;  %v2401_v61 = vld [vmem:[%s5297_s15 + $0x14e0] sm:$0xff]  ;;  %v2482_v31 = vld [vmem:[%s5297_s15 + $0x1768] sm:$0xff] }
 0x258   : > { %3099 = vmatpush.msrb.mxu1 %v2417_v54  ;;  %3119 = vmatpush.msrb.mxu2 %v1778_v56  ;;  %v2265_v25 = vld [vmem:[%s5297_s15 + $0x10a0] sm:$0xff]  ;;  %v2090_v33 = vld [vmem:[%s5297_s15 + $0xb28] sm:$0xff] }
 0x259   : > { %3139 = vmatpush.msrb.mxu3 %v1906_v55  ;;  %3080 = vmatpush.msrb.mxu0 %v2281_v57  ;;  %v2393_v26 = vld [vmem:[%s5297_s15 + $0x14a0] sm:$0xff]  ;;  %v2218_v34 = vld [vmem:[%s5297_s15 + $0xf28] sm:$0xff] }
 0x25a   : > { %3100 = vmatpush.msrb.mxu1 %v2409_v58  ;;  %3120 = vmatpush.msrb.mxu2 %v1770_v18  ;;  %v2257_v8 = vld [vmem:[%s5297_s15 + $0x1060] sm:$0xff]  ;;  %v2346_v35 = vld [vmem:[%s5297_s15 + $0x1328] sm:$0xff] }
 0x25b   : > { %3140 = vmatpush.msrb.mxu3 %v1898_v19  ;;  %3081 = vmatpush.msrb.mxu0 %v2273_v60  ;;  %v2385_v9 = vld [vmem:[%s5297_s15 + $0x1460] sm:$0xff]  ;;  %v2082_v38 = vld [vmem:[%s5297_s15 + $0xae8] sm:$0xff] }
 0x25c   : > { %3101 = vmatpush.msrb.mxu1 %v2401_v61  ;;  %3121 = vmatpush.msrb.mxu2 %v1762_v62  ;;  %v2249_v12 = vld [vmem:[%s5297_s15 + $0x1020] sm:$0xff]  ;;  %v2210_v39 = vld [vmem:[%s5297_s15 + $0xee8] sm:$0xff] }
 0x25d   : > { %3141 = vmatpush.msrb.mxu3 %v1890_v63  ;;  %3082 = vmatpush.msrb.mxu0 %v2265_v25  ;;  %v2377_v13 = vld [vmem:[%s5297_s15 + $0x1420] sm:$0xff]  ;;  %v2338_v40 = vld [vmem:[%s5297_s15 + $0x12e8] sm:$0xff] }
 0x25e   : > { %3102 = vmatpush.msrb.mxu1 %v2393_v26  ;;  %3122 = vmatpush.msrb.mxu2 %v1754_v5  ;;  %v2466_v41 = vld [vmem:[%s5297_s15 + $0x16e8] sm:$0xff] }
 0x25f   : > { %3142 = vmatpush.msrb.mxu3 %v1882_v7  ;;  %3083 = vmatpush.msrb.mxu0 %v2257_v8  ;;  %v2074_v44 = vld [vmem:[%s5297_s15 + $0xaa8] sm:$0xff] }
 0x260   : > { %3103 = vmatpush.msrb.mxu1 %v2385_v9  ;;  %3123 = vmatpush.msrb.mxu2 %v1746_v10  ;;  %v2202_v48 = vld [vmem:[%s5297_s15 + $0xea8] sm:$0xff] }
 0x261   : > { %3143 = vmatpush.msrb.mxu3 %v1874_v11  ;;  %3084 = vmatpush.msrb.mxu0 %v2249_v12  ;;  %v2330_v49 = vld [vmem:[%s5297_s15 + $0x12a8] sm:$0xff] }
 0x262   : > { %3104 = vmatpush.msrb.mxu1 %v2377_v13  ;;  %3124 = vmatpush.msrb.mxu2 %v1738_v14  ;;  %v2458_v51 = vld [vmem:[%s5297_s15 + $0x16a8] sm:$0xff] }
 0x263   : > { %3144 = vmatpush.msrb.mxu3 %v1866_v16  ;;  %3085 = vmatmul.f32.vlgmr.msrb.gmra.mxu0 %v5786_v37  ;;  %v2066_v53 = vld [vmem:[%s5297_s15 + $0xa68] sm:$0xff] }
 0x264   : > { %3125 = vmatmul.f32.vlgmr.msrb.gmra.mxu2 %v5703_v17  ;;  %3149 = vmatpush.msra.mxu0 %v2114_v21  ;;  %v2226_v17 = vld [vmem:[%s5297_s15 + $0xf68] sm:$0xff] }
 0x265   : > { %3169 = vmatpush.msra.mxu1 %v2242_v22  ;;  %3189 = vmatpush.msra.mxu2 %v2370_v23  ;;  %v2194_v54 = vld [vmem:[%s5297_s15 + $0xe68] sm:$0xff] }
 0x266   : > { %3209 = vmatpush.msra.mxu3 %v2498_v24  ;;  %3105 = vmatmul.f32.vlgmr.msrb.gmra.mxu1 %v5802_v43  ;;  %v2322_v56 = vld [vmem:[%s5297_s15 + $0x1268] sm:$0xff] }
 0x267   : > { %3145 = vmatmul.f32.vlgmr.msrb.gmra.mxu3 %v5714_v45  ;;  %3150 = vmatpush.msra.mxu0 %v2106_v27  ;;  %v2474_v45 = vld [vmem:[%s5297_s15 + $0x1728] sm:$0xff] }
 0x268   : > { %3170 = vmatpush.msra.mxu1 %v2234_v6  ;;  %3190 = vmatpush.msra.mxu2 %v2362_v28  ;;  %v2450_v55 = vld [vmem:[%s5297_s15 + $0x1668] sm:$0xff] }
 0x269   : > { %3210 = vmatpush.msra.mxu3 %v2490_v29  ;;  %3151 = vmatpush.msra.mxu0 %v2098_v52  ;;  %v2058_v57 = vld [vmem:[%s5297_s15 + $0xa28] sm:$0xff] }
 0x26a   : > { %3171 = vmatpush.msra.mxu1 %v2226_v17  ;;  %3191 = vmatpush.msra.mxu2 %v2354_v30  ;;  %v2186_v58 = vld [vmem:[%s5297_s15 + $0xe28] sm:$0xff] }
 0x26b   : > { %3211 = vmatpush.msra.mxu3 %v2482_v31  ;;  %3152 = vmatpush.msra.mxu0 %v2090_v33  ;;  %v2314_v18 = vld [vmem:[%s5297_s15 + $0x1228] sm:$0xff] }
 0x26c   : > { %3172 = vmatpush.msra.mxu1 %v2218_v34  ;;  %3192 = vmatpush.msra.mxu2 %v2346_v35  ;;  %v2442_v19 = vld [vmem:[%s5297_s15 + $0x1628] sm:$0xff] }
 0x26d   : > { %3212 = vmatpush.msra.mxu3 %v2474_v45  ;;  %3153 = vmatpush.msra.mxu0 %v2082_v38  ;;  %v2050_v60 = vld [vmem:[%s5297_s15 + $0x9e8] sm:$0xff]  ;;  %v1859_v38 = vld [vmem:[%s5297_s15 + $0x3f0] sm:$0xff] }
 0x26e   : > { %3173 = vmatpush.msra.mxu1 %v2210_v39  ;;  %3193 = vmatpush.msra.mxu2 %v2338_v40  ;;  %v2178_v61 = vld [vmem:[%s5297_s15 + $0xde8] sm:$0xff]  ;;  %v1987_v39 = vld [vmem:[%s5297_s15 + $0x7f0] sm:$0xff] }
 0x26f   : > { %3213 = vmatpush.msra.mxu3 %v2466_v41  ;;  %3154 = vmatpush.msra.mxu0 %v2074_v44  ;;  %v2306_v62 = vld [vmem:[%s5297_s15 + $0x11e8] sm:$0xff]  ;;  %v2115_v40 = vld [vmem:[%s5297_s15 + $0xbf0] sm:$0xff] }
 0x270   : > { %3174 = vmatpush.msra.mxu1 %v2202_v48  ;;  %3194 = vmatpush.msra.mxu2 %v2330_v49  ;;  %v2434_v63 = vld [vmem:[%s5297_s15 + $0x15e8] sm:$0xff]  ;;  %v2243_v41 = vld [vmem:[%s5297_s15 + $0xff0] sm:$0xff] }
 0x271   : > { %3214 = vmatpush.msra.mxu3 %v2458_v51  ;;  %3155 = vmatpush.msra.mxu0 %v2066_v53  ;;  %v2042_v25 = vld [vmem:[%s5297_s15 + $0x9a8] sm:$0xff]  ;;  %v1851_v44 = vld [vmem:[%s5297_s15 + $0x3b0] sm:$0xff] }
 0x272   : > { %3175 = vmatpush.msra.mxu1 %v2194_v54  ;;  %3195 = vmatpush.msra.mxu2 %v2322_v56  ;;  %v2170_v26 = vld [vmem:[%s5297_s15 + $0xda8] sm:$0xff]  ;;  %v1979_v48 = vld [vmem:[%s5297_s15 + $0x7b0] sm:$0xff] }
 0x273   : > { %3215 = vmatpush.msra.mxu3 %v2450_v55  ;;  %3156 = vmatpush.msra.mxu0 %v2058_v57  ;;  %v2298_v5 = vld [vmem:[%s5297_s15 + $0x11a8] sm:$0xff]  ;;  %v2107_v49 = vld [vmem:[%s5297_s15 + $0xbb0] sm:$0xff] }
 0x274   : > { %3176 = vmatpush.msra.mxu1 %v2186_v58  ;;  %3196 = vmatpush.msra.mxu2 %v2314_v18  ;;  %v2426_v7 = vld [vmem:[%s5297_s15 + $0x15a8] sm:$0xff]  ;;  %v2235_v51 = vld [vmem:[%s5297_s15 + $0xfb0] sm:$0xff] }
 0x275   : > { %3216 = vmatpush.msra.mxu3 %v2442_v19  ;;  %3157 = vmatpush.msra.mxu0 %v2050_v60  ;;  %v2034_v8 = vld [vmem:[%s5297_s15 + $0x968] sm:$0xff]  ;;  %v2099_v53 = vld [vmem:[%s5297_s15 + $0xb70] sm:$0xff] }
 0x276   : > { %3177 = vmatpush.msra.mxu1 %v2178_v61  ;;  %3197 = vmatpush.msra.mxu2 %v2306_v62  ;;  %v2162_v9 = vld [vmem:[%s5297_s15 + $0xd68] sm:$0xff]  ;;  %v2227_v54 = vld [vmem:[%s5297_s15 + $0xf70] sm:$0xff] }
 0x277   : > { %3217 = vmatpush.msra.mxu3 %v2434_v63  ;;  %3158 = vmatpush.msra.mxu0 %v2042_v25  ;;  %v2290_v10 = vld [vmem:[%s5297_s15 + $0x1168] sm:$0xff]  ;;  %v1835_v56 = vld [vmem:[%s5297_s15 + $0x330] sm:$0xff] }
 0x278   : > { %3178 = vmatpush.msra.mxu1 %v2170_v26  ;;  %v2418_v11 = vld [vmem:[%s5297_s15 + $0x1568] sm:$0xff]  ;;  %3198 = vmatpush.msra.mxu2 %v2298_v5  ;;  %v1963_v55 = vld [vmem:[%s5297_s15 + $0x730] sm:$0xff] }
 0x279   : > { %3218 = vmatpush.msra.mxu3 %v2426_v7  ;;  %v2026_v12 = vld [vmem:[%s5297_s15 + $0x928] sm:$0xff]  ;;  %3159 = vmatpush.msra.mxu0 %v2034_v8  ;;  %v1827_v57 = vld [vmem:[%s5297_s15 + $0x2f0] sm:$0xff] }
 0x27a   : > { %v2154_v13 = vld [vmem:[%s5297_s15 + $0xd28] sm:$0xff]  ;;  %3179 = vmatpush.msra.mxu1 %v2162_v9  ;;  %3199 = vmatpush.msra.mxu2 %v2290_v10  ;;  %v1955_v58 = vld [vmem:[%s5297_s15 + $0x6f0] sm:$0xff] }
 0x27b   : > { %v2282_v14 = vld [vmem:[%s5297_s15 + $0x1128] sm:$0xff]  ;;  %3219 = vmatpush.msra.mxu3 %v2418_v11  ;;  %3160 = vmatpush.msra.mxu0 %v2026_v12  ;;  %v2083_v18 = vld [vmem:[%s5297_s15 + $0xaf0] sm:$0xff] }
 0x27c   : > { %v2410_v16 = vld [vmem:[%s5297_s15 + $0x1528] sm:$0xff]  ;;  %3180 = vmatpush.msra.mxu1 %v2154_v13  ;;  %3200 = vmatpush.msra.mxu2 %v2282_v14  ;;  %v2211_v19 = vld [vmem:[%s5297_s15 + $0xef0] sm:$0xff] }
 0x27d   : > { %v2018_v21 = vld [vmem:[%s5297_s15 + $0x8e8] sm:$0xff]  ;;  %3220 = vmatpush.msra.mxu3 %v2410_v16  ;;  %v1819_v60 = vld [vmem:[%s5297_s15 + $0x2b0] sm:$0xff] }
 0x27e   : > { %v2146_v22 = vld [vmem:[%s5297_s15 + $0xce8] sm:$0xff]  ;;  %3161 = vmatpush.msra.mxu0 %v2018_v21  ;;  %v1947_v61 = vld [vmem:[%s5297_s15 + $0x6b0] sm:$0xff] }
 0x27f   : > { %v2274_v23 = vld [vmem:[%s5297_s15 + $0x10e8] sm:$0xff]  ;;  %3181 = vmatpush.msra.mxu1 %v2146_v22  ;;  %v2075_v62 = vld [vmem:[%s5297_s15 + $0xab0] sm:$0xff] }
 0x280   : > { %v2402_v24 = vld [vmem:[%s5297_s15 + $0x14e8] sm:$0xff]  ;;  %3201 = vmatpush.msra.mxu2 %v2274_v23  ;;  %v2203_v63 = vld [vmem:[%s5297_s15 + $0xeb0] sm:$0xff] }
 0x281   : > { %v2010_v27 = vld [vmem:[%s5297_s15 + $0x8a8] sm:$0xff]  ;;  %3221 = vmatpush.msra.mxu3 %v2402_v24  ;;  %v1811_v25 = vld [vmem:[%s5297_s15 + $0x270] sm:$0xff] }
 0x282   : > { %v2138_v6 = vld [vmem:[%s5297_s15 + $0xca8] sm:$0xff]  ;;  %3162 = vmatpush.msra.mxu0 %v2010_v27  ;;  %v1939_v26 = vld [vmem:[%s5297_s15 + $0x670] sm:$0xff] }
 0x283   : > { %v2266_v28 = vld [vmem:[%s5297_s15 + $0x10a8] sm:$0xff]  ;;  %3182 = vmatpush.msra.mxu1 %v2138_v6  ;;  %v2067_v5 = vld [vmem:[%s5297_s15 + $0xa70] sm:$0xff] }
 0x284   : > { %v2394_v29 = vld [vmem:[%s5297_s15 + $0x14a8] sm:$0xff]  ;;  %3202 = vmatpush.msra.mxu2 %v2266_v28  ;;  %v2195_v7 = vld [vmem:[%s5297_s15 + $0xe70] sm:$0xff] }
 0x285   : > { %v2002_v52 = vld [vmem:[%s5297_s15 + $0x868] sm:$0xff]  ;;  %3222 = vmatpush.msra.mxu3 %v2394_v29  ;;  %v1803_v8 = vld [vmem:[%s5297_s15 + $0x230] sm:$0xff] }
 0x286   : > { %v2130_v17 = vld [vmem:[%s5297_s15 + $0xc68] sm:$0xff]  ;;  %3163 = vmatpush.msra.mxu0 %v2002_v52  ;;  %v1931_v9 = vld [vmem:[%s5297_s15 + $0x630] sm:$0xff] }
 0x287   : > { %v2258_v30 = vld [vmem:[%s5297_s15 + $0x1068] sm:$0xff]  ;;  %3183 = vmatpush.msra.mxu1 %v2130_v17  ;;  %v2059_v10 = vld [vmem:[%s5297_s15 + $0xa30] sm:$0xff] }
 0x288   : > { %v2386_v31 = vld [vmem:[%s5297_s15 + $0x1468] sm:$0xff]  ;;  %3203 = vmatpush.msra.mxu2 %v2258_v30  ;;  %v2187_v11 = vld [vmem:[%s5297_s15 + $0xe30] sm:$0xff] }
 0x289   : > { %v1994_v33 = vld [vmem:[%s5297_s15 + $0x828] sm:$0xff]  ;;  %3223 = vmatpush.msra.mxu3 %v2386_v31  ;;  %v1795_v12 = vld [vmem:[%s5297_s15 + $0x1f0] sm:$0xff] }
 0x28a   : > { %v2122_v34 = vld [vmem:[%s5297_s15 + $0xc28] sm:$0xff]  ;;  %3164 = vmatpush.msra.mxu0 %v1994_v33  ;;  %v1923_v13 = vld [vmem:[%s5297_s15 + $0x5f0] sm:$0xff]  ;;  %v2526_v33 = vpop.f32.mrf.mxu0 }
 0x28b   : > { %v2250_v35 = vld [vmem:[%s5297_s15 + $0x1028] sm:$0xff]  ;;  %3184 = vmatpush.msra.mxu1 %v2122_v34  ;;  %3165 = vmatmul.f32.vlgmr.msra.gmra.mxu0 %v5780_v36  ;;  %v1843_v36 = vld [vmem:[%s5297_s15 + $0x370] sm:$0xff] }
 0x28c   : > { %v2378_v45 = vld [vmem:[%s5297_s15 + $0x1428] sm:$0xff]  ;;  %3204 = vmatpush.msra.mxu2 %v2250_v35  ;;  %3229 = vmatpush.msrb.mxu0 %v1859_v38  ;;  %v2051_v14 = vld [vmem:[%s5297_s15 + $0x9f0] sm:$0xff] }
 0x28d   : > { %3224 = vmatpush.msra.mxu3 %v2378_v45  ;;  %3205 = vmatmul.f32.vlgmr.msra.gmra.mxu2 %v5786_v37  ;;  %v1971_v37 = vld [vmem:[%s5297_s15 + $0x770] sm:$0xff] }
 0x28e   : > { %3249 = vmatpush.msrb.mxu1 %v1987_v39  ;;  %3269 = vmatpush.msrb.mxu2 %v2115_v40  ;;  %v2179_v16 = vld [vmem:[%s5297_s15 + $0xdf0] sm:$0xff]  ;;  %v6053_v39 = vpop.f32.mrf.mxu2 }
 0x28f   : > { %3289 = vmatpush.msrb.mxu3 %v2243_v41  ;;  %3185 = vmatmul.f32.vlgmr.msra.gmra.mxu1 %v5796_v42  ;;  %v2091_v42 = vld [vmem:[%s5297_s15 + $0xb30] sm:$0xff] }
 0x290   : > { %3225 = vmatmul.f32.vlgmr.msra.gmra.mxu3 %v5802_v43  ;;  %3230 = vmatpush.msrb.mxu0 %v1851_v44  ;;  %v2219_v43 = vld [vmem:[%s5297_s15 + $0xf30] sm:$0xff] }
 0x291   : > { %3250 = vmatpush.msrb.mxu1 %v1979_v48  ;;  %3270 = vmatpush.msrb.mxu2 %v2107_v49  ;;  %v1787_v21 = vld [vmem:[%s5297_s15 + $0x1b0] sm:$0xff]  ;;  %v2546_v49 = vpop.f32.mrf.mxu1 }
 0x292   : > { %3290 = vmatpush.msrb.mxu3 %v2235_v51  ;;  %3231 = vmatpush.msrb.mxu0 %v1843_v36  ;;  %v1915_v22 = vld [vmem:[%s5297_s15 + $0x5b0] sm:$0xff] }
 0x293   : > { %3251 = vmatpush.msrb.mxu1 %v1971_v37  ;;  %3271 = vmatpush.msrb.mxu2 %v2099_v53  ;;  %v2043_v23 = vld [vmem:[%s5297_s15 + $0x9b0] sm:$0xff] }
 0x294   : > { %3291 = vmatpush.msrb.mxu3 %v2227_v54  ;;  %3232 = vmatpush.msrb.mxu0 %v1835_v56  ;;  %v2171_v24 = vld [vmem:[%s5297_s15 + $0xdb0] sm:$0xff]  ;;  %v6063_v54 = vpop.f32.mrf.mxu3 }
 0x295   : > { %3252 = vmatpush.msrb.mxu1 %v1963_v55  ;;  %3272 = vmatpush.msrb.mxu2 %v2091_v42  ;;  %v1779_v27 = vld [vmem:[%s5297_s15 + $0x170] sm:$0xff] }
 0x296   : > { %3292 = vmatpush.msrb.mxu3 %v2219_v43  ;;  %3233 = vmatpush.msrb.mxu0 %v1827_v57  ;;  %v1907_v6 = vld [vmem:[%s5297_s15 + $0x570] sm:$0xff]  ;;  %v6069_v57 = vpop.f32.mrf.mxu0 }
 0x297   : > { %3253 = vmatpush.msrb.mxu1 %v1955_v58  ;;  %3273 = vmatpush.msrb.mxu2 %v2083_v18  ;;  %v2035_v28 = vld [vmem:[%s5297_s15 + $0x970] sm:$0xff] }
 0x298   : > { %3293 = vmatpush.msrb.mxu3 %v2211_v19  ;;  %3234 = vmatpush.msrb.mxu0 %v1819_v60  ;;  %v2163_v29 = vld [vmem:[%s5297_s15 + $0xd70] sm:$0xff]  ;;  %v2501_v19 = vperm.slane %v5155_v32, 0  ;;  %v2646_v60 = vpop.f32.mrf.mxu2 }
 0x299   : > { %3254 = vmatpush.msrb.mxu1 %v1947_v61  ;;  %3274 = vmatpush.msrb.mxu2 %v2075_v62  ;;  %v1771_v52 = vld [vmem:[%s5297_s15 + $0x130] sm:$0xff]  ;;  %v1860_v61 = vld [vmem:[%s5297_s15 + $0x3f8] sm:$0xff] }
 0x29a   : > { %3294 = vmatpush.msrb.mxu3 %v2203_v63  ;;  %3235 = vmatpush.msrb.mxu0 %v1811_v25  ;;  %v1899_v17 = vld [vmem:[%s5297_s15 + $0x530] sm:$0xff]  ;;  %v1988_v62 = vld [vmem:[%s5297_s15 + $0x7f8] sm:$0xff]  ;;  %v2502_v63 = vperm.slane %v5226_v47, 0  ;;  %v6080_v25 = vld [vmem:[%s6862_s0] sm:$0xff] }
 0x29b   : > { %3255 = vmatpush.msrb.mxu1 %v1939_v26  ;;  %3275 = vmatpush.msrb.mxu2 %v2067_v5  ;;  %v2027_v30 = vld [vmem:[%s5297_s15 + $0x930] sm:$0xff]  ;;  %v2527_v26 = vadd.f32 %v2526_v33, %v2501_v19  ;;  %v6089_v5 = vpop.f32.mrf.mxu1 }
 0x29c   : > { %3295 = vmatpush.msrb.mxu3 %v2195_v7  ;;  %3236 = vmatpush.msrb.mxu0 %v1803_v8  ;;  %v2155_v31 = vld [vmem:[%s5297_s15 + $0xd30] sm:$0xff]  ;;  %v2647_v8 = vadd.f32 %v2646_v60, %v2502_v63  ;;  %v1796_v60 = vld [vmem:[%s5297_s15 + $0x1f8] sm:$0xff] }
 0x29d   : > { %3256 = vmatpush.msrb.mxu1 %v1931_v9  ;;  %3276 = vmatpush.msrb.mxu2 %v2059_v10  ;;  %v1763_v34 = vld [vmem:[%s5297_s15 + $0xf0] sm:$0xff]  ;;  %v1852_v9 = vld [vmem:[%s5297_s15 + $0x3b8] sm:$0xff] }
 0x29e   : > { %3296 = vmatpush.msrb.mxu3 %v2187_v11  ;;  %3237 = vmatpush.msrb.mxu0 %v1795_v12  ;;  %v1891_v35 = vld [vmem:[%s5297_s15 + $0x4f0] sm:$0xff]  ;;  %v1980_v10 = vld [vmem:[%s5297_s15 + $0x7b8] sm:$0xff]  ;;  %v2666_v11 = vpop.f32.mrf.mxu3  ;;  %v6098_v12 = vld [vmem:[%s6862_s0 + $0x8] sm:$0xff] }
 0x29f   : > { %3257 = vmatpush.msrb.mxu1 %v1923_v13  ;;  %3277 = vmatpush.msrb.mxu2 %v2051_v14  ;;  %v2019_v45 = vld [vmem:[%s5297_s15 + $0x8f0] sm:$0xff]  ;;  %v6104_v13 = vld [vmem:[%s6862_s0 + $0x18] sm:$0xff] }
 0x2a0   : > { %3297 = vmatpush.msrb.mxu3 %v2179_v16  ;;  %3238 = vmatpush.msrb.mxu0 %v1787_v21  ;;  %v2147_v38 = vld [vmem:[%s5297_s15 + $0xcf0] sm:$0xff]  ;;  %v1844_v21 = vld [vmem:[%s5297_s15 + $0x378] sm:$0xff] }
 0x2a1   : > { %3258 = vmatpush.msrb.mxu1 %v1915_v22  ;;  %3278 = vmatpush.msrb.mxu2 %v2043_v23  ;;  %v1755_v40 = vld [vmem:[%s5297_s15 + $0xb0] sm:$0xff]  ;;  %v1972_v22 = vld [vmem:[%s5297_s15 + $0x778] sm:$0xff]  ;;  %v2547_v23 = vadd.f32 %v2546_v49, %v2527_v26 }
 0x2a2   : > { %3298 = vmatpush.msrb.mxu3 %v2171_v24  ;;  %3239 = vmatpush.msrb.mxu0 %v1779_v27  ;;  %v1883_v41 = vld [vmem:[%s5297_s15 + $0x4b0] sm:$0xff]  ;;  %v2686_v24 = vpop.f32.mrf.mxu0 }
 0x2a3   : > { %3259 = vmatpush.msrb.mxu1 %v1907_v6  ;;  %3279 = vmatpush.msrb.mxu2 %v2035_v28  ;;  %v2011_v44 = vld [vmem:[%s5297_s15 + $0x8b0] sm:$0xff]  ;;  %v2667_v28 = vadd.f32 %v2666_v11, %v2647_v8  ;;  %v1916_v8 = vld [vmem:[%s5297_s15 + $0x5b8] sm:$0xff]  ;;  %v4651_v11 = vmov 8.0  }
 0x2a4   : > { %3299 = vmatpush.msrb.mxu3 %v2163_v29  ;;  %3240 = vmatpush.msrb.mxu0 %v1771_v52  ;;  %v2139_v48 = vld [vmem:[%s5297_s15 + $0xcb0] sm:$0xff]  ;;  %v1836_v29 = vld [vmem:[%s5297_s15 + $0x338] sm:$0xff]  ;;  %4605 = vrcp.f32 %v4651_v11 }
 0x2a5   : > { %3260 = vmatpush.msrb.mxu1 %v1899_v17  ;;  %3280 = vmatpush.msrb.mxu2 %v2027_v30  ;;  %v1747_v51 = vld [vmem:[%s5297_s15 + $0x70] sm:$0xff]  ;;  %v1964_v52 = vld [vmem:[%s5297_s15 + $0x738] sm:$0xff]  ;;  %v2567_v17 = vadd.f32 %v6053_v39, %v2547_v23  ;;  %v2687_v33 = vadd.f32 %v2686_v24, %v2667_v28 }
 0x2a6   : > { %3300 = vmatpush.msrb.mxu3 %v2155_v31  ;;  %3241 = vmatpush.msrb.mxu0 %v1763_v34  ;;  %v1875_v36 = vld [vmem:[%s5297_s15 + $0x470] sm:$0xff]  ;;  %v1828_v34 = vld [vmem:[%s5297_s15 + $0x2f8] sm:$0xff] }
 0x2a7   : > { %3261 = vmatpush.msrb.mxu1 %v1891_v35  ;;  %3281 = vmatpush.msrb.mxu2 %v2019_v45  ;;  %v2003_v37 = vld [vmem:[%s5297_s15 + $0x870] sm:$0xff]  ;;  %v1956_v35 = vld [vmem:[%s5297_s15 + $0x6f8] sm:$0xff]  ;;  %v2706_v45 = vpop.f32.mrf.mxu1 }
 0x2a8   : > { %3301 = vmatpush.msrb.mxu3 %v2147_v38  ;;  %3242 = vmatpush.msrb.mxu0 %v1755_v40  ;;  %v2131_v53 = vld [vmem:[%s5297_s15 + $0xc70] sm:$0xff]  ;;  %v1820_v40 = vld [vmem:[%s5297_s15 + $0x2b8] sm:$0xff] }
 0x2a9   : > { %3262 = vmatpush.msrb.mxu1 %v1883_v41  ;;  %3282 = vmatpush.msrb.mxu2 %v2011_v44  ;;  %v1739_v56 = vld [vmem:[%s5297_s15 + $0x30] sm:$0xff]  ;;  %v1948_v41 = vld [vmem:[%s5297_s15 + $0x6b8] sm:$0xff]  ;;  %v2587_v44 = vadd.f32 %v6063_v54, %v2567_v17 }
 0x2aa   : > { %3302 = vmatpush.msrb.mxu3 %v2139_v48  ;;  %v1867_v55 = vld [vmem:[%s5297_s15 + $0x430] sm:$0xff]  ;;  %3243 = vmatpush.msrb.mxu0 %v1747_v51  ;;  %v2726_v48 = vpop.f32.mrf.mxu2  ;;  %v2236_v11 = vld [vmem:[%s5297_s15 + $0xfb8] sm:$0xff] }
 0x2ab   : > { %3263 = vmatpush.msrb.mxu1 %v1875_v36  ;;  %v1995_v42 = vld [vmem:[%s5297_s15 + $0x830] sm:$0xff]  ;;  %3283 = vmatpush.msrb.mxu2 %v2003_v37  ;;  %v2707_v36 = vadd.f32 %v2706_v45, %v2687_v33  ;;  %v1812_v37 = vld [vmem:[%s5297_s15 + $0x278] sm:$0xff]  ;;  %v6168_v45 = vpop.eup %4605 }
 0x2ac   : > { %v2123_v43 = vld [vmem:[%s5297_s15 + $0xc30] sm:$0xff]  ;;  %3303 = vmatpush.msrb.mxu3 %v2131_v53  ;;  %3244 = vmatpush.msrb.mxu0 %v1739_v56  ;;  %v1940_v53 = vld [vmem:[%s5297_s15 + $0x678] sm:$0xff]  ;;  %v2607_v56 = vadd.f32 %v6069_v57, %v2587_v44  ;;  %vm3532_vm0 = vweird.f32 %v6168_v45 }
 0x2ad   : > { %3264 = vmatpush.msrb.mxu1 %v1867_v55  ;;  %v2371_v58 = vld [vmem:[%s5297_s15 + $0x13f0] sm:$0xff]  ;;  %3284 = vmatpush.msrb.mxu2 %v1995_v42  ;;  %v2727_v42 = vadd.f32 %v2726_v48, %v2707_v36  ;;  %v1876_v36 = vld [vmem:[%s5297_s15 + $0x478] sm:$0xff] }
 0x2ae   : > { %v2499_v18 = vld [vmem:[%s5297_s15 + $0x17f0] sm:$0xff]  ;;  %3304 = vmatpush.msrb.mxu3 %v2123_v43  ;;  %3245 = vmatmul.f32.vlgmr.msrb.gmra.mxu0 %v6080_v25  ;;  %v1804_v43 = vld [vmem:[%s5297_s15 + $0x238] sm:$0xff] }
 0x2af   : > { %v6086_v32 = vld [vmem:[%s6862_s0 + $0x10] sm:$0xff]  ;;  %3309 = vmatpush.msra.mxu0 %v2371_v58  ;;  %3329 = vmatpush.msra.mxu1 %v2499_v18  ;;  %v1932_v58 = vld [vmem:[%s5297_s15 + $0x638] sm:$0xff]  ;;  %v2746_v18 = vpop.f32.mrf.mxu3  ;;  %v6157_v28 = vpop.f32.mrf.mxu1 }
 0x2b0   : > { %3285 = vmatmul.f32.vlgmr.msrb.gmra.mxu2 %v6086_v32  ;;  %v2363_v47 = vld [vmem:[%s5297_s15 + $0x13b0] sm:$0xff]  ;;  %3369 = vmatpush.msra.mxu3 %v1988_v62  ;;  %v2627_v62 = vadd.f32 %v6089_v5, %v2607_v56 }
 0x2b1   : > { %v2491_v7 = vld [vmem:[%s5297_s15 + $0x17b0] sm:$0xff]  ;;  %3349 = vmatpush.msra.mxu2 %v1860_v61  ;;  %3265 = vmatmul.f32.vlgmr.msrb.gmra.mxu1 %v6098_v12  ;;  %v1924_v61 = vld [vmem:[%s5297_s15 + $0x5f8] sm:$0xff] }
 0x2b2   : > { %3305 = vmatmul.f32.vlgmr.msrb.gmra.mxu3 %v6104_v13  ;;  %v2355_v14 = vld [vmem:[%s5297_s15 + $0x1370] sm:$0xff]  ;;  %3310 = vmatpush.msra.mxu0 %v2363_v47  ;;  %v2747_v47 = vadd.f32 %v2746_v18, %v2727_v42  ;;  %v1740_v42 = vld [vmem:[%s5297_s15 + $0x38] sm:$0xff] }
 0x2b3   : > { %v2483_v16 = vld [vmem:[%s5297_s15 + $0x1770] sm:$0xff]  ;;  %3330 = vmatpush.msra.mxu1 %v2491_v7  ;;  %3350 = vmatpush.msra.mxu2 %v1852_v9  ;;  %v1788_v7 = vld [vmem:[%s5297_s15 + $0x1b8] sm:$0xff]  ;;  %v6143_v9 = vpop.f32.mrf.mxu0 }
 0x2b4   : > { %3370 = vmatpush.msra.mxu3 %v1980_v10  ;;  %v2347_v27 = vld [vmem:[%s5297_s15 + $0x1330] sm:$0xff]  ;;  %3311 = vmatpush.msra.mxu0 %v2355_v14  ;;  %v1780_v14 = vld [vmem:[%s5297_s15 + $0x178] sm:$0xff]  ;;  %v6153_v24 = vmax.f32 %v2747_v47, 0.0 }
 0x2b5   : > { %v2475_v6 = vld [vmem:[%s5297_s15 + $0x1730] sm:$0xff]  ;;  %3331 = vmatpush.msra.mxu1 %v2483_v16  ;;  %3351 = vmatpush.msra.mxu2 %v1844_v21  ;;  %v1908_v16 = vld [vmem:[%s5297_s15 + $0x578] sm:$0xff]  ;;  %v6149_v21 = vmax.f32 %v2627_v62, 0.0 }
 0x2b6   : > { %3371 = vmatpush.msra.mxu3 %v1972_v22  ;;  %v2339_v30 = vld [vmem:[%s5297_s15 + $0x12f0] sm:$0xff]  ;;  %3312 = vmatpush.msra.mxu0 %v2347_v27  ;;  %v1772_v27 = vld [vmem:[%s5297_s15 + $0x138] sm:$0xff] }
 0x2b7   : > { %v2467_v31 = vld [vmem:[%s5297_s15 + $0x16f0] sm:$0xff]  ;;  %3332 = vmatpush.msra.mxu1 %v2475_v6  ;;  %3352 = vmatpush.msra.mxu2 %v1836_v29  ;;  %v1900_v6 = vld [vmem:[%s5297_s15 + $0x538] sm:$0xff]  ;;  %v6159_v29 = vpop.f32.mrf.mxu2  ;;  %v3477_v33 = vrot.slane %v6149_v21, 4  ;;  %v6189_v18 = vpop.f32.mrf.mxu1 }
 0x2b8   : > { %3372 = vmatpush.msra.mxu3 %v1964_v52  ;;  %v2331_v38 = vld [vmem:[%s5297_s15 + $0x12b0] sm:$0xff]  ;;  %3313 = vmatpush.msra.mxu0 %v2339_v30  ;;  %v1764_v30 = vld [vmem:[%s5297_s15 + $0xf8] sm:$0xff] }
 0x2b9   : > { %v2459_v39 = vld [vmem:[%s5297_s15 + $0x16b0] sm:$0xff]  ;;  %3333 = vmatpush.msra.mxu1 %v2467_v31  ;;  %3353 = vmatpush.msra.mxu2 %v1828_v34  ;;  %v1892_v31 = vld [vmem:[%s5297_s15 + $0x4f8] sm:$0xff] }
 0x2ba   : > { %3373 = vmatpush.msra.mxu3 %v1956_v35  ;;  %v2323_v49 = vld [vmem:[%s5297_s15 + $0x1270] sm:$0xff]  ;;  %3314 = vmatpush.msra.mxu0 %v2331_v38  ;;  %v3483_v38 = vrot.slane %v6153_v24, 4  ;;  %v2500_v47 = vld [vmem:[%s5297_s15 + $0x17f8] sm:$0xff] }
 0x2bb   : > { %v2451_v51 = vld [vmem:[%s5297_s15 + $0x1670] sm:$0xff]  ;;  %3334 = vmatpush.msra.mxu1 %v2459_v39  ;;  %3354 = vmatpush.msra.mxu2 %v1820_v40  ;;  %v1756_v39 = vld [vmem:[%s5297_s15 + $0xb8] sm:$0xff]  ;;  %v6175_v44 = vpop.f32.mrf.mxu0 }
 0x2bc   : > { %3374 = vmatpush.msra.mxu3 %v1948_v41  ;;  %v2315_v54 = vld [vmem:[%s5297_s15 + $0x1230] sm:$0xff]  ;;  %3315 = vmatpush.msra.mxu0 %v2323_v49  ;;  %v1884_v40 = vld [vmem:[%s5297_s15 + $0x4b8] sm:$0xff]  ;;  %v6173_v41 = vpop.f32.mrf.mxu3 }
 0x2bd   : > { %v2443_v55 = vld [vmem:[%s5297_s15 + $0x1630] sm:$0xff]  ;;  %3335 = vmatpush.msra.mxu1 %v2451_v51  ;;  %3355 = vmatpush.msra.mxu2 %v1812_v37  ;;  %v1748_v51 = vld [vmem:[%s5297_s15 + $0x78] sm:$0xff]  ;;  %v3478_v37 = vadd.f32 %v3477_v33, %v6149_v21 }
 0x2be   : > { %3375 = vmatpush.msra.mxu3 %v1940_v53  ;;  %v2307_v19 = vld [vmem:[%s5297_s15 + $0x11f0] sm:$0xff]  ;;  %3316 = vmatpush.msra.mxu0 %v2315_v54  ;;  %v3528_v53 = vmul.f32 8.0, %v6168_v45 }
 0x2bf   : > { %v2435_v57 = vld [vmem:[%s5297_s15 + $0x15f0] sm:$0xff]  ;;  %3336 = vmatpush.msra.mxu1 %v2443_v55  ;;  %3356 = vmatpush.msra.mxu2 %v1804_v43  ;;  %v3484_v55 = vadd.f32 %v3483_v38, %v6153_v24  ;;  %v1868_v43 = vld [vmem:[%s5297_s15 + $0x438] sm:$0xff]  ;;  %v3479_v62 = vrot.slane %v3478_v37, 2 }
 0x2c0   : > { %3376 = vmatpush.msra.mxu3 %v1932_v58  ;;  %v2299_v63 = vld [vmem:[%s5297_s15 + $0x11b0] sm:$0xff]  ;;  %3317 = vmatpush.msra.mxu0 %v2307_v19  ;;  %v2503_v58 = vperm.slane %v5303_v0, 0  ;;  %v2886_v19 = vpop.f32.mrf.mxu2  ;;  %v2372_v0 = vld [vmem:[%s5297_s15 + $0x13f8] sm:$0xff] }
 0x2c1   : > { %v2427_v26 = vld [vmem:[%s5297_s15 + $0x15b0] sm:$0xff]  ;;  %3337 = vmatpush.msra.mxu1 %v2435_v57  ;;  %3357 = vmatpush.msra.mxu2 %v1796_v60  ;;  %v2504_v57 = vperm.slane %v5386_v20, 0  ;;  %v2116_v60 = vld [vmem:[%s5297_s15 + $0xbf8] sm:$0xff]  ;;  %v6200_v20 = vld [vmem:[%s6862_s0 + $0x20] sm:$0xff] }
 0x2c2   : > { %3377 = vmatpush.msra.mxu3 %v1924_v61  ;;  %v2291_v10 = vld [vmem:[%s5297_s15 + $0x1170] sm:$0xff]  ;;  %3318 = vmatpush.msra.mxu0 %v2299_v63  ;;  %v2244_v61 = vld [vmem:[%s5297_s15 + $0xff8] sm:$0xff]  ;;  %v3529_v63 = vsub.f32 1.0, %v3528_v53 }
 0x2c3   : > { %v2419_v5 = vld [vmem:[%s5297_s15 + $0x1570] sm:$0xff]  ;;  %3338 = vmatpush.msra.mxu1 %v2427_v26  ;;  %3358 = vmatpush.msra.mxu2 %v1788_v7  ;;  %v2767_v26 = vadd.f32 %v6143_v9, %v2503_v58  ;;  %v3485_v7 = vrot.slane %v3484_v55, 2  ;;  %v2926_v9 = vpop.f32.mrf.mxu0  ;;  %v2220_v38 = vld [vmem:[%s5297_s15 + $0xf38] sm:$0xff]  ;;  %v2505_v58 = vperm.slane %v5475_v46, 0 }
 0x2c4   : > { %3378 = vmatpush.msra.mxu3 %v1916_v8  ;;  %v2283_v22 = vld [vmem:[%s5297_s15 + $0x1130] sm:$0xff]  ;;  %3319 = vmatpush.msra.mxu0 %v2291_v10  ;;  %v2887_v8 = vadd.f32 %v2886_v19, %v2504_v57  ;;  %v2906_v10 = vpop.f32.mrf.mxu3  ;;  %v2340_v53 = vld [vmem:[%s5297_s15 + $0x12f8] sm:$0xff] }
 0x2c5   : > { %v2411_v23 = vld [vmem:[%s5297_s15 + $0x1530] sm:$0xff]  ;;  %3339 = vmatpush.msra.mxu1 %v2419_v5  ;;  %3359 = vmatpush.msra.mxu2 %v1780_v14  ;;  %v2108_v5 = vld [vmem:[%s5297_s15 + $0xbb8] sm:$0xff] }
 0x2c6   : > { %3379 = vmatpush.msra.mxu3 %v1908_v16  ;;  %v2275_v52 = vld [vmem:[%s5297_s15 + $0x10f0] sm:$0xff]  ;;  %3320 = vmatpush.msra.mxu0 %v2283_v22  ;;  %v2364_v14 = vld [vmem:[%s5297_s15 + $0x13b8] sm:$0xff]  ;;  %v3480_v22 = vadd.f32 %v3479_v62, %v3478_v37 }
 0x2c7   : > { %v2403_v17 = vld [vmem:[%s5297_s15 + $0x14f0] sm:$0xff]  ;;  %3340 = vmatpush.msra.mxu1 %v2411_v23  ;;  %3360 = vmatpush.msra.mxu2 %v1772_v27  ;;  %v2492_v16 = vld [vmem:[%s5297_s15 + $0x17b8] sm:$0xff]  ;;  %v3530_v23 = vmul.f32 %v6168_v45, %v3529_v63  ;;  %v2787_v27 = vadd.f32 %v6157_v28, %v2767_v26 }
 0x2c8   : > { %3380 = vmatpush.msra.mxu3 %v1900_v6  ;;  %v2267_v34 = vld [vmem:[%s5297_s15 + $0x10b0] sm:$0xff]  ;;  %3321 = vmatpush.msra.mxu0 %v2275_v52  ;;  %v2100_v6 = vld [vmem:[%s5297_s15 + $0xb78] sm:$0xff] }
 0x2c9   : > { %v2395_v35 = vld [vmem:[%s5297_s15 + $0x14b0] sm:$0xff]  ;;  %3341 = vmatpush.msra.mxu1 %v2403_v17  ;;  %3361 = vmatpush.msra.mxu2 %v1764_v30  ;;  %v2228_v52 = vld [vmem:[%s5297_s15 + $0xf78] sm:$0xff]  ;;  %v3486_v17 = vadd.f32 %v3485_v7, %v3484_v55  ;;  %v2907_v30 = vadd.f32 %v2906_v10, %v2887_v8  ;;  %v2807_v33 = vadd.f32 %v6159_v29, %v2787_v27 }
 0x2ca   : > { %3381 = vmatpush.msra.mxu3 %v1892_v31  ;;  %v2259_v48 = vld [vmem:[%s5297_s15 + $0x1070] sm:$0xff]  ;;  %3322 = vmatpush.msra.mxu0 %v2267_v34  ;;  %v2356_v28 = vld [vmem:[%s5297_s15 + $0x1378] sm:$0xff]  ;;  %v2946_v34 = vpop.f32.mrf.mxu1 }
 0x2cb   : > { %v2387_v49 = vld [vmem:[%s5297_s15 + $0x1470] sm:$0xff]  ;;  %3342 = vmatpush.msra.mxu1 %v2395_v35  ;;  %3362 = vmatpush.msra.mxu2 %v1756_v39  ;;  %v2484_v31 = vld [vmem:[%s5297_s15 + $0x1778] sm:$0xff]  ;;  %v3487_v37 = vrot.slane %v3486_v17, 1  ;;  %v3006_v55 = vpop.f32.mrf.mxu0 }
 0x2cc   : > { %3382 = vmatpush.msra.mxu3 %v1884_v40  ;;  %v2251_v56 = vld [vmem:[%s5297_s15 + $0x1030] sm:$0xff]  ;;  %3323 = vmatpush.msra.mxu0 %v2259_v48  ;;  %v2092_v35 = vld [vmem:[%s5297_s15 + $0xb38] sm:$0xff]  ;;  %v3481_v48 = vrot.slane %v3480_v22, 1  ;;  %v2986_v63 = vpop.f32.mrf.mxu3  ;;  %v3007_v7 = vadd.f32 %v3006_v55, %v2505_v58 }
 0x2cd   : > { %v2379_v54 = vld [vmem:[%s5297_s15 + $0x1430] sm:$0xff]  ;;  %3343 = vmatpush.msra.mxu1 %v2387_v49  ;;  %3363 = vmatpush.msra.mxu2 %v1748_v51  ;;  %v2348_v39 = vld [vmem:[%s5297_s15 + $0x1338] sm:$0xff]  ;;  %v3531_v49 = vadd.f32 %v6168_v45, %v3530_v23  ;;  %v2966_v51 = vpop.f32.mrf.mxu2 }
 0x2ce   : > { %3383 = vmatpush.msra.mxu3 %v1876_v36  ;;  %3324 = vmatpush.msra.mxu0 %v2251_v56  ;;  %v2476_v40 = vld [vmem:[%s5297_s15 + $0x1738] sm:$0xff] }
 0x2cf   : > { %3344 = vmatpush.msra.mxu1 %v2379_v54  ;;  %3364 = vmatpush.msra.mxu2 %v1740_v42  ;;  %v2084_v29 = vld [vmem:[%s5297_s15 + $0xaf8] sm:$0xff]  ;;  %v2827_v54 = vadd.f32 %v6173_v41, %v2807_v33  ;;  %v6241_v41 = vsel %vm3532_vm0, %v6168_v45, %v3531_v49 }
 0x2d0   : > { %3384 = vmatpush.msra.mxu3 %v1868_v43  ;;  %3325 = vmatmul.f32.vlgmr.msra.gmra.mxu0 %v6200_v20  ;;  %v2212_v36 = vld [vmem:[%s5297_s15 + $0xef8] sm:$0xff] }
 0x2d1   : > { %3365 = vmatmul.f32.vlgmr.msra.gmra.mxu2 %v6080_v25  ;;  %3389 = vmatpush.msrb.mxu0 %v2116_v60  ;;  %v6213_v25 = vld [vmem:[%s6862_s0 + $0x28] sm:$0xff]  ;;  %v2468_v56 = vld [vmem:[%s5297_s15 + $0x16f8] sm:$0xff]  ;;  %v2847_v62 = vadd.f32 %v6175_v44, %v2827_v54 }
 0x2d2   : > { %3409 = vmatpush.msrb.mxu1 %v2244_v61  ;;  %3429 = vmatpush.msrb.mxu2 %v2372_v0  ;;  %v2076_v42 = vld [vmem:[%s5297_s15 + $0xab8] sm:$0xff]  ;;  %v3482_v61 = vadd.f32 %v3481_v48, %v3480_v22  ;;  %v3488_v0 = vadd.f32 %v3487_v37, %v3486_v17  ;;  %v3026_v10 = vpop.f32.mrf.mxu1 }
 0x2d3   : > { %3449 = vmatpush.msrb.mxu3 %v2500_v47  ;;  %3345 = vmatmul.f32.vlgmr.msra.gmra.mxu1 %v6213_v25  ;;  %v2204_v43 = vld [vmem:[%s5297_s15 + $0xeb8] sm:$0xff]  ;;  %v3027_v17 = vadd.f32 %v3026_v10, %v3007_v7 }
 0x2d4   : > { %3385 = vmatmul.f32.vlgmr.msra.gmra.mxu3 %v6098_v12  ;;  %3390 = vmatpush.msrb.mxu0 %v2108_v5  ;;  %v2927_v12 = vadd.f32 %v2926_v9, %v2907_v30  ;;  %v2332_v57 = vld [vmem:[%s5297_s15 + $0x12b8] sm:$0xff] }
 0x2d5   : > { %3410 = vmatpush.msrb.mxu1 %v2236_v11  ;;  %3430 = vmatpush.msrb.mxu2 %v2364_v14  ;;  %v2460_v60 = vld [vmem:[%s5297_s15 + $0x16b8] sm:$0xff]  ;;  %v3534_v14 = vmul.f32 %v6241_v41, %v3482_v61  ;;  %v3046_v22 = vpop.f32.mrf.mxu2 }
 0x2d6   : > { %3450 = vmatpush.msrb.mxu3 %v2492_v16  ;;  %3391 = vmatpush.msrb.mxu0 %v2100_v6  ;;  %v2947_v19 = vadd.f32 %v2946_v34, %v2927_v12  ;;  %v2068_v46 = vld [vmem:[%s5297_s15 + $0xa78] sm:$0xff]  ;;  %v2867_v16 = vadd.f32 %v6189_v18, %v2847_v62  ;;  %v3535_v6 = vmul.f32 %v6241_v41, %v3488_v0 }
 0x2d7   : > { %3411 = vmatpush.msrb.mxu1 %v2228_v52  ;;  %3431 = vmatpush.msrb.mxu2 %v2356_v28  ;;  %v2196_v26 = vld [vmem:[%s5297_s15 + $0xe78] sm:$0xff]  ;;  %v3047_v33 = vadd.f32 %v3046_v22, %v3027_v17 }
 0x2d8   : > { %3451 = vmatpush.msrb.mxu3 %v2484_v31  ;;  %3392 = vmatpush.msrb.mxu0 %v2092_v35  ;;  %v2967_v47 = vadd.f32 %v2966_v51, %v2947_v19  ;;  %v2324_v8 = vld [vmem:[%s5297_s15 + $0x1278] sm:$0xff]  ;;  %v6266_v12 = vmax.f32 %v2867_v16, 0.0  ;;  %v6271_v49 = vsub.f32 %v6153_v24, %v3535_v6 }
 0x2d9   : > { %3412 = vmatpush.msrb.mxu1 %v2220_v38  ;;  %3432 = vmatpush.msrb.mxu2 %v2348_v39  ;;  %v2452_v45 = vld [vmem:[%s5297_s15 + $0x1678] sm:$0xff]  ;;  %v6264_v38 = vsub.f32 %v6149_v21, %v3534_v14  ;;  %v3066_v39 = vpop.f32.mrf.mxu3 }
 0x2da   : > { %3452 = vmatpush.msrb.mxu3 %v2476_v40  ;;  %3393 = vmatpush.msrb.mxu0 %v2084_v29  ;;  %v2060_v44 = vld [vmem:[%s5297_s15 + $0xa38] sm:$0xff]  ;;  %v2987_v52 = vadd.f32 %v2986_v63, %v2967_v47  ;;  %v3489_v55 = vrot.slane %v6266_v12, 4  ;;  %v3551_v19 = vmul.f32 %v6271_v49, %v6271_v49 }
 0x2db   : > { %3413 = vmatpush.msrb.mxu1 %v2212_v36  ;;  %3433 = vmatpush.msrb.mxu2 %v2340_v53  ;;  %v2188_v9 = vld [vmem:[%s5297_s15 + $0xe38] sm:$0xff]  ;;  %v3067_v53 = vadd.f32 %v3066_v39, %v3047_v33  ;;  %v3550_v54 = vmul.f32 %v6264_v38, %v6264_v38 }
 0x2dc   : > { %3453 = vmatpush.msrb.mxu3 %v2468_v56  ;;  %3394 = vmatpush.msrb.mxu0 %v2076_v42  ;;  %v2316_v5 = vld [vmem:[%s5297_s15 + $0x1238] sm:$0xff]  ;;  %v6273_v51 = vmax.f32 %v2987_v52, 0.0 }
 0x2dd   : > { %3414 = vmatpush.msrb.mxu1 %v2204_v43  ;;  %3434 = vmatpush.msrb.mxu2 %v2332_v57  ;;  %v2444_v11 = vld [vmem:[%s5297_s15 + $0x1638] sm:$0xff]  ;;  %v3558_v7 = vrot.slane %v3550_v54, 4 }
 0x2de   : > { %3454 = vmatpush.msrb.mxu3 %v2460_v60  ;;  %3395 = vmatpush.msrb.mxu0 %v2068_v46  ;;  %v2052_v23 = vld [vmem:[%s5297_s15 + $0x9f8] sm:$0xff]  ;;  %v3495_v57 = vrot.slane %v6273_v51, 4 }
 0x2df   : > { %3415 = vmatpush.msrb.mxu1 %v2196_v26  ;;  %3435 = vmatpush.msrb.mxu2 %v2324_v8  ;;  %v2180_v27 = vld [vmem:[%s5297_s15 + $0xdf8] sm:$0xff]  ;;  %v3490_v8 = vadd.f32 %v3489_v55, %v6266_v12  ;;  %v3559_v52 = vadd.f32 %v3558_v7, %v3550_v54  ;;  %v3909_v54 = vld [vmem:[%s6307_s28 + $0xe8] sm:$0xff] }
 0x2e0   : > { %3455 = vmatpush.msrb.mxu3 %v2452_v45  ;;  %3396 = vmatpush.msrb.mxu0 %v2060_v44  ;;  %v2308_v30 = vld [vmem:[%s5297_s15 + $0x11f8] sm:$0xff]  ;;  %v3086_v58 = vpop.f32.mrf.mxu0  ;;  %v3925_v55 = vld [vmem:[%s6307_s28 + $0x168] sm:$0xff] }
 0x2e1   : > { %3416 = vmatpush.msrb.mxu1 %v2188_v9  ;;  %v2436_v28 = vld [vmem:[%s5297_s15 + $0x15f8] sm:$0xff]  ;;  %3436 = vmatpush.msrb.mxu2 %v2316_v5  ;;  %v3087_v62 = vadd.f32 %v3086_v58, %v3067_v53  ;;  %v3564_v9 = vrot.slane %v3551_v19, 4  ;;  %v3496_v5 = vadd.f32 %v3495_v57, %v6273_v51  ;;  %v3491_v17 = vrot.slane %v3490_v8, 2 }
 0x2e2   : > { %3456 = vmatpush.msrb.mxu3 %v2444_v11  ;;  %v2044_v18 = vld [vmem:[%s5297_s15 + $0x9b8] sm:$0xff]  ;;  %3397 = vmatpush.msrb.mxu0 %v2052_v23 }
 0x2e3   : > { %v2172_v31 = vld [vmem:[%s5297_s15 + $0xdb8] sm:$0xff]  ;;  %3417 = vmatpush.msrb.mxu1 %v2180_v27  ;;  %3437 = vmatpush.msrb.mxu2 %v2308_v30  ;;  %v3106_v47 = vpop.f32.mrf.mxu1 }
 0x2e4   : > { %v2300_v34 = vld [vmem:[%s5297_s15 + $0x11b8] sm:$0xff]  ;;  %3457 = vmatpush.msrb.mxu3 %v2436_v28  ;;  %3398 = vmatpush.msrb.mxu0 %v2044_v18  ;;  %v3107_v44 = vadd.f32 %v3106_v47, %v3087_v62  ;;  %v3565_v28 = vadd.f32 %v3564_v9, %v3551_v19  ;;  %v3497_v18 = vrot.slane %v3496_v5, 2  ;;  %v3892_v19 = vld [vmem:[%s6307_s28 + $0x60] sm:$0xff]  ;;  %v3922_v9 = vld [vmem:[%s6307_s28 + $0x150] sm:$0xff] }
 0x2e5   : > { %v2428_v35 = vld [vmem:[%s5297_s15 + $0x15b8] sm:$0xff]  ;;  %3418 = vmatpush.msrb.mxu1 %v2172_v31  ;;  %3438 = vmatpush.msrb.mxu2 %v2300_v34 }
 0x2e6   : > { %v2036_v40 = vld [vmem:[%s5297_s15 + $0x978] sm:$0xff]  ;;  %3458 = vmatpush.msrb.mxu3 %v2428_v35  ;;  %v6309_v23 = vmax.f32 %v3107_v44, 0.0  ;;  %v3498_v53 = vadd.f32 %v3497_v18, %v3496_v5  ;;  %v3938_v5 = vld [vmem:[%s6307_s28 + $0x1d0] sm:$0xff] }
 0x2e7   : > { %v2164_v48 = vld [vmem:[%s5297_s15 + $0xd78] sm:$0xff]  ;;  %3399 = vmatpush.msrb.mxu0 %v2036_v40  ;;  %v3560_v40 = vrot.slane %v3559_v52, 2 }
 0x2e8   : > { %v2292_v21 = vld [vmem:[%s5297_s15 + $0x1178] sm:$0xff]  ;;  %3419 = vmatpush.msrb.mxu1 %v2164_v48  ;;  %v3501_v30 = vrot.slane %v6309_v23, 4  ;;  %v3492_v48 = vadd.f32 %v3491_v17, %v3490_v8  ;;  %v3499_v57 = vrot.slane %v3498_v53, 1  ;;  %v3890_v8 = vld [vmem:[%s6307_s28 + $0x50] sm:$0xff]  ;;  %v3888_v17 = vld [vmem:[%s6307_s28 + $0x40] sm:$0xff] }
 0x2e9   : > { %v2420_v29 = vld [vmem:[%s5297_s15 + $0x1578] sm:$0xff]  ;;  %3439 = vmatpush.msrb.mxu2 %v2292_v21  ;;  %v3894_v21 = vld [vmem:[%s6307_s28 + $0x70] sm:$0xff] }
 0x2ea   : > { %v2028_v36 = vld [vmem:[%s5297_s15 + $0x938] sm:$0xff]  ;;  %3459 = vmatpush.msrb.mxu3 %v2420_v29  ;;  %v3502_v39 = vadd.f32 %v3501_v30, %v6309_v23  ;;  %v3910_v29 = vld [vmem:[%s6307_s28 + $0xf0] sm:$0xff]  ;;  %v3493_v58 = vrot.slane %v3492_v48, 1  ;;  %v3500_v44 = vadd.f32 %v3499_v57, %v3498_v53  ;;  %v3904_v30 = vld [vmem:[%s6307_s28 + $0xc0] sm:$0xff] }
 0x2eb   : > { %v2156_v37 = vld [vmem:[%s5297_s15 + $0xd38] sm:$0xff]  ;;  %3400 = vmatpush.msrb.mxu0 %v2028_v36  ;;  %v3886_v53 = vld [vmem:[%s6307_s28 + $0x30] sm:$0xff] }
 0x2ec   : > { %v2284_v56 = vld [vmem:[%s5297_s15 + $0x1138] sm:$0xff]  ;;  %3420 = vmatpush.msrb.mxu1 %v2156_v37  ;;  %v3503_v36 = vrot.slane %v3502_v39, 2  ;;  %v3566_v37 = vrot.slane %v3565_v28, 2  ;;  %v3494_v7 = vadd.f32 %v3493_v58, %v3492_v48  ;;  %v3537_v18 = vmul.f32 %v6241_v41, %v3500_v44  ;;  %v3933_v58 = vld [vmem:[%s6307_s28 + $0x1a8] sm:$0xff]  ;;  %v3882_v44 = vld [vmem:[%s6307_s28 + $0x10] sm:$0xff] }
 0x2ed   : > { %v2412_v24 = vld [vmem:[%s5297_s15 + $0x1538] sm:$0xff]  ;;  %3440 = vmatpush.msrb.mxu2 %v2284_v56  ;;  %v3926_v56 = vld [vmem:[%s6307_s28 + $0x170] sm:$0xff]  ;;  %v2506_v48 = vperm.slane %v5551_v15, 0 }
 0x2ee   : > { %v2020_v42 = vld [vmem:[%s5297_s15 + $0x8f8] sm:$0xff]  ;;  %3460 = vmatpush.msrb.mxu3 %v2412_v24  ;;  %v3893_v24 = vld [vmem:[%s6307_s28 + $0x68] sm:$0xff] }
 0x2ef   : > { %v2148_v43 = vld [vmem:[%s5297_s15 + $0xcf8] sm:$0xff]  ;;  %3401 = vmatpush.msrb.mxu0 %v2020_v42  ;;  %v3941_v42 = vld [vmem:[%s6307_s28 + $0x1e8] sm:$0xff] }
 0x2f0   : > { %v2276_v60 = vld [vmem:[%s5297_s15 + $0x10f8] sm:$0xff]  ;;  %3421 = vmatpush.msrb.mxu1 %v2148_v43  ;;  %v3561_v43 = vadd.f32 %v3560_v40, %v3559_v52  ;;  %v3536_v52 = vmul.f32 %v6241_v41, %v3494_v7 }
 0x2f1   : > { %v2404_v61 = vld [vmem:[%s5297_s15 + $0x14f8] sm:$0xff]  ;;  %3441 = vmatpush.msrb.mxu2 %v2276_v60  ;;  %v3924_v60 = vld [vmem:[%s6307_s28 + $0x160] sm:$0xff] }
 0x2f2   : > { %v2012_v63 = vld [vmem:[%s5297_s15 + $0x8b8] sm:$0xff]  ;;  %3461 = vmatpush.msrb.mxu3 %v2404_v61  ;;  %v3940_v61 = vld [vmem:[%s6307_s28 + $0x1e0] sm:$0xff]  ;;  %v3562_v47 = vrot.slane %v3561_v43, 1 }
 0x2f3   : > { %v2140_v46 = vld [vmem:[%s5297_s15 + $0xcb8] sm:$0xff]  ;;  %3402 = vmatpush.msrb.mxu0 %v2012_v63 }
 0x2f4   : > { %v2268_v26 = vld [vmem:[%s5297_s15 + $0x10b8] sm:$0xff]  ;;  %3422 = vmatpush.msrb.mxu1 %v2140_v46 }
 0x2f5   : > { %v2396_v0 = vld [vmem:[%s5297_s15 + $0x14b8] sm:$0xff]  ;;  %3442 = vmatpush.msrb.mxu2 %v2268_v26 }
 0x2f6   : > { %v2004_v45 = vld [vmem:[%s5297_s15 + $0x878] sm:$0xff]  ;;  %3462 = vmatpush.msrb.mxu3 %v2396_v0 }
 0x2f7   : > { %v2132_v10 = vld [vmem:[%s5297_s15 + $0xc78] sm:$0xff]  ;;  %3403 = vmatpush.msrb.mxu0 %v2004_v45  ;;  %v3906_v45 = vld [vmem:[%s6307_s28 + $0xd0] sm:$0xff] }
 0x2f8   : > { %v2260_v11 = vld [vmem:[%s5297_s15 + $0x1078] sm:$0xff]  ;;  %3423 = vmatpush.msrb.mxu1 %v2132_v10 }
 0x2f9   : > { %v2388_v14 = vld [vmem:[%s5297_s15 + $0x1478] sm:$0xff]  ;;  %3443 = vmatpush.msrb.mxu2 %v2260_v11 }
 0x2fa   : > { %v1996_v16 = vld [vmem:[%s5297_s15 + $0x838] sm:$0xff]  ;;  %3463 = vmatpush.msrb.mxu3 %v2388_v14  ;;  %v3889_v14 = vld [vmem:[%s6307_s28 + $0x48] sm:$0xff] }
 0x2fb   : > { %v2124_v22 = vld [vmem:[%s5297_s15 + $0xc38] sm:$0xff]  ;;  %3404 = vmatpush.msrb.mxu0 %v1996_v16  ;;  %v3905_v16 = vld [vmem:[%s6307_s28 + $0xc8] sm:$0xff] }
 0x2fc   : > { %v2252_v27 = vld [vmem:[%s5297_s15 + $0x1038] sm:$0xff]  ;;  %3424 = vmatpush.msrb.mxu1 %v2124_v22  ;;  %3405 = vmatmul.f32.vlgmr.msrb.gmra.mxu0 %v6086_v32  ;;  %v3942_v32 = vld [vmem:[%s6307_s28 + $0x1f0] sm:$0xff]  ;;  %v3921_v22 = vld [vmem:[%s6307_s28 + $0x148] sm:$0xff] }
 0x2fd   : > { %v2380_v6 = vld [vmem:[%s5297_s15 + $0x1438] sm:$0xff]  ;;  %3444 = vmatpush.msrb.mxu2 %v2252_v27  ;;  %3425 = vmatmul.f32.vlgmr.msrb.gmra.mxu1 %v6104_v13  ;;  %v3908_v13 = vld [vmem:[%s6307_s28 + $0xe0] sm:$0xff]  ;;  %v3937_v27 = vld [vmem:[%s6307_s28 + $0x1c8] sm:$0xff]  ;;  %s4594_s15 = smul.u32 936, %s6887_s18 }
 0x2fe   : > { %v3895_v31 = vld [vmem:[%s6307_s28 + $0x78] sm:$0xff]  ;;  %3464 = vmatpush.msrb.mxu3 %v2380_v6  ;;  %3445 = vmatmul.f32.vlgmr.msrb.gmra.mxu2 %v6200_v20  ;;  %v3504_v20 = vadd.f32 %v3503_v36, %v3502_v39  ;;  %v3563_v6 = vadd.f32 %v3562_v47, %v3561_v43  ;;  %v3901_v43 = vld [vmem:[%s6307_s28 + $0xa8] sm:$0xff] }
 0x2ff   : > { %v3911_v33 = vld [vmem:[%s6307_s28 + $0xf8] sm:$0xff]  ;;  %3976 = vmatpush.msra.mxu0 %v3895_v31  ;;  %3465 = vmatmul.f32.vlgmr.msrb.gmra.mxu3 %v6213_v25  ;;  %v3567_v25 = vadd.f32 %v3566_v37, %v3565_v28  ;;  %v3920_v31 = vld [vmem:[%s6307_s28 + $0x140] sm:$0xff]  ;;  %v6361_v37 = vsub.f32 %v6266_v12, %v3536_v52  ;;  %v3934_v12 = vld [vmem:[%s6307_s28 + $0x1b0] sm:$0xff]  ;;  %s6412_s12 = scalar_lea.vmem %s6871_s9, %s4594_s15 }
 0x300   : > { %v3927_v34 = vld [vmem:[%s6307_s28 + $0x178] sm:$0xff]  ;;  %3996 = vmatpush.msra.mxu1 %v3911_v33  ;;  %v3505_v62 = vrot.slane %v3504_v20, 1  ;;  %v3936_v33 = vld [vmem:[%s6307_s28 + $0x1c0] sm:$0xff]  ;;  %v3607_v36 = vmul.f32 %v3563_v6, %v6241_v41  ;;  %v3897_v6 = vld [vmem:[%s6307_s28 + $0x88] sm:$0xff] }
 0x301   : > { %v3943_v35 = vld [vmem:[%s6307_s28 + $0x1f8] sm:$0xff]  ;;  %4016 = vmatpush.msra.mxu2 %v3927_v34  ;;  %3977 = vmatpush.msra.mxu0 %v3894_v21  ;;  %v3568_v10 = vrot.slane %v3567_v25, 1  ;;  %v3913_v52 = vld [vmem:[%s6307_s28 + $0x108] sm:$0xff] }
 0x302   : > { %4036 = vmatpush.msra.mxu3 %v3943_v35  ;;  %3997 = vmatpush.msra.mxu1 %v3910_v29  ;;  %v3891_v63 = vld [vmem:[%s6307_s28 + $0x58] sm:$0xff]  ;;  %v3506_v11 = vadd.f32 %v3505_v62, %v3504_v20  ;;  %v3126_v35 = vpop.f32.mrf.mxu2  ;;  %v3916_v62 = vld [vmem:[%s6307_s28 + $0x120] sm:$0xff] }
 0x303   : > { %4017 = vmatpush.msra.mxu2 %v3926_v56  ;;  %3978 = vmatpush.msra.mxu0 %v3893_v24  ;;  %v3907_v46 = vld [vmem:[%s6307_s28 + $0xd8] sm:$0xff]  ;;  %v3569_v28 = vadd.f32 %v3568_v10, %v3567_v25  ;;  %v3902_v56 = vld [vmem:[%s6307_s28 + $0xb0] sm:$0xff]  ;;  %v3127_v20 = vadd.f32 %v3126_v35, %v2506_v48  ;;  %v3900_v25 = vld [vmem:[%s6307_s28 + $0xa0] sm:$0xff] }
 0x304   : > { %4037 = vmatpush.msra.mxu3 %v3942_v32  ;;  %3998 = vmatpush.msra.mxu1 %v3909_v54  ;;  %v3923_v26 = vld [vmem:[%s6307_s28 + $0x158] sm:$0xff]  ;;  %v3538_v34 = vmul.f32 %v6241_v41, %v3506_v11  ;;  %v6367_v32 = vsub.f32 %v6273_v51, %v3537_v18  ;;  %v3918_v24 = vld [vmem:[%s6307_s28 + $0x130] sm:$0xff]  ;;  %v3917_v51 = vld [vmem:[%s6307_s28 + $0x128] sm:$0xff] }
 0x305   : > { %4018 = vmatpush.msra.mxu2 %v3925_v55  ;;  %3979 = vmatpush.msra.mxu0 %v3892_v19  ;;  %v3939_v0 = vld [vmem:[%s6307_s28 + $0x1d8] sm:$0xff]  ;;  %v3608_v15 = vmul.f32 %v3569_v28, %v6241_v41  ;;  %v3146_v55 = vpop.f32.mrf.mxu3  ;;  %v6378_v19 = vadd.f32 1e-05, %v3607_v36  ;;  %v3914_v11 = vld [vmem:[%s6307_s28 + $0x110] sm:$0xff]  ;;  %v3880_v18 = vld [vmem:[%s6307_s28] sm:$0xff] }
 0x306   : > { %4038 = vmatpush.msra.mxu3 %v3941_v42  ;;  %3999 = vmatpush.msra.mxu1 %v3908_v13  ;;  %v3887_v39 = vld [vmem:[%s6307_s28 + $0x38] sm:$0xff]  ;;  %v6372_v54 = vsub.f32 %v6309_v23, %v3538_v34  ;;  %v3885_v42 = vld [vmem:[%s6307_s28 + $0x28] sm:$0xff]  ;;  %v3552_v13 = vmul.f32 %v6361_v37, %v6361_v37  ;;  %v3884_v23 = vld [vmem:[%s6307_s28 + $0x20] sm:$0xff] }
 0x307   : > { %4019 = vmatpush.msra.mxu2 %v3924_v60  ;;  %3980 = vmatpush.msra.mxu0 %v3891_v63  ;;  %v3903_v40 = vld [vmem:[%s6307_s28 + $0xb8] sm:$0xff]  ;;  %v6384_v57 = vadd.f32 1e-05, %v3608_v15  ;;  %v3553_v60 = vmul.f32 %v6367_v32, %v6367_v32  ;;  %v3932_v63 = vld [vmem:[%s6307_s28 + $0x1a0] sm:$0xff]  ;;  %4607 = vrsqrt.f32 %v6378_v19  ;;  %vm3629_vm3 = vweird.f32 %v6378_v19 }
 0x308   : > { %4039 = vmatpush.msra.mxu3 %v3940_v61  ;;  %4000 = vmatpush.msra.mxu1 %v3907_v46  ;;  %v3919_v21 = vld [vmem:[%s6307_s28 + $0x138] sm:$0xff]  ;;  %v3147_v61 = vadd.f32 %v3146_v55, %v3127_v20  ;;  %v3554_v46 = vmul.f32 %v6372_v54, %v6372_v54  ;;  %v3166_v47 = vpop.f32.mrf.mxu0  ;;  %v3570_v10 = vrot.slane %v3552_v13, 4  ;;  %v3912_v35 = vld [vmem:[%s6307_s28 + $0x100] sm:$0xff]  ;;  %v3974_v55 = vld [vmem:[%s6307_s28 + $0x2f0] sm:$0xff] }
 0x309   : > { %4020 = vmatpush.msra.mxu2 %v3923_v26  ;;  %3981 = vmatpush.msra.mxu0 %v3890_v8  ;;  %v3935_v29 = vld [vmem:[%s6307_s28 + $0x1b8] sm:$0xff]  ;;  %4609 = vrsqrt.f32 %v6384_v57  ;;  %vm3639_vm5 = vweird.f32 %v6384_v57 }
 0x30a   : > { %4040 = vmatpush.msra.mxu3 %v3939_v0  ;;  %4001 = vmatpush.msra.mxu1 %v3906_v45  ;;  %v3883_v26 = vld [vmem:[%s6307_s28 + $0x18] sm:$0xff]  ;;  %v3167_v45 = vadd.f32 %v3166_v47, %v3147_v61  ;;  %v3571_v28 = vadd.f32 %v3570_v10, %v3552_v13  ;;  %v3793_v13 = vld [vmem:[%s6412_s12 + $0xf0] sm:$0xff]  ;;  %v3973_v61 = vld [vmem:[%s6307_s28 + $0x2e8] sm:$0xff] }
 0x30b   : > { %4021 = vmatpush.msra.mxu2 %v3922_v9  ;;  %3982 = vmatpush.msra.mxu0 %v3889_v14  ;;  %v3899_v0 = vld [vmem:[%s6307_s28 + $0x98] sm:$0xff]  ;;  %v3898_v9 = vld [vmem:[%s6307_s28 + $0x90] sm:$0xff]  ;;  %v3972_v47 = vld [vmem:[%s6307_s28 + $0x2e0] sm:$0xff] }
 0x30c   : > { %4041 = vmatpush.msra.mxu3 %v3938_v5  ;;  %4002 = vmatpush.msra.mxu1 %v3905_v16  ;;  %v3915_v7 = vld [vmem:[%s6307_s28 + $0x118] sm:$0xff]  ;;  %v3576_v5 = vrot.slane %v3553_v60, 4  ;;  %v3930_v14 = vld [vmem:[%s6307_s28 + $0x190] sm:$0xff]  ;;  %v3186_v16 = vpop.f32.mrf.mxu1  ;;  %v3775_v10 = vld [vmem:[%s6412_s12 + $0x60] sm:$0xff] }
 0x30d   : > { %4022 = vmatpush.msra.mxu2 %v3921_v22  ;;  %3983 = vmatpush.msra.mxu0 %v3888_v17  ;;  %v3931_v8 = vld [vmem:[%s6307_s28 + $0x198] sm:$0xff]  ;;  %v3582_v22 = vrot.slane %v3554_v46, 4  ;;  %v3929_v17 = vld [vmem:[%s6307_s28 + $0x188] sm:$0xff]  ;;  %v6416_v48 = vpop.eup %4607 }
 0x30e   : > { %4042 = vmatpush.msra.mxu3 %v3937_v27  ;;  %4003 = vmatpush.msra.mxu1 %v3904_v30  ;;  %v3881_v27 = vld [vmem:[%s6307_s28 + $0x8] sm:$0xff]  ;;  %v3187_v30 = vadd.f32 %v3186_v16, %v3167_v45  ;;  %v3577_v34 = vadd.f32 %v3576_v5, %v3553_v60  ;;  %v3975_v36 = vld [vmem:[%s6307_s28 + $0x2f8] sm:$0xff]  ;;  %vm3630_vm1 = vweird.f32 %v6416_v48 }
 0x30f   : > { %4023 = vmatpush.msra.mxu2 %v3920_v31  ;;  %3984 = vmatpush.msra.mxu0 %v3887_v39  ;;  %v3896_v31 = vld [vmem:[%s6307_s28 + $0x80] sm:$0xff]  ;;  %v3794_v15 = vld [vmem:[%s6412_s12 + $0xf8] sm:$0xff]  ;;  %v3957_v60 = vld [vmem:[%s6307_s28 + $0x268] sm:$0xff] }
 0x310   : > { %4043 = vmatpush.msra.mxu3 %v3936_v33  ;;  %4004 = vmatpush.msra.mxu1 %v3903_v40  ;;  %v3206_v33 = vpop.f32.mrf.mxu2  ;;  %v3928_v39 = vld [vmem:[%s6307_s28 + $0x180] sm:$0xff]  ;;  %vm6494_vm4 = vmor %vm3629_vm3, %vm3630_vm1  ;;  %vm3519_vm3 = vcmask 326656  }
 0x311   : > { %4024 = vmatpush.msra.mxu2 %v3919_v21  ;;  %3985 = vmatpush.msra.mxu0 %v3886_v53  ;;  %v3207_v40 = vadd.f32 %v3206_v33, %v3187_v30  ;;  %v3583_v21 = vadd.f32 %v3582_v22, %v3554_v46  ;;  %v6420_v53 = vpop.eup %4609  ;;  %v3792_v46 = vld [vmem:[%s6412_s12 + $0xe8] sm:$0xff]  ;;  %v3774_v22 = vld [vmem:[%s6412_s12 + $0x58] sm:$0xff]  ;;  %v3970_v30 = vld [vmem:[%s6307_s28 + $0x2d0] sm:$0xff] }
 0x312   : > { %4044 = vmatpush.msra.mxu3 %v3935_v29  ;;  %4005 = vmatpush.msra.mxu1 %v3902_v56  ;;  %v3959_v29 = vld [vmem:[%s6307_s28 + $0x278] sm:$0xff]  ;;  %v3789_v33 = vld [vmem:[%s6412_s12 + $0xd0] sm:$0xff]  ;;  %vm3640_vm2 = vweird.f32 %v6420_v53 }
 0x313   : > { %4025 = vmatpush.msra.mxu2 %v3918_v24  ;;  %3986 = vmatpush.msra.mxu0 %v3885_v42  ;;  %v3778_v56 = vld [vmem:[%s6412_s12 + $0x78] sm:$0xff]  ;;  %v3226_v20 = vpop.f32.mrf.mxu3  ;;  %v3572_v24 = vrot.slane %v3571_v28, 2  ;;  %vm6510_vm6 = vmor %vm3639_vm5, %vm3640_vm2 }
 0x314   : > { %4045 = vmatpush.msra.mxu3 %v3934_v12  ;;  %4006 = vmatpush.msra.mxu1 %v3901_v43  ;;  %v3958_v12 = vld [vmem:[%s6307_s28 + $0x270] sm:$0xff]  ;;  %v3227_v42 = vadd.f32 %v3226_v20, %v3207_v40  ;;  %v3624_v43 = vmul.f32 %v6416_v48, %v6378_v19  ;;  %v3953_v40 = vld [vmem:[%s6307_s28 + $0x248] sm:$0xff]  ;;  %v3952_v20 = vld [vmem:[%s6307_s28 + $0x240] sm:$0xff] }
 0x315   : > { %4026 = vmatpush.msra.mxu2 %v3917_v51  ;;  %3987 = vmatpush.msra.mxu0 %v3884_v23  ;;  %v3578_v51 = vrot.slane %v3577_v34, 2  ;;  %v3634_v23 = vmul.f32 %v6420_v53, %v6384_v57  ;;  %v3842_v57 = vld [vmem:[%s6412_s12 + $0x278] sm:$0xff] }
 0x316   : > { %4046 = vmatpush.msra.mxu3 %v3933_v58  ;;  %4007 = vmatpush.msra.mxu1 %v3900_v25  ;;  %v3777_v58 = vld [vmem:[%s6412_s12 + $0x70] sm:$0xff]  ;;  %v3584_v25 = vrot.slane %v3583_v21, 2 }
 0x317   : > { %4027 = vmatpush.msra.mxu2 %v3916_v62  ;;  %3988 = vmatpush.msra.mxu0 %v3883_v26  ;;  %v6434_v62 = vmax.f32 %v3227_v42, 0.0  ;;  %v3573_v26 = vadd.f32 %v3572_v24, %v3571_v28  ;;  %v3579_v45 = vadd.f32 %v3578_v51, %v3577_v34  ;;  %v3968_v24 = vld [vmem:[%s6307_s28 + $0x2c0] sm:$0xff] }
 0x318   : > { %4047 = vmatpush.msra.mxu3 %v3932_v63  ;;  %4008 = vmatpush.msra.mxu1 %v3899_v0  ;;  %v3776_v63 = vld [vmem:[%s6412_s12 + $0x68] sm:$0xff]  ;;  %v3956_v0 = vld [vmem:[%s6307_s28 + $0x260] sm:$0xff]  ;;  %v3585_v5 = vadd.f32 %v3584_v25, %v3583_v21  ;;  %v3967_v25 = vld [vmem:[%s6307_s28 + $0x2b8] sm:$0xff] }
 0x319   : > { %4028 = vmatpush.msra.mxu2 %v3915_v7  ;;  %3989 = vmatpush.msra.mxu0 %v3882_v44  ;;  %v3507_v7 = vrot.slane %v6434_v62, 4  ;;  %v3791_v44 = vld [vmem:[%s6412_s12 + $0xe0] sm:$0xff]  ;;  %v3969_v21 = vld [vmem:[%s6307_s28 + $0x2c8] sm:$0xff] }
 0x31a   : > { %4048 = vmatpush.msra.mxu3 %v3931_v8  ;;  %4009 = vmatpush.msra.mxu1 %v3898_v9  ;;  %v3625_v8 = vmul.f32 %v6416_v48, %v3624_v43  ;;  %v3635_v9 = vmul.f32 %v6420_v53, %v3634_v23  ;;  %v3771_v42 = vld [vmem:[%s6412_s12 + $0x40] sm:$0xff]  ;;  %v3951_v23 = vld [vmem:[%s6307_s28 + $0x238] sm:$0xff] }
 0x31b   : > { %4029 = vmatpush.msra.mxu2 %v3914_v11  ;;  %3990 = vmatpush.msra.mxu0 %v3881_v27  ;;  %v3955_v11 = vld [vmem:[%s6307_s28 + $0x258] sm:$0xff]  ;;  %v3508_v16 = vadd.f32 %v3507_v7, %v6434_v62  ;;  %v3787_v43 = vld [vmem:[%s6412_s12 + $0xc0] sm:$0xff] }
 0x31c   : > { %4049 = vmatpush.msra.mxu3 %v3930_v14  ;;  %4010 = vmatpush.msra.mxu1 %v3897_v6  ;;  %v3971_v14 = vld [vmem:[%s6307_s28 + $0x2d8] sm:$0xff]  ;;  %v3574_v6 = vrot.slane %v3573_v26, 1  ;;  %v3626_v28 = vmul.f32 0.5, %v3625_v8  ;;  %v3636_v34 = vmul.f32 0.5, %v3635_v9  ;;  %v3769_v8 = vld [vmem:[%s6412_s12 + $0x30] sm:$0xff] }
 0x31d   : > { %4030 = vmatpush.msra.mxu2 %v3913_v52  ;;  %3991 = vmatpush.msra.mxu0 %v3880_v18  ;;  %v3790_v27 = vld [vmem:[%s6412_s12 + $0xd8] sm:$0xff]  ;;  %v3509_v52 = vrot.slane %v3508_v16, 2  ;;  %v3580_v18 = vrot.slane %v3579_v45, 1 }
 0x31e   : > { %4050 = vmatpush.msra.mxu3 %v3929_v17  ;;  %4011 = vmatpush.msra.mxu1 %v3896_v31  ;;  %v3954_v17 = vld [vmem:[%s6307_s28 + $0x250] sm:$0xff]  ;;  %v3637_v51 = vsub.f32 1.5, %v3636_v34  ;;  %v3947_v34 = vld [vmem:[%s6307_s28 + $0x218] sm:$0xff] }
 0x31f   : > { %4031 = vmatpush.msra.mxu2 %v3912_v35  ;;  %4056 = vmatpush.msrb.mxu0 %v3959_v29  ;;  %v3773_v31 = vld [vmem:[%s6412_s12 + $0x50] sm:$0xff]  ;;  %v3586_v35 = vrot.slane %v3585_v5, 1  ;;  %v3772_v29 = vld [vmem:[%s6412_s12 + $0x48] sm:$0xff] }
 0x320   : > { %4051 = vmatpush.msra.mxu3 %v3928_v39  ;;  %4076 = vmatpush.msrb.mxu1 %v3975_v36  ;;  %v3510_v39 = vadd.f32 %v3509_v52, %v3508_v16  ;;  %v3788_v36 = vld [vmem:[%s6412_s12 + $0xc8] sm:$0xff] }
 0x321   : > { %4099 = vmatpush.msrb.mxu2 %v3778_v56  ;;  %4057 = vmatpush.msrb.mxu0 %v3958_v12  ;;  %v3575_v56 = vadd.f32 %v3574_v6, %v3573_v26  ;;  %v3627_v12 = vsub.f32 1.5, %v3626_v28  ;;  %v3950_v26 = vld [vmem:[%s6307_s28 + $0x230] sm:$0xff]  ;;  %v3784_v16 = vld [vmem:[%s6412_s12 + $0xa8] sm:$0xff]  ;;  %v3964_v6 = vld [vmem:[%s6307_s28 + $0x2a0] sm:$0xff] }
 0x322   : > { %4119 = vmatpush.msrb.mxu3 %v3794_v15  ;;  %4077 = vmatpush.msrb.mxu1 %v3974_v55  ;;  %v3511_v15 = vrot.slane %v3510_v39, 1  ;;  %v3581_v55 = vadd.f32 %v3580_v18, %v3579_v45  ;;  %v3785_v45 = vld [vmem:[%s6412_s12 + $0xb0] sm:$0xff]  ;;  %v3783_v28 = vld [vmem:[%s6412_s12 + $0xa0] sm:$0xff] }
 0x323   : > { %4100 = vmatpush.msrb.mxu2 %v3777_v58  ;;  %4058 = vmatpush.msrb.mxu0 %v3957_v60  ;;  %v3587_v58 = vadd.f32 %v3586_v35, %v3585_v5  ;;  %v3770_v60 = vld [vmem:[%s6412_s12 + $0x38] sm:$0xff]  ;;  %v3949_v5 = vld [vmem:[%s6307_s28 + $0x228] sm:$0xff] }
 0x324   : > { %4120 = vmatpush.msrb.mxu3 %v3793_v13  ;;  %4078 = vmatpush.msrb.mxu1 %v3973_v61  ;;  %v3512_v13 = vadd.f32 %v3511_v15, %v3510_v39  ;;  %v3786_v61 = vld [vmem:[%s6412_s12 + $0xb8] sm:$0xff]  ;;  %v3610_v7 = vmul.f32 %v3581_v55, %v6241_v41  ;;  %v6550_v55 = vld [vmem:[%s524_s21] sm:$0xff] }
 0x325   : > { %4101 = vmatpush.msrb.mxu2 %v3776_v63  ;;  %4059 = vmatpush.msrb.mxu0 %v3956_v0  ;;  %v3609_v63 = vmul.f32 %v3575_v56, %v6241_v41  ;;  %v3966_v0 = vld [vmem:[%s6307_s28 + $0x2b0] sm:$0xff]  ;;  %v3963_v35 = vld [vmem:[%s6307_s28 + $0x298] sm:$0xff] }
 0x326   : > { %4121 = vmatpush.msrb.mxu3 %v3792_v46  ;;  %4079 = vmatpush.msrb.mxu1 %v3972_v47  ;;  %v3539_v46 = vmul.f32 %v6241_v41, %v3512_v13  ;;  %v3628_v47 = vmul.f32 %v6416_v48, %v3627_v12  ;;  %v3962_v56 = vld [vmem:[%s6307_s28 + $0x290] sm:$0xff]  ;;  %v3961_v13 = vld [vmem:[%s6307_s28 + $0x288] sm:$0xff] }
 0x327   : > { %4102 = vmatpush.msrb.mxu2 %v3775_v10  ;;  %4060 = vmatpush.msrb.mxu0 %v3955_v11  ;;  %v3638_v10 = vmul.f32 %v6420_v53, %v3637_v51  ;;  %v3965_v11 = vld [vmem:[%s6307_s28 + $0x2a8] sm:$0xff]  ;;  %v6499_v19 = vadd.f32 1e-05, %v3609_v63  ;;  %v3765_v12 = vld [vmem:[%s6412_s12 + $0x10] sm:$0xff]  ;;  %v4638_v51 = vld [vmem:[%s6862_s0] sm:$0xff] }
 0x328   : > { %4122 = vmatpush.msrb.mxu3 %v3791_v44  ;;  %4080 = vmatpush.msrb.mxu1 %v3971_v14  ;;  %v3611_v44 = vmul.f32 %v3587_v58, %v6241_v41  ;;  %v6479_v9 = vsub.f32 %v6434_v62, %v3539_v46  ;;  %v3768_v14 = vld [vmem:[%s6412_s12 + $0x28] sm:$0xff]  ;;  %v3632_v52 = vsel %vm6494_vm4, %v6416_v48, %v3628_v47  ;;  %v3740_v46 = vperm.slane %v6550_v55, 1 }
 0x329   : > { %4103 = vmatpush.msrb.mxu2 %v3774_v22  ;;  %4061 = vmatpush.msrb.mxu0 %v3954_v17  ;;  %v6514_v17 = vadd.f32 1e-05, %v3610_v7  ;;  %v3642_v18 = vsel %vm6510_vm6, %v6420_v53, %v3638_v10  ;;  %v3703_v53 = vmul.f32 %v3632_v52, %v6264_v38  ;;  %4611 = vrsqrt.f32 %v6499_v19  ;;  %v4637_v38 = vld [vmem:[%s6862_s0 + $0x18] sm:$0xff]  ;;  %v3945_v58 = vld [vmem:[%s6307_s28 + $0x208] sm:$0xff]  ;;  %v3944_v7 = vld [vmem:[%s6307_s28 + $0x200] sm:$0xff] }
 0x32a   : > { %4123 = vmatpush.msrb.mxu3 %v3790_v27  ;;  %4081 = vmatpush.msrb.mxu1 %v3970_v30  ;;  %v3555_v22 = vmul.f32 %v6479_v9, %v6479_v9  ;;  %v3948_v27 = vld [vmem:[%s6307_s28 + $0x220] sm:$0xff]  ;;  %v6521_v48 = vadd.f32 1e-05, %v3611_v44  ;;  %v4639_v47 = vld [vmem:[%s6862_s0 + $0x8] sm:$0xff]  ;;  %vm3649_vm8 = vweird.f32 %v6499_v19 }
 0x32b   : > { %4104 = vmatpush.msrb.mxu2 %v3773_v31  ;;  %4062 = vmatpush.msrb.mxu0 %v3953_v40  ;;  %v3767_v30 = vld [vmem:[%s6412_s12 + $0x20] sm:$0xff]  ;;  %v3766_v40 = vld [vmem:[%s6412_s12 + $0x18] sm:$0xff]  ;;  %4613 = vrsqrt.f32 %v6514_v17  ;;  %vm3659_vm12 = vweird.f32 %v6514_v17 }
 0x32c   : > { %4124 = vmatpush.msrb.mxu3 %v3789_v33  ;;  %4082 = vmatpush.msrb.mxu1 %v3969_v21  ;;  %v3588_v31 = vrot.slane %v3555_v22, 4  ;;  %v6524_v33 = vld [vmem:[%s6490_s16] sm:$0xff]  ;;  %v3782_v21 = vld [vmem:[%s6412_s12 + $0x98] sm:$0xff]  ;;  %4615 = vrsqrt.f32 %v6521_v48  ;;  %vm3669_vm14 = vweird.f32 %v6521_v48 }
 0x32d   : > { %4105 = vmatpush.msrb.mxu2 %v3772_v29  ;;  %4063 = vmatpush.msrb.mxu0 %v3952_v20  ;;  %v3704_v29 = vmul.f32 %v3642_v18, %v6271_v49  ;;  %v3713_v15 = vperm.slane %v6524_v33, 0  ;;  %v3714_v20 = vperm.slane %v6524_v33, 1  ;;  %v3763_v10 = vld [vmem:[%s6412_s12] sm:$0xff]  ;;  %v3825_v18 = vld [vmem:[%s6412_s12 + $0x1f0] sm:$0xff] }
 0x32e   : > { %4125 = vmatpush.msrb.mxu3 %v3788_v36  ;;  %4083 = vmatpush.msrb.mxu1 %v3968_v24  ;;  %v3589_v39 = vadd.f32 %v3588_v31, %v3555_v22  ;;  %v4636_v36 = vld [vmem:[%s6862_s0 + $0x10] sm:$0xff]  ;;  %v3779_v44 = vld [vmem:[%s6412_s12 + $0x80] sm:$0xff]  ;;  %v3810_v22 = vld [vmem:[%s6412_s12 + $0x178] sm:$0xff] }
 0x32f   : > { %4106 = vmatpush.msrb.mxu2 %v3771_v42  ;;  %4064 = vmatpush.msrb.mxu0 %v3951_v23  ;;  %v3946_v24 = vld [vmem:[%s6307_s28 + $0x210] sm:$0xff]  ;;  %v3764_v23 = vld [vmem:[%s6412_s12 + $0x8] sm:$0xff]  ;;  %v3730_v63 = vmul.f32 %v3714_v20, %v3704_v29  ;;  %v3823_v20 = vld [vmem:[%s6412_s12 + $0x1e0] sm:$0xff] }
 0x330   : > { %4126 = vmatpush.msrb.mxu3 %v3787_v43  ;;  %4084 = vmatpush.msrb.mxu1 %v3967_v25  ;;  %v3590_v49 = vrot.slane %v3589_v39, 2  ;;  %v3781_v42 = vld [vmem:[%s6412_s12 + $0x90] sm:$0xff]  ;;  %v3780_v25 = vld [vmem:[%s6412_s12 + $0x88] sm:$0xff] }
 0x331   : > { %4107 = vmatpush.msrb.mxu2 %v3770_v60  ;;  %4065 = vmatpush.msrb.mxu0 %v3950_v26  ;;  %v3729_v60 = vmul.f32 %v3713_v15, %v3703_v53  ;;  %v6562_v26 = vpop.eup %4611  ;;  %v3756_v62 = vadd.f32 %v3740_v46, %v3730_v63  ;;  %v4640_v53 = vld [vmem:[%s6862_s0 + $0x20] sm:$0xff]  ;;  %v3840_v29 = vld [vmem:[%s6412_s12 + $0x268] sm:$0xff]  ;;  %v3246_v63 = vpop.f32.mrf.mxu0  ;;  %v3837_v46 = vld [vmem:[%s6412_s12 + $0x250] sm:$0xff] }
 0x332   : > { %4127 = vmatpush.msrb.mxu3 %v3786_v61  ;;  %4085 = vmatpush.msrb.mxu1 %v3966_v0  ;;  %v3591_v43 = vadd.f32 %v3590_v49, %v3589_v39  ;;  %v3739_v61 = vperm.slane %v6550_v55, 0  ;;  %v3808_v39 = vld [vmem:[%s6412_s12 + $0x168] sm:$0xff]  ;;  %v3807_v15 = vld [vmem:[%s6412_s12 + $0x160] sm:$0xff]  ;;  %vm3650_vm7 = vweird.f32 %v6562_v26 }
 0x333   : > { %4108 = vmatpush.msrb.mxu2 %v3769_v8  ;;  %4066 = vmatpush.msrb.mxu0 %v3949_v5  ;;  %v3960_v8 = vld [vmem:[%s6307_s28 + $0x280] sm:$0xff]  ;;  %vm6647_vm11 = vmor %vm3649_vm8, %vm3650_vm7 }
 0x334   : > { %4128 = vmatpush.msrb.mxu3 %v3785_v45  ;;  %4086 = vmatpush.msrb.mxu1 %v3965_v11  ;;  %v3592_v0 = vrot.slane %v3591_v43, 1  ;;  %v6569_v45 = vpop.eup %4613  ;;  %v3839_v49 = vld [vmem:[%s6412_s12 + $0x260] sm:$0xff] }
 0x335   : > { %4109 = vmatpush.msrb.mxu2 %v3768_v14  ;;  %4067 = vmatpush.msrb.mxu0 %v3948_v27  ;;  %v6573_v5 = vpop.eup %4615  ;;  %v3644_v14 = vmul.f32 %v6562_v26, %v6499_v19  ;;  %v3826_v27 = vld [vmem:[%s6412_s12 + $0x1f8] sm:$0xff]  ;;  %vm3660_vm9 = vweird.f32 %v6569_v45  ;;  %v3845_v19 = vld [vmem:[%s6412_s12 + $0x290] sm:$0xff] }
 0x336   : > { %4129 = vmatpush.msrb.mxu3 %v3784_v16  ;;  %4087 = vmatpush.msrb.mxu1 %v3964_v6  ;;  %v3593_v11 = vadd.f32 %v3592_v0, %v3591_v43  ;;  %v3755_v16 = vadd.f32 %v3739_v61, %v3729_v60  ;;  %v3654_v6 = vmul.f32 %v6569_v45, %v6514_v17  ;;  %v3822_v43 = vld [vmem:[%s6412_s12 + $0x1d8] sm:$0xff]  ;;  %v3821_v60 = vld [vmem:[%s6412_s12 + $0x1d0] sm:$0xff]  ;;  %v3855_v0 = vld [vmem:[%s6412_s12 + $0x2e0] sm:$0xff]  ;;  %vm3670_vm10 = vweird.f32 %v6573_v5 }
 0x337   : > { %4110 = vmatpush.msrb.mxu2 %v3767_v30  ;;  %4052 = vmatmul.f32.vlgmr.msra.gmra.mxu3 %v4637_v38  ;;  %v3664_v30 = vmul.f32 %v6573_v5, %v6521_v48  ;;  %vm6659_vm13 = vmor %vm3659_vm12, %vm3660_vm9  ;;  %v3800_v17 = vld [vmem:[%s6412_s12 + $0x128] sm:$0xff] }
 0x338   : > { %4130 = vmatpush.msrb.mxu3 %v3783_v28  ;;  %4032 = vmatmul.f32.vlgmr.msra.gmra.mxu2 %v4636_v36  ;;  %v3612_v52 = vmul.f32 %v3593_v11, %v6241_v41  ;;  %v3809_v28 = vld [vmem:[%s6412_s12 + $0x170] sm:$0xff]  ;;  %v3858_v36 = vld [vmem:[%s6412_s12 + $0x2f8] sm:$0xff]  ;;  %vm6671_vm15 = vmor %vm3669_vm14, %vm3670_vm10  ;;  %vm4410_vm10 = vcmask 64512  }
 0x339   : > { %4068 = vmatpush.msrb.mxu0 %v3947_v34  ;;  %4088 = vmatpush.msrb.mxu1 %v3963_v35  ;;  %v3841_v34 = vld [vmem:[%s6412_s12 + $0x270] sm:$0xff]  ;;  %v3645_v35 = vmul.f32 %v6562_v26, %v3644_v14  ;;  %v3665_v38 = vmul.f32 %v6573_v5, %v3664_v30  ;;  %v3836_v14 = vld [vmem:[%s6412_s12 + $0x248] sm:$0xff] }
 0x33a   : > { %4111 = vmatpush.msrb.mxu2 %v3766_v40  ;;  %4131 = vmatpush.msrb.mxu3 %v3782_v21  ;;  %v6587_v31 = vadd.f32 1e-05, %v3612_v52  ;;  %v3824_v40 = vld [vmem:[%s6412_s12 + $0x1e8] sm:$0xff]  ;;  %v3655_v21 = vmul.f32 %v6569_v45, %v3654_v6  ;;  %v3819_v6 = vld [vmem:[%s6412_s12 + $0x1c0] sm:$0xff]  ;;  %v3266_v52 = vpop.f32.mrf.mxu1  ;;  %v3853_v30 = vld [vmem:[%s6412_s12 + $0x2d0] sm:$0xff] }
 0x33b   : > { %3992 = vmatmul.f32.vlgmr.msra.gmra.mxu0 %v4638_v51  ;;  %4089 = vmatpush.msrb.mxu1 %v3962_v56  ;;  %v4641_v56 = vld [vmem:[%s6862_s0 + $0x28] sm:$0xff] }
 0x33c   : > { %4069 = vmatpush.msrb.mxu0 %v3946_v24  ;;  %4112 = vmatpush.msrb.mxu2 %v3765_v12  ;;  %4617 = vrsqrt.f32 %v6587_v31  ;;  %v3857_v24 = vld [vmem:[%s6412_s12 + $0x2f0] sm:$0xff]  ;;  %v3646_v12 = vmul.f32 0.5, %v3645_v35  ;;  %v3656_v51 = vmul.f32 0.5, %v3655_v21  ;;  %v3818_v35 = vld [vmem:[%s6412_s12 + $0x1b8] sm:$0xff]  ;;  %v3852_v21 = vld [vmem:[%s6412_s12 + $0x2c8] sm:$0xff]  ;;  %vm3679_vm1 = vweird.f32 %v6587_v31 }
 0x33d   : > { %4132 = vmatpush.msrb.mxu3 %v3781_v42  ;;  %4012 = vmatmul.f32.vlgmr.msra.gmra.mxu1 %v4639_v47  ;;  %v3806_v42 = vld [vmem:[%s6412_s12 + $0x158] sm:$0xff]  ;;  %v2507_v47 = vperm.slane %v5622_v50, 0  ;;  %v3832_v48 = vld [vmem:[%s6412_s12 + $0x228] sm:$0xff] }
 0x33e   : > { %4070 = vmatpush.msrb.mxu0 %v3945_v58  ;;  %4090 = vmatpush.msrb.mxu1 %v3961_v13  ;;  %v3838_v58 = vld [vmem:[%s6412_s12 + $0x258] sm:$0xff]  ;;  %v3856_v13 = vld [vmem:[%s6412_s12 + $0x2e8] sm:$0xff]  ;;  %v3657_v11 = vsub.f32 1.5, %v3656_v51 }
 0x33f   : > { %4113 = vmatpush.msrb.mxu2 %v3764_v23  ;;  %4133 = vmatpush.msrb.mxu3 %v3780_v25  ;;  %v3666_v23 = vmul.f32 0.5, %v3665_v38  ;;  %v3805_v25 = vld [vmem:[%s6412_s12 + $0x150] sm:$0xff] }
 0x340   : > { %4071 = vmatpush.msrb.mxu0 %v3944_v7  ;;  %4091 = vmatpush.msrb.mxu1 %v3960_v8  ;;  %v3647_v7 = vsub.f32 1.5, %v3646_v12 }
 0x341   : > { %4114 = vmatpush.msrb.mxu2 %v3763_v10  ;;  %4134 = vmatpush.msrb.mxu3 %v3779_v44  ;;  %v3804_v10 = vld [vmem:[%s6412_s12 + $0x148] sm:$0xff] }
 0x342   : > { %4115 = vmatmul.f32.vlgmr.msrb.gmra.mxu2 %v3755_v16  ;;  %4135 = vmatmul.f32.vlgmr.msrb.gmra.mxu3 %v3756_v62  ;;  %v6614_v61 = vpop.eup %4617  ;;  %v3820_v44 = vld [vmem:[%s6412_s12 + $0x1c8] sm:$0xff]  ;;  %v3854_v16 = vld [vmem:[%s6412_s12 + $0x2d8] sm:$0xff]  ;;  %v3667_v62 = vsub.f32 1.5, %v3666_v23 }
 0x343   : > { %4139 = vmatpush.msra.mxu0 %v3810_v22  ;;  %4159 = vmatpush.msra.mxu1 %v3826_v27  ;;  %v3674_v8 = vmul.f32 %v6614_v61, %v6587_v31  ;;  %v3247_v22 = vadd.f32 %v3246_v63, %v2507_v47  ;;  %v3803_v27 = vld [vmem:[%s6412_s12 + $0x140] sm:$0xff]  ;;  %vm3680_vm0 = vweird.f32 %v6614_v61  ;;  %v3848_v31 = vld [vmem:[%s6412_s12 + $0x2a8] sm:$0xff] }
 0x344   : > { %4179 = vmatpush.msra.mxu2 %v3842_v57  ;;  %4072 = vmatmul.f32.vlgmr.msrb.gmra.mxu0 %v4640_v53  ;;  %v3835_v57 = vld [vmem:[%s6412_s12 + $0x240] sm:$0xff]  ;;  %v3658_v53 = vmul.f32 %v6569_v45, %v3657_v11  ;;  %vm6696_vm2 = vmor %vm3679_vm1, %vm3680_vm0 }
 0x345   : > { %4140 = vmatpush.msra.mxu0 %v3809_v28  ;;  %4160 = vmatpush.msra.mxu1 %v3825_v18  ;;  %v3675_v50 = vmul.f32 %v6614_v61, %v3674_v8  ;;  %v3648_v28 = vmul.f32 %v6562_v26, %v3647_v7  ;;  %v3267_v38 = vadd.f32 %v3266_v52, %v3247_v22  ;;  %v3798_v8 = vld [vmem:[%s6412_s12 + $0x118] sm:$0xff]  ;;  %v3847_v52 = vld [vmem:[%s6412_s12 + $0x2a0] sm:$0xff] }
 0x346   : > { %4180 = vmatpush.msra.mxu2 %v3841_v34  ;;  %4092 = vmatmul.f32.vlgmr.msrb.gmra.mxu1 %v4641_v56  ;;  %v3802_v34 = vld [vmem:[%s6412_s12 + $0x138] sm:$0xff]  ;;  %v3801_v56 = vld [vmem:[%s6412_s12 + $0x130] sm:$0xff]  ;;  %v3662_v51 = vsel %vm6659_vm13, %v6569_v45, %v3658_v53  ;;  %v3799_v45 = vld [vmem:[%s6412_s12 + $0x120] sm:$0xff] }
 0x347   : > { %4141 = vmatpush.msra.mxu0 %v3808_v39  ;;  %4161 = vmatpush.msra.mxu1 %v3824_v40  ;;  %v3676_v18 = vmul.f32 0.5, %v3675_v50  ;;  %v3286_v39 = vpop.f32.mrf.mxu2  ;;  %v3834_v40 = vld [vmem:[%s6412_s12 + $0x238] sm:$0xff]  ;;  %v3652_v12 = vsel %vm6647_vm11, %v6562_v26, %v3648_v28  ;;  %v3706_v47 = vmul.f32 %v3662_v51, %v6367_v32  ;;  %v3813_v50 = vld [vmem:[%s6412_s12 + $0x190] sm:$0xff]  ;;  %v3844_v51 = vld [vmem:[%s6412_s12 + $0x288] sm:$0xff] }
 0x348   : > { %4181 = vmatpush.msra.mxu2 %v3840_v29  ;;  %4199 = vmatpush.msra.mxu3 %v3858_v36  ;;  %v3668_v29 = vmul.f32 %v6573_v5, %v3667_v62  ;;  %v3705_v63 = vmul.f32 %v3652_v12, %v6361_v37  ;;  %v3716_v37 = vperm.slane %v6524_v33, 3  ;;  %v3830_v32 = vld [vmem:[%s6412_s12 + $0x218] sm:$0xff]  ;;  %v3797_v62 = vld [vmem:[%s6412_s12 + $0x110] sm:$0xff]  ;;  %v3867_v11 = vld [vmem:[%s6412_s12 + $0x340] sm:$0xff] }
 0x349   : > { %4142 = vmatpush.msra.mxu0 %v3807_v15  ;;  %4162 = vmatpush.msra.mxu1 %v3823_v20  ;;  %v3677_v36 = vsub.f32 1.5, %v3676_v18  ;;  %v3817_v15 = vld [vmem:[%s6412_s12 + $0x1b0] sm:$0xff]  ;;  %v3742_v18 = vperm.slane %v6550_v55, 3 }
 0x34a   : > { %4182 = vmatpush.msra.mxu2 %v3839_v49  ;;  %4200 = vmatpush.msra.mxu3 %v3857_v24  ;;  %v3833_v49 = vld [vmem:[%s6412_s12 + $0x230] sm:$0xff]  ;;  %v3851_v24 = vld [vmem:[%s6412_s12 + $0x2c0] sm:$0xff]  ;;  %v3672_v23 = vsel %vm6671_vm15, %v6573_v5, %v3668_v29  ;;  %v3715_v5 = vperm.slane %v6524_v33, 2  ;;  %v3732_v28 = vmul.f32 %v3716_v37, %v3706_v47  ;;  %v3846_v29 = vld [vmem:[%s6412_s12 + $0x298] sm:$0xff] }
 0x34b   : > { %4143 = vmatpush.msra.mxu0 %v3806_v42  ;;  %4163 = vmatpush.msra.mxu1 %v3822_v43  ;;  %v3287_v42 = vadd.f32 %v3286_v39, %v3267_v38  ;;  %v3816_v43 = vld [vmem:[%s6412_s12 + $0x1a8] sm:$0xff]  ;;  %v3795_v38 = vld [vmem:[%s6412_s12 + $0x100] sm:$0xff] }
 0x34c   : > { %4183 = vmatpush.msra.mxu2 %v3838_v58  ;;  %4201 = vmatpush.msra.mxu3 %v3856_v13  ;;  %v3306_v58 = vpop.f32.mrf.mxu3  ;;  %v3850_v13 = vld [vmem:[%s6412_s12 + $0x2b8] sm:$0xff]  ;;  %v3828_v39 = vld [vmem:[%s6412_s12 + $0x208] sm:$0xff] }
 0x34d   : > { %4144 = vmatpush.msra.mxu0 %v3805_v25  ;;  %4164 = vmatpush.msra.mxu1 %v3821_v60  ;;  %v3678_v25 = vmul.f32 %v6614_v61, %v3677_v36  ;;  %v3815_v60 = vld [vmem:[%s6412_s12 + $0x1a0] sm:$0xff]  ;;  %v3307_v7 = vadd.f32 %v3306_v58, %v3287_v42  ;;  %v3718_v36 = vperm.slane %v6524_v33, 5 }
 0x34e   : > { %4184 = vmatpush.msra.mxu2 %v3837_v46  ;;  %4202 = vmatpush.msra.mxu3 %v3855_v0  ;;  %v3831_v46 = vld [vmem:[%s6412_s12 + $0x220] sm:$0xff]  ;;  %v3849_v0 = vld [vmem:[%s6412_s12 + $0x2b0] sm:$0xff] }
 0x34f   : > { %4145 = vmatpush.msra.mxu0 %v3804_v10  ;;  %4165 = vmatpush.msra.mxu1 %v3820_v44  ;;  %v3814_v10 = vld [vmem:[%s6412_s12 + $0x198] sm:$0xff]  ;;  %v3707_v44 = vmul.f32 %v3672_v23, %v6372_v54  ;;  %v3682_v54 = vsel %vm6696_vm2, %v6614_v61, %v3678_v25  ;;  %v3731_v61 = vmul.f32 %v3715_v5, %v3705_v63  ;;  %v3843_v58 = vld [vmem:[%s6412_s12 + $0x280] sm:$0xff]  ;;  %v3873_v25 = vld [vmem:[%s6412_s12 + $0x370] sm:$0xff] }
 0x350   : > { %4185 = vmatpush.msra.mxu2 %v3836_v14  ;;  %4203 = vmatpush.msra.mxu3 %v3854_v16  ;;  %v3717_v14 = vperm.slane %v6524_v33, 4  ;;  %v3326_v16 = vpop.f32.mrf.mxu0  ;;  %v3708_v53 = vmul.f32 %v3682_v54, %v6479_v9  ;;  %v3870_v5 = vld [vmem:[%s6412_s12 + $0x358] sm:$0xff] }
 0x351   : > { %4146 = vmatpush.msra.mxu0 %v3803_v27  ;;  %4166 = vmatpush.msra.mxu1 %v3819_v6  ;;  %v3327_v22 = vadd.f32 %v3326_v16, %v3307_v7  ;;  %v3829_v27 = vld [vmem:[%s6412_s12 + $0x210] sm:$0xff]  ;;  %v3741_v6 = vperm.slane %v6550_v55, 2 }
 0x352   : > { %4186 = vmatpush.msra.mxu2 %v3835_v57  ;;  %4204 = vmatpush.msra.mxu3 %v3853_v30  ;;  %v3796_v57 = vld [vmem:[%s6412_s12 + $0x108] sm:$0xff]  ;;  %v3734_v42 = vmul.f32 %v3718_v36, %v3708_v53  ;;  %v3869_v7 = vld [vmem:[%s6412_s12 + $0x350] sm:$0xff]  ;;  %v3859_v36 = vld [vmem:[%s6412_s12 + $0x300] sm:$0xff] }
 0x353   : > { %4147 = vmatpush.msra.mxu0 %v3802_v34  ;;  %4167 = vmatpush.msra.mxu1 %v3818_v35  ;;  %v3812_v30 = vld [vmem:[%s6412_s12 + $0x188] sm:$0xff]  ;;  %v3743_v34 = vperm.slane %v6550_v55, 4  ;;  %v3346_v35 = vpop.f32.mrf.mxu1  ;;  %v3757_v9 = vadd.f32 %v3741_v6, %v3731_v61 }
 0x354   : > { %4187 = vmatpush.msra.mxu2 %v3834_v40  ;;  %4205 = vmatpush.msra.mxu3 %v3852_v21  ;;  %v3733_v40 = vmul.f32 %v3717_v14, %v3707_v44  ;;  %v3347_v21 = vadd.f32 %v3346_v35, %v3327_v22  ;;  %v3366_v44 = vpop.f32.mrf.mxu2  ;;  %v3866_v14 = vld [vmem:[%s6412_s12 + $0x338] sm:$0xff]  ;;  %v3861_v35 = vld [vmem:[%s6412_s12 + $0x310] sm:$0xff] }
 0x355   : > { %4148 = vmatpush.msra.mxu0 %v3801_v56  ;;  %4168 = vmatpush.msra.mxu1 %v3817_v15  ;;  %v3811_v56 = vld [vmem:[%s6412_s12 + $0x180] sm:$0xff] }
 0x356   : > { %4188 = vmatpush.msra.mxu2 %v3833_v49  ;;  %4206 = vmatpush.msra.mxu3 %v3851_v24  ;;  %v3827_v15 = vld [vmem:[%s6412_s12 + $0x200] sm:$0xff]  ;;  %v3475_v20 = vmax.f32 %v3347_v21, 0.0  ;;  %v3758_v49 = vadd.f32 %v3742_v18, %v3732_v28  ;;  %v3759_v24 = vadd.f32 %v3743_v34, %v3733_v40  ;;  %v3862_v28 = vld [vmem:[%s6412_s12 + $0x318] sm:$0xff]  ;;  %v3860_v21 = vld [vmem:[%s6412_s12 + $0x308] sm:$0xff] }
 0x357   : > { %4149 = vmatpush.msra.mxu0 %v3800_v17  ;;  %4169 = vmatpush.msra.mxu1 %v3816_v43  ;;  %v3744_v17 = vperm.slane %v6550_v55, 5 }
 0x358   : > { %4189 = vmatpush.msra.mxu2 %v3832_v48  ;;  %4207 = vmatpush.msra.mxu3 %v3850_v13  ;;  %v3513_v12 = vrot.slane %v3475_v20, 4  ;;  %v3874_v13 = vld [vmem:[%s6412_s12 + $0x378] sm:$0xff] }
 0x359   : > { %4150 = vmatpush.msra.mxu0 %v3799_v45  ;;  %4170 = vmatpush.msra.mxu1 %v3815_v60  ;;  %v3760_v48 = vadd.f32 %v3744_v17, %v3734_v42  ;;  %v3872_v60 = vld [vmem:[%s6412_s12 + $0x368] sm:$0xff]  ;;  %v4274_v17 = vld [vmem:[%s6757_s23 + $0x78] sm:$0xff] }
 0x35a   : > { %4190 = vmatpush.msra.mxu2 %v3831_v46  ;;  %4208 = vmatpush.msra.mxu3 %v3849_v0  ;;  %v3514_v43 = vadd.f32 %v3513_v12, %v3475_v20  ;;  %v3871_v46 = vld [vmem:[%s6412_s12 + $0x360] sm:$0xff] }
 0x35b   : > { %4151 = vmatpush.msra.mxu0 %v3798_v8  ;;  %4171 = vmatpush.msra.mxu1 %v3814_v10  ;;  %v3868_v10 = vld [vmem:[%s6412_s12 + $0x348] sm:$0xff]  ;;  %v3879_v12 = vld [vmem:[%s6412_s12 + $0x3a0] sm:$0xff] }
 0x35c   : > { %4191 = vmatpush.msra.mxu2 %v3830_v32  ;;  %4209 = vmatpush.msra.mxu3 %v3848_v31  ;;  %v3515_v26 = vrot.slane %v3514_v43, 2  ;;  %v2508_v32 = vperm.slane %v5679_v59, 0  ;;  %v3863_v59 = vld [vmem:[%s6412_s12 + $0x320] sm:$0xff] }
 0x35d   : > { %4152 = vmatpush.msra.mxu0 %v3797_v62  ;;  %4172 = vmatpush.msra.mxu1 %v3813_v50  ;;  %v3386_v62 = vpop.f32.mrf.mxu3  ;;  %v3865_v50 = vld [vmem:[%s6412_s12 + $0x330] sm:$0xff] }
 0x35e   : > { %4192 = vmatpush.msra.mxu2 %v3829_v27  ;;  %4210 = vmatpush.msra.mxu3 %v3847_v52  ;;  %v3516_v23 = vadd.f32 %v3515_v26, %v3514_v43  ;;  %v3367_v16 = vadd.f32 %v3366_v44, %v2508_v32  ;;  %v3864_v27 = vld [vmem:[%s6412_s12 + $0x328] sm:$0xff]  ;;  %v4290_v43 = vld [vmem:[%s6757_s23 + $0xf8] sm:$0xff] }
 0x35f   : > { %4153 = vmatpush.msra.mxu0 %v3796_v57  ;;  %4173 = vmatpush.msra.mxu1 %v3812_v30  ;;  %v4270_v32 = vld [vmem:[%s6757_s23 + $0x58] sm:$0xff] }
 0x360   : > { %4193 = vmatpush.msra.mxu2 %v3828_v39  ;;  %4211 = vmatpush.msra.mxu3 %v3846_v29  ;;  %v3517_v45 = vrot.slane %v3516_v23, 1  ;;  %v3387_v6 = vadd.f32 %v3386_v62, %v3367_v16  ;;  %v4269_v62 = vld [vmem:[%s6757_s23 + $0x50] sm:$0xff] }
 0x361   : > { %4154 = vmatpush.msra.mxu0 %v3795_v38  ;;  %4174 = vmatpush.msra.mxu1 %v3811_v56 }
 0x362   : > { %4194 = vmatpush.msra.mxu2 %v3827_v15  ;;  %4155 = vmatmul.f32.vlgmr.msra.gmra.mxu0 %v3757_v9  ;;  %v3518_v63 = vadd.f32 %v3517_v45, %v3516_v23  ;;  %v3877_v23 = vld [vmem:[%s6412_s12 + $0x390] sm:$0xff] }
 0x363   : > { %4175 = vmatmul.f32.vlgmr.msra.gmra.mxu1 %v3758_v49  ;;  %4195 = vmatmul.f32.vlgmr.msra.gmra.mxu2 %v3759_v24 }
 0x364   : > { %4212 = vmatpush.msra.mxu3 %v3845_v19  ;;  %4219 = vmatpush.msrb.mxu0 %v3874_v13  ;;  %v3540_v0 = vmul.f32 %v6241_v41, %v3518_v63  ;;  %v4289_v13 = vld [vmem:[%s6757_s23 + $0xf0] sm:$0xff]  ;;  %v4288_v63 = vld [vmem:[%s6757_s23 + $0xe8] sm:$0xff] }
 0x365   : > { %4250 = vmatpush.msrb.mxu1 %v3879_v12  ;;  %4323 = vmatpush.msrb.mxu2 %v4274_v17  ;;  %v4280_v12 = vld [vmem:[%s6757_s23 + $0xa8] sm:$0xff]  ;;  %v4317_v17 = vld [vmem:[%s6757_s23 + $0x1d0] sm:$0xff] }
 0x366   : > { %4213 = vmatpush.msra.mxu3 %v3844_v51  ;;  %4220 = vmatpush.msrb.mxu0 %v3873_v25  ;;  %v6732_v47 = vsub.f32 %v3475_v20, %v3540_v0  ;;  %v3878_v51 = vld [vmem:[%s6412_s12 + $0x398] sm:$0xff] }
 0x367   : > { %4251 = vmatpush.msrb.mxu1 %v3878_v51  ;;  %v4279_v51 = vld [vmem:[%s6757_s23 + $0xa0] sm:$0xff] }
 0x368   : > { %4214 = vmatpush.msra.mxu3 %v3843_v58  ;;  %4221 = vmatpush.msrb.mxu0 %v3872_v60  ;;  %v3556_v8 = vmul.f32 %v6732_v47, %v6732_v47  ;;  %v4272_v60 = vld [vmem:[%s6757_s23 + $0x68] sm:$0xff] }
 0x369   : > { %4215 = vmatmul.f32.vlgmr.msra.gmra.mxu3 %v3760_v48  ;;  %v4273_v48 = vld [vmem:[%s6757_s23 + $0x70] sm:$0xff]  ;;  %4252 = vmatpush.msrb.mxu1 %v3877_v23  ;;  %v4278_v23 = vld [vmem:[%s6757_s23 + $0x98] sm:$0xff] }
 0x36a   : > { %4222 = vmatpush.msrb.mxu0 %v3871_v46  ;;  %v3594_v37 = vrot.slane %v3556_v8, 4  ;;  %4343 = vmatpush.msrb.mxu3 %v4290_v43  ;;  %v3876_v46 = vld [vmem:[%s6412_s12 + $0x388] sm:$0xff]  ;;  %v4263_v43 = vld [vmem:[%s6757_s23 + $0x20] sm:$0xff] }
 0x36b   : > { %4324 = vmatpush.msrb.mxu2 %v4273_v48  ;;  %4253 = vmatpush.msrb.mxu1 %v3876_v46  ;;  %v4316_v48 = vld [vmem:[%s6757_s23 + $0x1c8] sm:$0xff]  ;;  %v4277_v46 = vld [vmem:[%s6757_s23 + $0x90] sm:$0xff] }
 0x36c   : > { %4223 = vmatpush.msrb.mxu0 %v3870_v5  ;;  %v3595_v31 = vadd.f32 %v3594_v37, %v3556_v8  ;;  %4344 = vmatpush.msrb.mxu3 %v4289_v13  ;;  %v4287_v8 = vld [vmem:[%s6757_s23 + $0xe0] sm:$0xff]  ;;  %v4262_v13 = vld [vmem:[%s6757_s23 + $0x18] sm:$0xff] }
 0x36d   : > { %4325 = vmatpush.msrb.mxu2 %v4272_v60  ;;  %v3875_v37 = vld [vmem:[%s6412_s12 + $0x380] sm:$0xff] }
 0x36e   : > { %4224 = vmatpush.msrb.mxu0 %v3869_v7  ;;  %v3596_v54 = vrot.slane %v3595_v31, 2  ;;  %4345 = vmatpush.msrb.mxu3 %v4288_v63  ;;  %v4271_v7 = vld [vmem:[%s6757_s23 + $0x60] sm:$0xff]  ;;  %v4261_v63 = vld [vmem:[%s6757_s23 + $0x10] sm:$0xff] }
 0x36f   : > { %4326 = vmatpush.msrb.mxu2 %v4271_v7  ;;  %4254 = vmatpush.msrb.mxu1 %v3875_v37  ;;  %v4315_v60 = vld [vmem:[%s6757_s23 + $0x1c0] sm:$0xff]  ;;  %v4314_v7 = vld [vmem:[%s6757_s23 + $0x1b8] sm:$0xff]  ;;  %v4296_v37 = vld [vmem:[%s6757_s23 + $0x128] sm:$0xff] }
 0x370   : > { %4225 = vmatpush.msrb.mxu0 %v3868_v10  ;;  %v3597_v22 = vadd.f32 %v3596_v54, %v3595_v31  ;;  %v3719_v10 = vperm.slane %v6524_v33, 6  ;;  %4346 = vmatpush.msrb.mxu3 %v4287_v8  ;;  %v4286_v31 = vld [vmem:[%s6757_s23 + $0xd8] sm:$0xff]  ;;  %v3745_v54 = vperm.slane %v6550_v55, 6  ;;  %v4260_v8 = vld [vmem:[%s6757_s23 + $0x8] sm:$0xff] }
 0x371   : > { %4327 = vmatpush.msrb.mxu2 %v4270_v32  ;;  %v4259_v32 = vld [vmem:[%s6757_s23] sm:$0xff] }
 0x372   : > { %4226 = vmatpush.msrb.mxu0 %v3867_v11  ;;  %v3598_v52 = vrot.slane %v3597_v22, 1  ;;  %4347 = vmatpush.msrb.mxu3 %v4286_v31  ;;  %v4275_v31 = vld [vmem:[%s6757_s23 + $0x80] sm:$0xff] }
 0x373   : > { %4328 = vmatpush.msrb.mxu2 %v4269_v62  ;;  %v4293_v62 = vld [vmem:[%s6757_s23 + $0x110] sm:$0xff] }
 0x374   : > { %4227 = vmatpush.msrb.mxu0 %v3866_v14  ;;  %v3599_v61 = vadd.f32 %v3598_v52, %v3597_v22  ;;  %v4306_v14 = vld [vmem:[%s6757_s23 + $0x178] sm:$0xff]  ;;  %v4305_v22 = vld [vmem:[%s6757_s23 + $0x170] sm:$0xff]  ;;  %v4268_v52 = vld [vmem:[%s6757_s23 + $0x48] sm:$0xff] }
 0x375   : > { %4363 = vmatpush.msra.mxu1 %v4306_v14  ;;  %4329 = vmatpush.msrb.mxu2 %v4268_v52  ;;  %v4295_v14 = vld [vmem:[%s6757_s23 + $0x120] sm:$0xff]  ;;  %v4308_v52 = vld [vmem:[%s6757_s23 + $0x188] sm:$0xff] }
 0x376   : > { %4228 = vmatpush.msrb.mxu0 %v3865_v50  ;;  %v3613_v34 = vmul.f32 %v3599_v61, %v6241_v41  ;;  %v4285_v50 = vld [vmem:[%s6757_s23 + $0xd0] sm:$0xff] }
 0x377   : > { %4348 = vmatpush.msrb.mxu3 %v4285_v50  ;;  %4364 = vmatpush.msra.mxu1 %v4305_v22  ;;  %v4321_v61 = vld [vmem:[%s6757_s23 + $0x1f0] sm:$0xff]  ;;  %v4310_v50 = vld [vmem:[%s6757_s23 + $0x198] sm:$0xff]  ;;  %v4292_v22 = vld [vmem:[%s6757_s23 + $0x108] sm:$0xff] }
 0x378   : > { %4229 = vmatpush.msrb.mxu0 %v3864_v27  ;;  %v3621_v39 = vadd.f32 1e-05, %v3613_v34  ;;  %v4283_v34 = vld [vmem:[%s6757_s23 + $0xc0] sm:$0xff] }
 0x379   : > { %v3406_v57 = vpop.f32.mrf.mxu0 }
 0x37a   : > { %v3407_v30 = vadd.f32 %v3406_v57, %v3387_v6  ;;  %4230 = vmatpush.msrb.mxu0 %v3863_v59  ;;  %v3426_v18 = vpop.f32.mrf.mxu1  ;;  %4619 = vrsqrt.f32 %v3621_v39  ;;  %vm3689_vm5 = vweird.f32 %v3621_v39  ;;  %v4284_v57 = vld [vmem:[%s6757_s23 + $0xc8] sm:$0xff] }
 0x37b   : > { %v4304_v59 = vld [vmem:[%s6757_s23 + $0x168] sm:$0xff]  ;;  %4349 = vmatpush.msrb.mxu3 %v4284_v57 }
 0x37c   : > { %4231 = vmatpush.msrb.mxu0 %v3862_v28  ;;  %v3427_v53 = vadd.f32 %v3426_v18, %v3407_v30  ;;  %4365 = vmatpush.msra.mxu1 %v4304_v59  ;;  %v4267_v18 = vld [vmem:[%s6757_s23 + $0x40] sm:$0xff] }
 0x37d   : > { %4330 = vmatpush.msrb.mxu2 %v4267_v18  ;;  %4350 = vmatpush.msrb.mxu3 %v4283_v34  ;;  %v4642_v18 = vld [vmem:[%s6490_s16] sm:$0xff] }
 0x37e   : > { %4232 = vmatpush.msrb.mxu0 %v3861_v35  ;;  %v4303_v35 = vld [vmem:[%s6757_s23 + $0x160] sm:$0xff]  ;;  %v3720_v34 = vperm.slane %v4642_v18, 7 }
 0x37f   : > { %4366 = vmatpush.msra.mxu1 %v4303_v35 }
 0x380   : > { %4233 = vmatpush.msrb.mxu0 %v3860_v21  ;;  %v4620_v20 = vpop.eup %4619  ;;  %v4282_v21 = vld [vmem:[%s6757_s23 + $0xb8] sm:$0xff] }
 0x381   : > { %v3446_v40 = vpop.f32.mrf.mxu2  ;;  %v3684_v49 = vmul.f32 %v4620_v20, %v3621_v39  ;;  %vm3690_vm4 = vweird.f32 %v4620_v20  ;;  %4351 = vmatpush.msrb.mxu3 %v4282_v21 }
 0x382   : > { %v3447_v29 = vadd.f32 %v3446_v40, %v3427_v53  ;;  %v3466_v38 = vpop.f32.mrf.mxu3  ;;  %4234 = vmatpush.msrb.mxu0 %v3859_v36  ;;  %vm3691_vm6 = vmor %vm3689_vm5, %vm3690_vm4  ;;  %v4320_v53 = vld [vmem:[%s6757_s23 + $0x1e8] sm:$0xff]  ;;  %v4266_v40 = vld [vmem:[%s6757_s23 + $0x38] sm:$0xff] }
 0x383   : > { %v3685_v19 = vmul.f32 %v4620_v20, %v3684_v49  ;;  %4331 = vmatpush.msrb.mxu2 %v4266_v40  ;;  %v4318_v49 = vld [vmem:[%s6757_s23 + $0x1d8] sm:$0xff] }
 0x384   : > { %v6749_v56 = vadd.f32 %v3466_v38, %v3447_v29  ;;  %v4302_v29 = vld [vmem:[%s6757_s23 + $0x158] sm:$0xff]  ;;  %v4319_v38 = vld [vmem:[%s6757_s23 + $0x1e0] sm:$0xff] }
 0x385   : > { %v3686_v26 = vmul.f32 0.5, %v3685_v19  ;;  %4367 = vmatpush.msra.mxu1 %v4302_v29  ;;  %v4300_v19 = vld [vmem:[%s6757_s23 + $0x148] sm:$0xff] }
 0x386   : > { %v3476_v15 = vmax.f32 %v6749_v56, 0.0  ;;  %v4265_v56 = vld [vmem:[%s6757_s23 + $0x30] sm:$0xff] }
 0x387   : > { %v3687_v25 = vsub.f32 1.5, %v3686_v26  ;;  %4332 = vmatpush.msrb.mxu2 %v4265_v56  ;;  %v4299_v26 = vld [vmem:[%s6757_s23 + $0x140] sm:$0xff] }
 0x388   : > { %v3520_v9 = vsel %vm3519_vm3, %v3476_v15, 0.0 }
 0x389   : > { %v3521_v24 = vrot.slane %v3520_v9, 4  ;;  %v3688_v0 = vmul.f32 %v4620_v20, %v3687_v25  ;;  %v4298_v25 = vld [vmem:[%s6757_s23 + $0x138] sm:$0xff] }
 0x38b   : > { %v3522_v42 = vadd.f32 %v3521_v24, %v3520_v9  ;;  %v3692_v44 = vsel %vm3691_vm6, %v4620_v20, %v3688_v0  ;;  %v4301_v20 = vld [vmem:[%s6757_s23 + $0x150] sm:$0xff]  ;;  %v4264_v24 = vld [vmem:[%s6757_s23 + $0x28] sm:$0xff] }
 0x38c   : > { %v3709_v16 = vmul.f32 %v3692_v44, %v6732_v47  ;;  %v4322_v47 = vld [vmem:[%s6757_s23 + $0x1f8] sm:$0xff]  ;;  %4368 = vmatpush.msra.mxu1 %v4301_v20  ;;  %4333 = vmatpush.msrb.mxu2 %v4264_v24  ;;  %v4297_v0 = vld [vmem:[%s6757_s23 + $0x130] sm:$0xff] }
 0x38d   : > { %v3523_v58 = vrot.slane %v3522_v42, 2  ;;  %4383 = vmatpush.msra.mxu0 %v4322_v47  ;;  %v4291_v47 = vld [vmem:[%s6757_s23 + $0x100] sm:$0xff] }
 0x38e   : > { %v3735_v27 = vmul.f32 %v3719_v10, %v3709_v16  ;;  %4369 = vmatpush.msra.mxu1 %v4300_v19  ;;  %4334 = vmatpush.msrb.mxu2 %v4263_v43  ;;  %v4276_v10 = vld [vmem:[%s6757_s23 + $0x88] sm:$0xff] }
 0x38f   : > { %v3524_v45 = vadd.f32 %v3523_v58, %v3522_v42  ;;  %4384 = vmatpush.msra.mxu0 %v4321_v61  ;;  %v4312_v16 = vld [vmem:[%s6757_s23 + $0x1a8] sm:$0xff] }
 0x390   : > { %v3761_v30 = vadd.f32 %v3745_v54, %v3735_v27  ;;  %4370 = vmatpush.msra.mxu1 %v4299_v26  ;;  %4335 = vmatpush.msrb.mxu2 %v4262_v13  ;;  %v4309_v27 = vld [vmem:[%s6757_s23 + $0x190] sm:$0xff] }
 0x391   : > { %v3525_v5 = vrot.slane %v3524_v45, 1  ;;  %4385 = vmatpush.msra.mxu0 %v4320_v53 }
 0x392   : > { %4235 = vmatmul.f32.vlgmr.msrb.gmra.mxu0 %v3761_v30  ;;  %4371 = vmatpush.msra.mxu1 %v4298_v25 }
 0x393   : > { %v3526_v11 = vadd.f32 %v3525_v5, %v3524_v45  ;;  %4386 = vmatpush.msra.mxu0 %v4319_v38  ;;  %4336 = vmatpush.msrb.mxu2 %v4261_v63 }
 0x394   : > { %4372 = vmatpush.msra.mxu1 %v4297_v0 }
 0x395   : > { %v3541_v33 = vmul.f32 %v6241_v41, %v3526_v11  ;;  %4387 = vmatpush.msra.mxu0 %v4318_v49  ;;  %4337 = vmatpush.msrb.mxu2 %v4260_v8  ;;  %v4313_v11 = vld [vmem:[%s6757_s23 + $0x1b0] sm:$0xff] }
 0x396   : > { %4373 = vmatpush.msra.mxu1 %v4296_v37 }
 0x397   : > { %v6783_v6 = vsub.f32 %v3476_v15, %v3541_v33  ;;  %v4281_v15 = vld [vmem:[%s6757_s23 + $0xb0] sm:$0xff]  ;;  %4388 = vmatpush.msra.mxu0 %v4317_v17  ;;  %4338 = vmatpush.msrb.mxu2 %v4259_v32  ;;  %v4294_v33 = vld [vmem:[%s6757_s23 + $0x118] sm:$0xff] }
 0x398   : > { %4352 = vmatpush.msrb.mxu3 %v4281_v15  ;;  %4374 = vmatpush.msra.mxu1 %v4295_v14 }
 0x399   : > { %v3557_v28 = vmul.f32 %v6783_v6, %v6783_v6  ;;  %4389 = vmatpush.msra.mxu0 %v4316_v48  ;;  %4339 = vmatmul.f32.vlgmr.msrb.gmra.mxu2 %v4860_v1  ;;  %v4307_v1 = vld [vmem:[%s6757_s23 + $0x180] sm:$0xff] }
 0x39a   : > { %4353 = vmatpush.msrb.mxu3 %v4280_v12  ;;  %4375 = vmatpush.msra.mxu1 %v4294_v33 }
 0x39b   : > { %v3600_v39 = vsel %vm3519_vm3, %v3557_v28, 0.0  ;;  %4390 = vmatpush.msra.mxu0 %v4315_v60 }
 0x39c   : > { %v3601_v36 = vrot.slane %v3600_v39, 4  ;;  %4354 = vmatpush.msrb.mxu3 %v4279_v51  ;;  %4376 = vmatpush.msra.mxu1 %v4293_v62 }
 0x39d   : > { %4391 = vmatpush.msra.mxu0 %v4314_v7 }
 0x39e   : > { %v3602_v9 = vadd.f32 %v3601_v36, %v3600_v39  ;;  %4355 = vmatpush.msrb.mxu3 %v4278_v23  ;;  %4377 = vmatpush.msra.mxu1 %v4292_v22  ;;  %v3746_v39 = vperm.slane %v6550_v55, 7 }
 0x39f   : > { %4392 = vmatpush.msra.mxu0 %v4313_v11 }
 0x3a0   : > { %v3603_v42 = vrot.slane %v3602_v9, 2  ;;  %4356 = vmatpush.msrb.mxu3 %v4277_v46  ;;  %4378 = vmatpush.msra.mxu1 %v4291_v47 }
 0x3a1   : > { %4393 = vmatpush.msra.mxu0 %v4312_v16 }
 0x3a2   : > { %v3604_v58 = vadd.f32 %v3603_v42, %v3602_v9  ;;  %4357 = vmatpush.msrb.mxu3 %v4276_v10 }
 0x3a4   : > { %v3605_v45 = vrot.slane %v3604_v58, 1  ;;  %4358 = vmatpush.msrb.mxu3 %v4275_v31 }
 0x3a5   : > { %4359 = vmatmul.f32.vlgmr.msrb.gmra.mxu3 %v4862_v2 }
 0x3a6   : > { %v3606_v5 = vadd.f32 %v3605_v45, %v3604_v58 }
 0x3a8   : > { %v3614_v44 = vmul.f32 %v3606_v5, %v6241_v41  ;;  %v4311_v41 = vld [vmem:[%s6757_s23 + $0x1a0] sm:$0xff] }
 0x3a9   : > { %4394 = vmatpush.msra.mxu0 %v4311_v41 }
 0x3aa   : > { %v3622_v54 = vadd.f32 1e-05, %v3614_v44  ;;  %v4604_v44 = vld [vmem:[%s542_s25] ss:$0 sm:$0xff] }
 0x3ab   : > { %4395 = vmatpush.msra.mxu0 %v4310_v50 }
 0x3ac   : > { %4621 = vrsqrt.f32 %v3622_v54  ;;  %vm3699_vm8 = vweird.f32 %v3622_v54 }
 0x3ad   : > { %4396 = vmatpush.msra.mxu0 %v4309_v27 }
 0x3af   : > { %4397 = vmatpush.msra.mxu0 %v4308_v52 }
 0x3b1   : > { %4398 = vmatpush.msra.mxu0 %v4307_v1 }
 0x3b2   : > { %v4622_v57 = vpop.eup %4621  ;;  %4399 = vmatmul.f32.vlgmr.msra.gmra.mxu0 %v4866_v4 }
 0x3b3   : > { %v3694_v59 = vmul.f32 %v4622_v57, %v3622_v54  ;;  %vm3700_vm7 = vweird.f32 %v4622_v57 }
 0x3b4   : > { %vm3701_vm9 = vmor %vm3699_vm8, %vm3700_vm7 }
 0x3b5   : > { %v3695_v30 = vmul.f32 %v4622_v57, %v3694_v59 }
 0x3b7   : > { %v3696_v2 = vmul.f32 0.5, %v3695_v30 }
 0x3b8   : > { %v3993_v29 = vpop.f32.mrf.mxu0 }
 0x3b9   : > { %v3697_v61 = vsub.f32 1.5, %v3696_v2 }
 0x3ba   : > { %v4013_v4 = vpop.f32.mrf.mxu1  ;;  %v4053_v56 = vpop.f32.mrf.mxu3 }
 0x3bb   : > { %v3698_v28 = vmul.f32 %v4622_v57, %v3697_v61  ;;  %v4014_v36 = vadd.f32 %v4013_v4, %v3993_v29  ;;  %v4033_v38 = vpop.f32.mrf.mxu2 }
 0x3bd   : > { %v3702_v35 = vsel %vm3701_vm9, %v4622_v57, %v3698_v28  ;;  %v4034_v15 = vadd.f32 %v4033_v38, %v4014_v36 }
 0x3be   : > { %v3710_v53 = vmul.f32 %v3702_v35, %v6783_v6 }
 0x3bf   : > { %v4054_v20 = vadd.f32 %v4053_v56, %v4034_v15 }
 0x3c0   : > { %v3736_v40 = vmul.f32 %v3720_v34, %v3710_v53 }
 0x3c1   : > { %v4073_v6 = vpop.f32.mrf.mxu0 }
 0x3c2   : > { %v3762_v21 = vadd.f32 %v3746_v39, %v3736_v40  ;;  %v4074_v24 = vadd.f32 %v4073_v6, %v4054_v20 }
 0x3c3   : > { %v4093_v9 = vpop.f32.mrf.mxu1 }
 0x3c4   : > { %4587 = vmatmul.msk.f32.vlgmr.msrb.gmra.mxu1 %vm3519_vm3, %v3762_v21  ;;  %v4094_v12 = vadd.f32 %v4093_v9, %v4074_v24 }
 0x3c5   : > { %v4116_v55 = vpop.f32.mrf.mxu2  ;;  %v4136_v49 = vpop.f32.mrf.mxu3 }
 0x3c6   : > { %v4117_v51 = vadd.f32 %v4116_v55, %v4094_v12 }
 0x3c8   : > { %v4137_v26 = vadd.f32 %v4136_v49, %v4117_v51 }
 0x3cc   : > { %4379 = vmatmul.f32.vlgmr.msra.gmra.mxu1 %v4864_v3 }
 0x3df   : > { %v4156_v19 = vpop.f32.mrf.mxu0 }
 0x3e0   : > { %v4176_v42 = vpop.f32.mrf.mxu1  ;;  %v4157_v48 = vadd.f32 %v4156_v19, %v4137_v26 }
 0x3e2   : > { %v4177_v25 = vadd.f32 %v4176_v42, %v4157_v48 }
 0x3e6   : > { %v4196_v17 = vpop.f32.mrf.mxu2 }
 0x3e7   : > { %v4197_v60 = vadd.f32 %v4196_v17, %v4177_v25 }
 0x3ec   : > { %v4216_v43 = vpop.f32.mrf.mxu3 }
 0x3ed   : > { %v4217_v0 = vadd.f32 %v4216_v43, %v4197_v60 }
 0x40f   : > { %v4236_v3 = vpop.f32.mrf.mxu0 }
 0x410   : > { %v4237_v7 = vadd.f32 %v4236_v3, %v4217_v0 }
 0x41c   : > { %v4340_v13 = vpop.f32.mrf.mxu2 }
 0x428   : > { %v4360_v23 = vpop.f32.mrf.mxu3 }
 0x429   : > { %v4361_v45 = vadd.f32 %v4360_v23, %v4340_v13 }
 0x42f   : > { %v4400_v46 = vpop.f32.mrf.mxu0 }
 0x441   : > { %v4256_v58 = vpop.f32.mrf.mxu1 }
 0x442   : > { %v4257_v10 = vadd.f32 %v4256_v58, %v4237_v7 }
 0x449   : > { %v4380_v63 = vpop.f32.mrf.mxu1 }
 0x44a   : > { %v4381_v5 = vadd.f32 %v4380_v63, %v4361_v45 }
 0x44c   : > { %v4401_v8 = vadd.f32 %v4400_v46, %v4381_v5 }
 0x44e   : > { %v4403_v37 = vperm.slane %v4401_v8, 0 }
 0x450   : > { %v4404_v11 = vadd.f32 %v4403_v37, %v4257_v10 }
 0x452   : > { %v4409_v32 = vadd.f32 %v4604_v44, %v4404_v11 }
 0x454   : > { %4411 = vst.msk [vmem:[%s546_s30] sm:$0xff] %vm4410_vm10, %v4409_v32 }
 0x455 PF: > { %s21_s17 = sadd.s32 1, %s4649_s17  }
 0x456   : > { %p18_p4 = scmp.ge.s32.totalorder %s21_s17, 4  }
 0x458   :  { %20 = sbr.rel (!%p18_p4) target bundleno = 1 (0x1), region = 121 }

</bundles_post_ra>
